<compile_context>
chip_gen: v5e
topology: v5e:2x2
jax: 0.10.0
libtpu: 0.0.40
codegen_flags: <defaults>
</compile_context>

<pallas_src>
import functools

import jax
import jax.numpy as jnp
from jax.experimental import pallas as pl
from jax.experimental.pallas import tpu as pltpu


def _convlstm_kernel(x_ref, w_ref, b_ref, c_ref, h_out_ref, c_out_ref, *,
                     HID, H, W, KH, KW):
    # x_ref:     (1, CIN_PAD, LANES_PAD) bf16  row-padded combined [x, h] slab
    # w_ref:     (KH*KW, 4*HID, CIN_PAD) bf16  per-tap packed conv weight
    # b_ref:     (4*HID, 1)              f32   conv bias
    # c_ref:     (1, HID, HW)            f32   current cell state
    # h_out_ref: (1, HID, HW)            f32   next hidden state
    # c_out_ref: (1, HID, HW)            f32   next cell state
    HW = H * W
    pw = KW // 2

    xp = x_ref[0]                                   # (CIN_PAD, LANES_PAD) bf16

    # x-coordinate of every output lane, built once (1, HW).
    xx = jax.lax.broadcasted_iota(jnp.int32, (1, HW), 1) % W

    # Accumulator lives in vregs; seed it with the broadcast bias.
    acc = jnp.broadcast_to(b_ref[...], (4 * HID, HW)).astype(jnp.float32)

    # 9 accumulating MXU matmuls: (4*HID, CIN_PAD) @ (CIN_PAD, HW).
    # Each tap is a contiguous static lane slice of the row-padded slab;
    # off = dy*W + dx because rows are pre-padded by ph and lanes by pw.
    for dy in range(KH):
        for dx in range(KW):
            ox = dx - pw
            off = dy * W + dx
            tap = xp[:, off:off + HW]               # (CIN_PAD, HW) bf16
            if ox != 0:
                valid = jnp.logical_and(xx + ox >= 0, xx + ox < W)
                tap = jnp.where(valid, tap, 0)      # SAME padding along W
            acc = acc + jnp.dot(w_ref[dy * KW + dx], tap,
                                preferred_element_type=jnp.float32)

    # Gate extraction = aligned sublane slices of the f32 pre-activation.
    i = jax.nn.sigmoid(acc[0 * HID:1 * HID, :])
    f = jax.nn.sigmoid(acc[1 * HID:2 * HID, :])
    o = jax.nn.sigmoid(acc[2 * HID:3 * HID, :])
    g = jnp.tanh(acc[3 * HID:4 * HID, :])

    c_cur = c_ref[0]                                # (HID, HW) f32
    c_next = f * c_cur + i * g
    h_next = o * jnp.tanh(c_next)

    c_out_ref[0] = c_next.astype(c_out_ref.dtype)
    h_out_ref[0] = h_next.astype(h_out_ref.dtype)


@functools.partial(jax.jit, static_argnames=("kernel_size",))
def conv_lstm_cell_forward(x_nchw, h_nchw, c_nchw, weight_oihw, bias, *,
                           kernel_size):
    """Equivalent of ConvLSTMCell.forward(input_tensor, (h_cur, c_cur))."""
    KH, KW = kernel_size
    ph, pw = KH // 2, KW // 2
    B, cin_x, H, W = x_nchw.shape
    HID = h_nchw.shape[1]
    CIN = cin_x + HID
    HW = H * W

    # Pad the per-tap contraction to a multiple of the bf16 sublane tile (16).
    CIN_PAD = -(-CIN // 16) * 16
    # Flattened lane axis: pw zeros | (ph zero rows, H rows, ph zero rows)*W |
    # pw zeros, rounded up to a multiple of 128 lanes.
    lanes = 2 * pw + (H + 2 * ph) * W
    LANES_PAD = -(-lanes // 128) * 128

    # ---- wrapper-side layout prep (plain XLA, fused under jit) -------------
    combined = jnp.concatenate([x_nchw, h_nchw], axis=1)        # (B, CIN, H, W)
    combined = jnp.pad(combined, ((0, 0), (0, 0), (ph, ph), (0, 0)))
    slab = combined.reshape(B, CIN, (H + 2 * ph) * W)
    slab = jnp.pad(slab, ((0, 0), (0, CIN_PAD - CIN),
                          (pw, LANES_PAD - (H + 2 * ph) * W - pw)))
    slab = slab.astype(jnp.bfloat16)                # (B, CIN_PAD, LANES_PAD)

    # PyTorch Conv2d weight (O, I, KH, KW) -> (KH*KW, O, CIN_PAD), bf16.
    w_taps = jnp.transpose(weight_oihw, (2, 3, 0, 1)).reshape(KH * KW,
                                                              4 * HID, CIN)
    w_taps = jnp.pad(w_taps, ((0, 0), (0, 0), (0, CIN_PAD - CIN)))
    w_taps = w_taps.astype(jnp.bfloat16)

    b_col = bias.reshape(4 * HID, 1).astype(jnp.float32)
    c_flat = c_nchw.reshape(B, HID, HW).astype(jnp.float32)

    kernel = functools.partial(_convlstm_kernel, HID=HID, H=H, W=W,
                               KH=KH, KW=KW)

    h_next, c_next = pl.pallas_call(
        kernel,
        out_shape=(jax.ShapeDtypeStruct((B, HID, HW), jnp.float32),
                   jax.ShapeDtypeStruct((B, HID, HW), jnp.float32)),
        grid_spec=pltpu.PrefetchScalarGridSpec(
            num_scalar_prefetch=0,
            grid=(B,),
            in_specs=[
                pl.BlockSpec((1, CIN_PAD, LANES_PAD), lambda b: (b, 0, 0)),
                pl.BlockSpec((KH * KW, 4 * HID, CIN_PAD), lambda b: (0, 0, 0)),
                pl.BlockSpec((4 * HID, 1), lambda b: (0, 0)),
                pl.BlockSpec((1, HID, HW), lambda b: (b, 0, 0)),
            ],
            out_specs=[
                pl.BlockSpec((1, HID, HW), lambda b: (b, 0, 0)),
                pl.BlockSpec((1, HID, HW), lambda b: (b, 0, 0)),
            ],
        ),
        compiler_params=pltpu.CompilerParams(
            dimension_semantics=("parallel",)),
    )(slab, w_taps, b_col, c_flat)

    # Flattened NCHW -> NCHW (pure reshape, no transpose).
    return h_next.reshape(B, HID, H, W), c_next.reshape(B, HID, H, W)


def _reference(x, h, c, w_oihw, bias, kernel_size):
    """Pure-JAX f32 reference identical to the PyTorch forward (NCHW)."""
    KH, KW = kernel_size
    ph, pw = KH // 2, KW // 2
    combined = jnp.concatenate([x, h], axis=1)
    conv = jax.lax.conv_general_dilated(
        combined, w_oihw, window_strides=(1, 1),
        padding=((ph, ph), (pw, pw)),
        dimension_numbers=("NCHW", "OIHW", "NCHW"))
    conv = conv + bias[None, :, None, None]
    cc_i, cc_f, cc_o, cc_g = jnp.split(conv, 4, axis=1)
    i = jax.nn.sigmoid(cc_i)
    f = jax.nn.sigmoid(cc_f)
    o = jax.nn.sigmoid(cc_o)
    g = jnp.tanh(cc_g)
    c_next = f * c + i * g
    h_next = o * jnp.tanh(c_next)
    return h_next, c_next


if __name__ == "__main__":
    # Module config: ConvLSTMCell(input_dim=4, hidden_dim=32, kernel_size=(3,3), bias=True)
    INPUT_DIM, HIDDEN_DIM = 4, 32
    KERNEL_SIZE = (3, 3)
    B, H, W = 2, 16, 16

    key = jax.random.PRNGKey(0)
    kx, kh, kc, kw_, kb = jax.random.split(key, 5)

    x = jax.random.normal(kx, (B, INPUT_DIM, H, W), dtype=jnp.float32)
    h_cur = jax.random.normal(kh, (B, HIDDEN_DIM, H, W), dtype=jnp.float32)
    c_cur = jax.random.normal(kc, (B, HIDDEN_DIM, H, W), dtype=jnp.float32)

    # Deterministic synthetic conv params (PyTorch Conv2d shapes).
    cin_total = INPUT_DIM + HIDDEN_DIM
    weight = 0.05 * jax.random.normal(
        kw_, (4 * HIDDEN_DIM, cin_total, KERNEL_SIZE[0], KERNEL_SIZE[1]),
        dtype=jnp.float32)
    bias = 0.05 * jax.random.normal(kb, (4 * HIDDEN_DIM,), dtype=jnp.float32)

    h_next, c_next = conv_lstm_cell_forward(x, h_cur, c_cur, weight, bias,
                                            kernel_size=KERNEL_SIZE)
    jax.block_until_ready((h_next, c_next))

    h_exp, c_exp = _reference(x, h_cur, c_cur, weight, bias, KERNEL_SIZE)
    assert h_next.shape == (B, HIDDEN_DIM, H, W)
    assert c_next.shape == (B, HIDDEN_DIM, H, W)
    # bf16 matmul operands (f32 accumulation / gates) -> relaxed tolerance.
    assert jnp.allclose(h_next, h_exp, atol=2e-2, rtol=2e-2)
    assert jnp.allclose(c_next, c_exp, atol=2e-2, rtol=2e-2)

    print("KERNEL_OK")
</pallas_src>

<mosaic_0001>
module attributes {stable_mosaic.version = 11 : i64} {
  func.func @_convlstm_kernel(%arg0: i32, %arg1: memref<1x48x384xbf16, #tpu.memory_space<vmem>>, %arg2: memref<9x128x48xbf16, #tpu.memory_space<vmem>>, %arg3: memref<128x1xf32, #tpu.memory_space<vmem>>, %arg4: memref<1x32x256xf32, #tpu.memory_space<vmem>>, %arg5: memref<1x32x256xf32, #tpu.memory_space<vmem>>, %arg6: memref<1x32x256xf32, #tpu.memory_space<vmem>>) attributes {dimension_semantics = [#tpu.dimension_semantics<parallel>], iteration_bounds = array<i64: 2>, scalar_prefetch = 0 : i64, scratch_operands = 0 : i64, tpu.core_type = #tpu.core_type<tc>, window_params = [{transform_indices = @transform_0, window_bounds = array<i64: 1, 48, 384>}, {pipeline_mode = #tpu.pipeline_mode<synchronous>, transform_indices = @transform_1, window_bounds = array<i64: 9, 128, 48>}, {pipeline_mode = #tpu.pipeline_mode<synchronous>, transform_indices = @transform_2, window_bounds = array<i64: 128, 1>}, {transform_indices = @transform_3, window_bounds = array<i64: 1, 32, 256>}, {transform_indices = @transform_4, window_bounds = array<i64: 1, 32, 256>}, {transform_indices = @transform_5, window_bounds = array<i64: 1, 32, 256>}]} {
    %c0 = arith.constant 0 : index
    %c0_0 = arith.constant 0 : index
    %c0_1 = arith.constant 0 : index
    %0 = vector.load %arg1[%c0, %c0_0, %c0_1] : memref<1x48x384xbf16, #tpu.memory_space<vmem>>, vector<1x48x384xbf16>
    %1 = vector.shape_cast %0 : vector<1x48x384xbf16> to vector<48x384xbf16>
    %2 = tpu.iota {dimensions = array<i32: 1>} : vector<1x256xi32>
    %c16_i32 = arith.constant 16 : i32
    %c0_i32 = arith.constant 0 : i32
    %3 = arith.cmpi eq, %c16_i32, %c0_i32 : i32
    %c1_i32 = arith.constant 1 : i32
    %4 = arith.select %3, %c1_i32, %c16_i32 : i32
    %5 = vector.broadcast %4 : i32 to vector<1x256xi32>
    %6 = arith.remsi %2, %5 : vector<1x256xi32>
    %c0_i32_2 = arith.constant 0 : i32
    %7 = vector.broadcast %c0_i32_2 : i32 to vector<1x256xi32>
    %8 = arith.cmpi ne, %6, %7 : vector<1x256xi32>
    %c0_i32_3 = arith.constant 0 : i32
    %9 = vector.broadcast %c0_i32_3 : i32 to vector<1x256xi32>
    %10 = arith.cmpi slt, %6, %9 : vector<1x256xi32>
    %c0_i32_4 = arith.constant 0 : i32
    %11 = arith.cmpi slt, %4, %c0_i32_4 : i32
    %12 = vector.broadcast %11 : i1 to vector<1x256xi1>
    %13 = vector.broadcast %12 : vector<1x256xi1> to vector<1x256xi1>
    %14 = arith.xori %10, %13 : vector<1x256xi1>
    %15 = arith.andi %14, %8 : vector<1x256xi1>
    %16 = vector.broadcast %4 : i32 to vector<1x256xi32>
    %17 = arith.addi %6, %16 : vector<1x256xi32>
    %18 = arith.select %15, %17, %6 : vector<1x256xi1>, vector<1x256xi32>
    %c0_5 = arith.constant 0 : index
    %c0_6 = arith.constant 0 : index
    %19 = vector.load %arg3[%c0_5, %c0_6] : memref<128x1xf32, #tpu.memory_space<vmem>>, vector<128x1xf32>
    %20 = vector.shape_cast %19 : vector<128x1xf32> to vector<128x1xf32>
    %21 = vector.broadcast %20 : vector<128x1xf32> to vector<128x256xf32>
    %22 = vector.extract_strided_slice %1 {offsets = [0, 0], sizes = [48, 256], strides = [1, 1]} : vector<48x384xbf16> to vector<48x256xbf16>
    %c-1_i32 = arith.constant -1 : i32
    %23 = vector.broadcast %c-1_i32 : i32 to vector<1x256xi32>
    %24 = arith.addi %18, %23 : vector<1x256xi32>
    %c0_i32_7 = arith.constant 0 : i32
    %25 = vector.broadcast %c0_i32_7 : i32 to vector<1x256xi32>
    %26 = arith.cmpi sge, %24, %25 : vector<1x256xi32>
    %c-1_i32_8 = arith.constant -1 : i32
    %27 = vector.broadcast %c-1_i32_8 : i32 to vector<1x256xi32>
    %28 = arith.addi %18, %27 : vector<1x256xi32>
    %c16_i32_9 = arith.constant 16 : i32
    %29 = vector.broadcast %c16_i32_9 : i32 to vector<1x256xi32>
    %30 = arith.cmpi slt, %28, %29 : vector<1x256xi32>
    %31 = arith.andi %26, %30 : vector<1x256xi1>
    %c0_i32_10 = arith.constant 0 : i32
    %32 = arith.sitofp %c0_i32_10 : i32 to bf16
    %33 = vector.shape_cast %31 : vector<1x256xi1> to vector<1x256xi1>
    %34 = vector.broadcast %33 : vector<1x256xi1> to vector<48x256xi1>
    %35 = vector.broadcast %32 : bf16 to vector<48x256xbf16>
    %36 = arith.select %34, %22, %35 : vector<48x256xi1>, vector<48x256xbf16>
    %c0_11 = arith.constant 0 : index
    %c0_12 = arith.constant 0 : index
    %c0_13 = arith.constant 0 : index
    %37 = vector.load %arg2[%c0_11, %c0_12, %c0_13] : memref<9x128x48xbf16, #tpu.memory_space<vmem>>, vector<1x128x48xbf16>
    %38 = vector.shape_cast %37 : vector<1x128x48xbf16> to vector<128x48xbf16>
    %cst = arith.constant dense<0.000000e+00> : vector<128x256xf32>
    %39 = tpu.matmul %38, %36, %cst {dimension_numbers = #tpu.dot_dimension_numbers<[1], [0], [0], [1], [0, 0, 1, 1], [], []>} : vector<128x48xbf16>, vector<48x256xbf16>, vector<128x256xf32> -> vector<128x256xf32>
    %40 = arith.addf %21, %39 : vector<128x256xf32>
    %41 = vector.extract_strided_slice %1 {offsets = [0, 1], sizes = [48, 256], strides = [1, 1]} : vector<48x384xbf16> to vector<48x256xbf16>
    %c1 = arith.constant 1 : index
    %c0_14 = arith.constant 0 : index
    %c0_15 = arith.constant 0 : index
    %42 = vector.load %arg2[%c1, %c0_14, %c0_15] : memref<9x128x48xbf16, #tpu.memory_space<vmem>>, vector<1x128x48xbf16>
    %43 = vector.shape_cast %42 : vector<1x128x48xbf16> to vector<128x48xbf16>
    %cst_16 = arith.constant dense<0.000000e+00> : vector<128x256xf32>
    %44 = tpu.matmul %43, %41, %cst_16 {dimension_numbers = #tpu.dot_dimension_numbers<[1], [0], [0], [1], [0, 0, 1, 1], [], []>} : vector<128x48xbf16>, vector<48x256xbf16>, vector<128x256xf32> -> vector<128x256xf32>
    %45 = arith.addf %40, %44 : vector<128x256xf32>
    %46 = vector.extract_strided_slice %1 {offsets = [0, 2], sizes = [48, 256], strides = [1, 1]} : vector<48x384xbf16> to vector<48x256xbf16>
    %c1_i32_17 = arith.constant 1 : i32
    %47 = vector.broadcast %c1_i32_17 : i32 to vector<1x256xi32>
    %48 = arith.addi %18, %47 : vector<1x256xi32>
    %c0_i32_18 = arith.constant 0 : i32
    %49 = vector.broadcast %c0_i32_18 : i32 to vector<1x256xi32>
    %50 = arith.cmpi sge, %48, %49 : vector<1x256xi32>
    %c1_i32_19 = arith.constant 1 : i32
    %51 = vector.broadcast %c1_i32_19 : i32 to vector<1x256xi32>
    %52 = arith.addi %18, %51 : vector<1x256xi32>
    %c16_i32_20 = arith.constant 16 : i32
    %53 = vector.broadcast %c16_i32_20 : i32 to vector<1x256xi32>
    %54 = arith.cmpi slt, %52, %53 : vector<1x256xi32>
    %55 = arith.andi %50, %54 : vector<1x256xi1>
    %c0_i32_21 = arith.constant 0 : i32
    %56 = arith.sitofp %c0_i32_21 : i32 to bf16
    %57 = vector.shape_cast %55 : vector<1x256xi1> to vector<1x256xi1>
    %58 = vector.broadcast %57 : vector<1x256xi1> to vector<48x256xi1>
    %59 = vector.broadcast %56 : bf16 to vector<48x256xbf16>
    %60 = arith.select %58, %46, %59 : vector<48x256xi1>, vector<48x256xbf16>
    %c2 = arith.constant 2 : index
    %c0_22 = arith.constant 0 : index
    %c0_23 = arith.constant 0 : index
    %61 = vector.load %arg2[%c2, %c0_22, %c0_23] : memref<9x128x48xbf16, #tpu.memory_space<vmem>>, vector<1x128x48xbf16>
    %62 = vector.shape_cast %61 : vector<1x128x48xbf16> to vector<128x48xbf16>
    %cst_24 = arith.constant dense<0.000000e+00> : vector<128x256xf32>
    %63 = tpu.matmul %62, %60, %cst_24 {dimension_numbers = #tpu.dot_dimension_numbers<[1], [0], [0], [1], [0, 0, 1, 1], [], []>} : vector<128x48xbf16>, vector<48x256xbf16>, vector<128x256xf32> -> vector<128x256xf32>
    %64 = arith.addf %45, %63 : vector<128x256xf32>
    %65 = vector.extract_strided_slice %1 {offsets = [0, 16], sizes = [48, 256], strides = [1, 1]} : vector<48x384xbf16> to vector<48x256xbf16>
    %c-1_i32_25 = arith.constant -1 : i32
    %66 = vector.broadcast %c-1_i32_25 : i32 to vector<1x256xi32>
    %67 = arith.addi %18, %66 : vector<1x256xi32>
    %c0_i32_26 = arith.constant 0 : i32
    %68 = vector.broadcast %c0_i32_26 : i32 to vector<1x256xi32>
    %69 = arith.cmpi sge, %67, %68 : vector<1x256xi32>
    %c-1_i32_27 = arith.constant -1 : i32
    %70 = vector.broadcast %c-1_i32_27 : i32 to vector<1x256xi32>
    %71 = arith.addi %18, %70 : vector<1x256xi32>
    %c16_i32_28 = arith.constant 16 : i32
    %72 = vector.broadcast %c16_i32_28 : i32 to vector<1x256xi32>
    %73 = arith.cmpi slt, %71, %72 : vector<1x256xi32>
    %74 = arith.andi %69, %73 : vector<1x256xi1>
    %c0_i32_29 = arith.constant 0 : i32
    %75 = arith.sitofp %c0_i32_29 : i32 to bf16
    %76 = vector.shape_cast %74 : vector<1x256xi1> to vector<1x256xi1>
    %77 = vector.broadcast %76 : vector<1x256xi1> to vector<48x256xi1>
    %78 = vector.broadcast %75 : bf16 to vector<48x256xbf16>
    %79 = arith.select %77, %65, %78 : vector<48x256xi1>, vector<48x256xbf16>
    %c3 = arith.constant 3 : index
    %c0_30 = arith.constant 0 : index
    %c0_31 = arith.constant 0 : index
    %80 = vector.load %arg2[%c3, %c0_30, %c0_31] : memref<9x128x48xbf16, #tpu.memory_space<vmem>>, vector<1x128x48xbf16>
    %81 = vector.shape_cast %80 : vector<1x128x48xbf16> to vector<128x48xbf16>
    %cst_32 = arith.constant dense<0.000000e+00> : vector<128x256xf32>
    %82 = tpu.matmul %81, %79, %cst_32 {dimension_numbers = #tpu.dot_dimension_numbers<[1], [0], [0], [1], [0, 0, 1, 1], [], []>} : vector<128x48xbf16>, vector<48x256xbf16>, vector<128x256xf32> -> vector<128x256xf32>
    %83 = arith.addf %64, %82 : vector<128x256xf32>
    %84 = vector.extract_strided_slice %1 {offsets = [0, 17], sizes = [48, 256], strides = [1, 1]} : vector<48x384xbf16> to vector<48x256xbf16>
    %c4 = arith.constant 4 : index
    %c0_33 = arith.constant 0 : index
    %c0_34 = arith.constant 0 : index
    %85 = vector.load %arg2[%c4, %c0_33, %c0_34] : memref<9x128x48xbf16, #tpu.memory_space<vmem>>, vector<1x128x48xbf16>
    %86 = vector.shape_cast %85 : vector<1x128x48xbf16> to vector<128x48xbf16>
    %cst_35 = arith.constant dense<0.000000e+00> : vector<128x256xf32>
    %87 = tpu.matmul %86, %84, %cst_35 {dimension_numbers = #tpu.dot_dimension_numbers<[1], [0], [0], [1], [0, 0, 1, 1], [], []>} : vector<128x48xbf16>, vector<48x256xbf16>, vector<128x256xf32> -> vector<128x256xf32>
    %88 = arith.addf %83, %87 : vector<128x256xf32>
    %89 = vector.extract_strided_slice %1 {offsets = [0, 18], sizes = [48, 256], strides = [1, 1]} : vector<48x384xbf16> to vector<48x256xbf16>
    %c1_i32_36 = arith.constant 1 : i32
    %90 = vector.broadcast %c1_i32_36 : i32 to vector<1x256xi32>
    %91 = arith.addi %18, %90 : vector<1x256xi32>
    %c0_i32_37 = arith.constant 0 : i32
    %92 = vector.broadcast %c0_i32_37 : i32 to vector<1x256xi32>
    %93 = arith.cmpi sge, %91, %92 : vector<1x256xi32>
    %c1_i32_38 = arith.constant 1 : i32
    %94 = vector.broadcast %c1_i32_38 : i32 to vector<1x256xi32>
    %95 = arith.addi %18, %94 : vector<1x256xi32>
    %c16_i32_39 = arith.constant 16 : i32
    %96 = vector.broadcast %c16_i32_39 : i32 to vector<1x256xi32>
    %97 = arith.cmpi slt, %95, %96 : vector<1x256xi32>
    %98 = arith.andi %93, %97 : vector<1x256xi1>
    %c0_i32_40 = arith.constant 0 : i32
    %99 = arith.sitofp %c0_i32_40 : i32 to bf16
    %100 = vector.shape_cast %98 : vector<1x256xi1> to vector<1x256xi1>
    %101 = vector.broadcast %100 : vector<1x256xi1> to vector<48x256xi1>
    %102 = vector.broadcast %99 : bf16 to vector<48x256xbf16>
    %103 = arith.select %101, %89, %102 : vector<48x256xi1>, vector<48x256xbf16>
    %c5 = arith.constant 5 : index
    %c0_41 = arith.constant 0 : index
    %c0_42 = arith.constant 0 : index
    %104 = vector.load %arg2[%c5, %c0_41, %c0_42] : memref<9x128x48xbf16, #tpu.memory_space<vmem>>, vector<1x128x48xbf16>
    %105 = vector.shape_cast %104 : vector<1x128x48xbf16> to vector<128x48xbf16>
    %cst_43 = arith.constant dense<0.000000e+00> : vector<128x256xf32>
    %106 = tpu.matmul %105, %103, %cst_43 {dimension_numbers = #tpu.dot_dimension_numbers<[1], [0], [0], [1], [0, 0, 1, 1], [], []>} : vector<128x48xbf16>, vector<48x256xbf16>, vector<128x256xf32> -> vector<128x256xf32>
    %107 = arith.addf %88, %106 : vector<128x256xf32>
    %108 = vector.extract_strided_slice %1 {offsets = [0, 32], sizes = [48, 256], strides = [1, 1]} : vector<48x384xbf16> to vector<48x256xbf16>
    %c-1_i32_44 = arith.constant -1 : i32
    %109 = vector.broadcast %c-1_i32_44 : i32 to vector<1x256xi32>
    %110 = arith.addi %18, %109 : vector<1x256xi32>
    %c0_i32_45 = arith.constant 0 : i32
    %111 = vector.broadcast %c0_i32_45 : i32 to vector<1x256xi32>
    %112 = arith.cmpi sge, %110, %111 : vector<1x256xi32>
    %c-1_i32_46 = arith.constant -1 : i32
    %113 = vector.broadcast %c-1_i32_46 : i32 to vector<1x256xi32>
    %114 = arith.addi %18, %113 : vector<1x256xi32>
    %c16_i32_47 = arith.constant 16 : i32
    %115 = vector.broadcast %c16_i32_47 : i32 to vector<1x256xi32>
    %116 = arith.cmpi slt, %114, %115 : vector<1x256xi32>
    %117 = arith.andi %112, %116 : vector<1x256xi1>
    %c0_i32_48 = arith.constant 0 : i32
    %118 = arith.sitofp %c0_i32_48 : i32 to bf16
    %119 = vector.shape_cast %117 : vector<1x256xi1> to vector<1x256xi1>
    %120 = vector.broadcast %119 : vector<1x256xi1> to vector<48x256xi1>
    %121 = vector.broadcast %118 : bf16 to vector<48x256xbf16>
    %122 = arith.select %120, %108, %121 : vector<48x256xi1>, vector<48x256xbf16>
    %c6 = arith.constant 6 : index
    %c0_49 = arith.constant 0 : index
    %c0_50 = arith.constant 0 : index
    %123 = vector.load %arg2[%c6, %c0_49, %c0_50] : memref<9x128x48xbf16, #tpu.memory_space<vmem>>, vector<1x128x48xbf16>
    %124 = vector.shape_cast %123 : vector<1x128x48xbf16> to vector<128x48xbf16>
    %cst_51 = arith.constant dense<0.000000e+00> : vector<128x256xf32>
    %125 = tpu.matmul %124, %122, %cst_51 {dimension_numbers = #tpu.dot_dimension_numbers<[1], [0], [0], [1], [0, 0, 1, 1], [], []>} : vector<128x48xbf16>, vector<48x256xbf16>, vector<128x256xf32> -> vector<128x256xf32>
    %126 = arith.addf %107, %125 : vector<128x256xf32>
    %127 = vector.extract_strided_slice %1 {offsets = [0, 33], sizes = [48, 256], strides = [1, 1]} : vector<48x384xbf16> to vector<48x256xbf16>
    %c7 = arith.constant 7 : index
    %c0_52 = arith.constant 0 : index
    %c0_53 = arith.constant 0 : index
    %128 = vector.load %arg2[%c7, %c0_52, %c0_53] : memref<9x128x48xbf16, #tpu.memory_space<vmem>>, vector<1x128x48xbf16>
    %129 = vector.shape_cast %128 : vector<1x128x48xbf16> to vector<128x48xbf16>
    %cst_54 = arith.constant dense<0.000000e+00> : vector<128x256xf32>
    %130 = tpu.matmul %129, %127, %cst_54 {dimension_numbers = #tpu.dot_dimension_numbers<[1], [0], [0], [1], [0, 0, 1, 1], [], []>} : vector<128x48xbf16>, vector<48x256xbf16>, vector<128x256xf32> -> vector<128x256xf32>
    %131 = arith.addf %126, %130 : vector<128x256xf32>
    %132 = vector.extract_strided_slice %1 {offsets = [0, 34], sizes = [48, 256], strides = [1, 1]} : vector<48x384xbf16> to vector<48x256xbf16>
    %c1_i32_55 = arith.constant 1 : i32
    %133 = vector.broadcast %c1_i32_55 : i32 to vector<1x256xi32>
    %134 = arith.addi %18, %133 : vector<1x256xi32>
    %c0_i32_56 = arith.constant 0 : i32
    %135 = vector.broadcast %c0_i32_56 : i32 to vector<1x256xi32>
    %136 = arith.cmpi sge, %134, %135 : vector<1x256xi32>
    %c1_i32_57 = arith.constant 1 : i32
    %137 = vector.broadcast %c1_i32_57 : i32 to vector<1x256xi32>
    %138 = arith.addi %18, %137 : vector<1x256xi32>
    %c16_i32_58 = arith.constant 16 : i32
    %139 = vector.broadcast %c16_i32_58 : i32 to vector<1x256xi32>
    %140 = arith.cmpi slt, %138, %139 : vector<1x256xi32>
    %141 = arith.andi %136, %140 : vector<1x256xi1>
    %c0_i32_59 = arith.constant 0 : i32
    %142 = arith.sitofp %c0_i32_59 : i32 to bf16
    %143 = vector.shape_cast %141 : vector<1x256xi1> to vector<1x256xi1>
    %144 = vector.broadcast %143 : vector<1x256xi1> to vector<48x256xi1>
    %145 = vector.broadcast %142 : bf16 to vector<48x256xbf16>
    %146 = arith.select %144, %132, %145 : vector<48x256xi1>, vector<48x256xbf16>
    %c8 = arith.constant 8 : index
    %c0_60 = arith.constant 0 : index
    %c0_61 = arith.constant 0 : index
    %147 = vector.load %arg2[%c8, %c0_60, %c0_61] : memref<9x128x48xbf16, #tpu.memory_space<vmem>>, vector<1x128x48xbf16>
    %148 = vector.shape_cast %147 : vector<1x128x48xbf16> to vector<128x48xbf16>
    %cst_62 = arith.constant dense<0.000000e+00> : vector<128x256xf32>
    %149 = tpu.matmul %148, %146, %cst_62 {dimension_numbers = #tpu.dot_dimension_numbers<[1], [0], [0], [1], [0, 0, 1, 1], [], []>} : vector<128x48xbf16>, vector<48x256xbf16>, vector<128x256xf32> -> vector<128x256xf32>
    %150 = arith.addf %131, %149 : vector<128x256xf32>
    %151 = vector.extract_strided_slice %150 {offsets = [0, 0], sizes = [32, 256], strides = [1, 1]} : vector<128x256xf32> to vector<32x256xf32>
    %152 = arith.negf %151 : vector<32x256xf32>
    %153 = math.exp %152 : vector<32x256xf32>
    %cst_63 = arith.constant 1.000000e+00 : f32
    %154 = vector.broadcast %cst_63 : f32 to vector<32x256xf32>
    %155 = arith.addf %154, %153 : vector<32x256xf32>
    %156 = arith.divf %154, %155 : vector<32x256xf32>
    %157 = vector.extract_strided_slice %150 {offsets = [32, 0], sizes = [32, 256], strides = [1, 1]} : vector<128x256xf32> to vector<32x256xf32>
    %158 = arith.negf %157 : vector<32x256xf32>
    %159 = math.exp %158 : vector<32x256xf32>
    %cst_64 = arith.constant 1.000000e+00 : f32
    %160 = vector.broadcast %cst_64 : f32 to vector<32x256xf32>
    %161 = arith.addf %160, %159 : vector<32x256xf32>
    %162 = arith.divf %160, %161 : vector<32x256xf32>
    %163 = vector.extract_strided_slice %150 {offsets = [64, 0], sizes = [32, 256], strides = [1, 1]} : vector<128x256xf32> to vector<32x256xf32>
    %164 = arith.negf %163 : vector<32x256xf32>
    %165 = math.exp %164 : vector<32x256xf32>
    %cst_65 = arith.constant 1.000000e+00 : f32
    %166 = vector.broadcast %cst_65 : f32 to vector<32x256xf32>
    %167 = arith.addf %166, %165 : vector<32x256xf32>
    %168 = arith.divf %166, %167 : vector<32x256xf32>
    %169 = vector.extract_strided_slice %150 {offsets = [96, 0], sizes = [32, 256], strides = [1, 1]} : vector<128x256xf32> to vector<32x256xf32>
    %170 = math.tanh %169 : vector<32x256xf32>
    %c0_66 = arith.constant 0 : index
    %c0_67 = arith.constant 0 : index
    %c0_68 = arith.constant 0 : index
    %171 = vector.load %arg4[%c0_66, %c0_67, %c0_68] : memref<1x32x256xf32, #tpu.memory_space<vmem>>, vector<1x32x256xf32>
    %172 = vector.shape_cast %171 : vector<1x32x256xf32> to vector<32x256xf32>
    %173 = arith.mulf %162, %172 : vector<32x256xf32>
    %174 = arith.mulf %156, %170 : vector<32x256xf32>
    %175 = arith.addf %173, %174 : vector<32x256xf32>
    %176 = math.tanh %175 : vector<32x256xf32>
    %177 = arith.mulf %168, %176 : vector<32x256xf32>
    %c0_69 = arith.constant 0 : index
    %c0_70 = arith.constant 0 : index
    %c0_71 = arith.constant 0 : index
    %178 = vector.load %arg6[%c0_69, %c0_70, %c0_71] : memref<1x32x256xf32, #tpu.memory_space<vmem>>, vector<1x32x256xf32>
    %179 = vector.shape_cast %178 : vector<1x32x256xf32> to vector<32x256xf32>
    %180 = vector.shape_cast %175 : vector<32x256xf32> to vector<1x32x256xf32>
    tpu.vector_store %arg6[%c0_69, %c0_70, %c0_71], %180 {strides = array<i32>} : memref<1x32x256xf32, #tpu.memory_space<vmem>>, vector<1x32x256xf32>,
    %c0_72 = arith.constant 0 : index
    %c0_73 = arith.constant 0 : index
    %c0_74 = arith.constant 0 : index
    %181 = vector.load %arg5[%c0_72, %c0_73, %c0_74] : memref<1x32x256xf32, #tpu.memory_space<vmem>>, vector<1x32x256xf32>
    %182 = vector.shape_cast %181 : vector<1x32x256xf32> to vector<32x256xf32>
    %183 = vector.shape_cast %177 : vector<32x256xf32> to vector<1x32x256xf32>
    tpu.vector_store %arg5[%c0_72, %c0_73, %c0_74], %183 {strides = array<i32>} : memref<1x32x256xf32, #tpu.memory_space<vmem>>, vector<1x32x256xf32>,
    return
  }
  func.func @transform_0(%arg0: i32) -> (i32, i32, i32) {
    %c0_i32 = arith.constant 0 : i32
    %c0_i32_0 = arith.constant 0 : i32
    %c0_i32_1 = arith.constant 0 : i32
    return %arg0, %c0_i32, %c0_i32_0 : i32, i32, i32
  }
  func.func @transform_1(%arg0: i32) -> (i32, i32, i32) {
    %c0_i32 = arith.constant 0 : i32
    %c0_i32_0 = arith.constant 0 : i32
    %c0_i32_1 = arith.constant 0 : i32
    %c0_i32_2 = arith.constant 0 : i32
    return %c0_i32, %c0_i32_0, %c0_i32_1 : i32, i32, i32
  }
  func.func @transform_2(%arg0: i32) -> (i32, i32) {
    %c0_i32 = arith.constant 0 : i32
    %c0_i32_0 = arith.constant 0 : i32
    %c0_i32_1 = arith.constant 0 : i32
    return %c0_i32, %c0_i32_0 : i32, i32
  }
  func.func @transform_3(%arg0: i32) -> (i32, i32, i32) {
    %c0_i32 = arith.constant 0 : i32
    %c0_i32_0 = arith.constant 0 : i32
    %c0_i32_1 = arith.constant 0 : i32
    return %arg0, %c0_i32, %c0_i32_0 : i32, i32, i32
  }
  func.func @transform_4(%arg0: i32) -> (i32, i32, i32) {
    %c0_i32 = arith.constant 0 : i32
    %c0_i32_0 = arith.constant 0 : i32
    %c0_i32_1 = arith.constant 0 : i32
    return %arg0, %c0_i32, %c0_i32_0 : i32, i32, i32
  }
  func.func @transform_5(%arg0: i32) -> (i32, i32, i32) {
    %c0_i32 = arith.constant 0 : i32
    %c0_i32_0 = arith.constant 0 : i32
    %c0_i32_1 = arith.constant 0 : i32
    return %arg0, %c0_i32, %c0_i32_0 : i32, i32, i32
  }
}

</mosaic_0001>

<bundles_post_ra>
// kernel: conv_lstm_cell_forward.1
= control target key start
LH: loop header
LB: loop body
LE: loop exit
PB: predicated region body
PF: predicated region fallthrough
CT: control target
= control target key end

     0   :  { %s4566_s18 = smov 0   ;;  %s7132_s0 = inlined_call_operand.vmem [shape: bf16[2,48,384], index: 0, kind: input, shape index: {}]   ;;  %s7133_s1 = inlined_call_operand.vmem [shape: bf16[9,128,48], index: 1, kind: input, shape index: {}]   ;;  %s7134_s2 = inlined_call_operand.vmem [shape: f32[128,1], index: 2, kind: input, shape index: {}]   ;;  %s7135_s3 = inlined_call_operand.vmem [shape: f32[2,32,256], index: 3, kind: input, shape index: {}]   ;;  %s7136_s4 = inlined_call_operand.vmem [shape: f32[2,32,256], index: 4, kind: output, shape index: {0}]   ;;  %s7137_s5 = inlined_call_operand.vmem [shape: f32[2,32,256], index: 5, kind: output, shape index: {1}]  }
   0x1 LB: > { %s3624_s19 = sadd.s32 4294967295, %s4520_s18   ;;  %p3628_p0 = scmp.ge.s32.totalorder %s4520_s18, 1  ;;  %s4520_s18 = sphi %s4566_s18, %s16_s18  }
   0x2   : > { %p200_p1 = scmp.lt.s32.totalorder %s4520_s18, 3 }
   0x4   : > { %p201_p2 = pnand %p3628_p0, %p200_p1 }
   0x6   : > { %204 = sbr.rel (%p201_p2) target bundleno = 1024 (0x400), region = 36 }
   0xb   : > { %v273_v0 = vlaneseq  ;;  %p238_p3 = scmp.lt.s32.totalorder %s3624_s19, 1  ;;  %v4522_v1 = vmov 0   ;;  %s4523_s24 = smov 127   ;;  %vm954_vm6 = vcmask 15360   ;;  %vm770_vm13 = vcmask 1039360   ;;  %v4274_v17 = vld [vmem:[%s7133_s1 + $0x20] sm:$0xff] }
   0xc   : > { %4373 = vset.pattern.permute.xlu1 %v4522_v1  ;;  %4372 = vset.pattern.permute.xlu0 %v4522_v1  ;;  %s4524_s25 = smov 2   ;;  %v4648_v40 = vunpack.c.l.b16 %v4522_v1  ;;  %v4651_v41 = vunpack.c.h.b16 %v4522_v1  ;;  %s4525_s26 = smov 126   ;;  %vm501_vm14 = vcmask 392192   ;;  %vm1096_vm15 = vcmask 1031168  }
   0xd   : > { %v274_v2 = vand.u32 127, %v273_v0  ;;  %s7524_s19 = smov (!%p238_p3, %s3624_s19), 1  ;;  %4371 = vset.pattern.permute.xlu2 %v4522_v1  ;;  %s4526_s27 = smov 111  }
   0xe   : > { %s4348_s20 = smul.u32 72, %s7524_s19  ;;  %s4527_s28 = smov 16  }
   0xf   : > { %v275_v3 = vadd.s32 128, %v274_v2  ;;  %v280_v4 = vand.u32 15, %v274_v2  ;;  %s4529_s12 = smov 32   ;;  %s4530_s13 = smov 18  }
  0x10   : > { %s4583_s23 = scalar_lea.vmem %s7132_s0, %s4348_s20  ;;  %s4531_s14 = smov 110  }
  0x11   : > { %v287_v5 = vand.u32 15, %v275_v3  ;;  %v396_v6 = vadd.s32 4294967295, %v280_v4  ;;  %v937_v7 = vadd.s32 1, %v280_v4  ;;  %v4267_v8 = vld [vmem:[%s4583_s23 + $0x34] sm:$0xf]  ;;  %v4665_v51 = vld [vmem:[%s4583_s23 + $0x3c] sm:$0xff] }
  0x12   : > { %v3760_v9 = vld [vmem:[%s4583_s23 + $0x3c] sm:$0xf0]  ;;  %v3746_v13 = vld [vmem:[%s4583_s23 + $0x18] sm:$0xf]  ;;  %v4265_v14 = vld [vmem:[%s4583_s23 + $0x20] sm:$0xf0] }
  0x13   : > { %v938_v10 = vadd.s32 1, %v287_v5  ;;  %vm941_vm0 = vcmp.lt.s32.totalorder %v937_v7, 16  ;;  %v397_v11 = vadd.s32 4294967295, %v287_v5  ;;  %vm398_vm1 = vcmp.ge.s32.totalorder %v396_v6, 0  ;;  %v3766_v18 = vld [vmem:[%s4583_s23 + $0x38] sm:$0xf] }
  0x14   : > { %v4587_v12 = vor.u32 %v4267_v8, %v3760_v9  ;;  %v4593_v15 = vor.u32 %v4265_v14, %v3746_v13  ;;  %v4269_v19 = vld [vmem:[%s4583_s23 + $0x40] sm:$0xf0]  ;;  %v3758_v20 = vld [vmem:[%s4583_s23 + $0x30] sm:$0xf]  ;;  %v4268_v21 = vld [vmem:[%s4583_s23 + $0x38] sm:$0xf0] }
  0x15   : > { %vm942_vm2 = vcmp.lt.s32.totalorder %v938_v10, 16  ;;  %vm399_vm3 = vcmp.ge.s32.totalorder %v397_v11, 0  ;;  %v4264_v22 = vld [vmem:[%s4583_s23 + $0x1c] sm:$0xf]  ;;  %v3748_v23 = vld [vmem:[%s4583_s23 + $0x24] sm:$0xf0]  ;;  %v4611_v24 = vor.u32 %v4269_v19, %v3766_v18  ;;  %v4613_v25 = vor.u32 %v4268_v21, %v3758_v20 }
  0x16   : > { %vm949_vm4 = vmpackc.low %vm942_vm2, %vm941_vm0  ;;  %766 = vrot.lane.b32.xlu1 %v4587_v12, %s4523_s24  ;;  %758 = vrot.lane.b32.xlu2 %v4593_v15, %s4523_s24  ;;  %v4615_v26 = vor.u32 %v4264_v22, %v3748_v23  ;;  %v3754_v27 = vld [vmem:[%s4583_s23 + $0x20] sm:$0xf]  ;;  %v4266_v28 = vld [vmem:[%s4583_s23 + $0x28] sm:$0xf0]  ;;  %vm1267_vm0 = vcmask 130048   ;;  %s4532_s22 = smov 96  }
  0x17   : > { %v4596_v16 = vsel %vm949_vm4, 65537, %v4522_v1  ;;  %vm4598_vm5 = vmpackc.low %vm399_vm3, %vm398_vm1  ;;  %v4625_v29 = vor.u32 %v4266_v28, %v3754_v27  ;;  %v3742_v30 = vld [vmem:[%s4583_s23 + $0x8] sm:$0xf]  ;;  %v4263_v31 = vld [vmem:[%s4583_s23 + $0x10] sm:$0xf0]  ;;  %s4533_s6 = smov 95  }
  0x18   : > { %951 = vrot.lane.b32.xlu0 %v4596_v16, %s4524_s25  ;;  %v4631_v32 = vor.u32 %v4263_v31, %v3742_v30  ;;  %v3734_v33 = vld [vmem:[%s4583_s23] sm:$0xf]  ;;  %v4262_v34 = vld [vmem:[%s4583_s23 + $0x8] sm:$0xf0]  ;;  %v4261_v35 = vld [vmem:[%s4583_s23 + $0x4] sm:$0xf] }
  0x19   : > { %v4636_v36 = vor.u32 %v4262_v34, %v3734_v33  ;;  %v3736_v37 = vld [vmem:[%s4583_s23 + $0xc] sm:$0xf0]  ;;  %v4654_v48 = vld [vmem:[%s4583_s23 + $0x38] sm:$0xf]  ;;  %v4657_v49 = vld [vmem:[%s4583_s23 + $0x44] sm:$0xf] }
  0x1a   : > { %v4641_v38 = vor.u32 %v4261_v35, %v3736_v37  ;;  %v4662_v50 = vld [vmem:[%s4583_s23 + $0x30] sm:$0xff]  ;;  %v4690_v60 = vld [vmem:[%s4583_s23 + $0x20] sm:$0xf]  ;;  %v4693_v61 = vld [vmem:[%s4583_s23 + $0x2c] sm:$0xf]  ;;  %v4749_v53 = vsel %vm4598_vm5, 65537, %v4522_v1 }
  0x1b   : > { %v4696_v3 = vld [vmem:[%s4583_s23 + $0x18] sm:$0xff]  ;;  %v4699_v4 = vld [vmem:[%s4583_s23 + $0x24] sm:$0xff]  ;;  %v4720_v23 = vld [vmem:[%s4583_s23 + $0x14] sm:$0xf]  ;;  %s4534_s7 = smov 34   ;;  %s6523_s9 = sshll.u32 %s7524_s19, 6 }
  0x1c   : > { %v4717_v22 = vld [vmem:[%s4583_s23 + $0x8] sm:$0xf]  ;;  %v4723_v27 = vld [vmem:[%s4583_s23] sm:$0xff]  ;;  %v4726_v28 = vld [vmem:[%s4583_s23 + $0xc] sm:$0xff]  ;;  %s6559_s11 = scalar_lea.vmem %s7135_s3, %s6523_s9  ;;  %s6948_s17 = scalar_lea.vmem %s7136_s4, %s6523_s9 }
  0x1e   : > { %768 = vrot.lane.b32.xlu1 %v4611_v24, %s4523_s24  ;;  %760 = vrot.lane.b32.xlu2 %v4615_v26, %s4523_s24 }
  0x20   : > { %764 = vrot.lane.b32.xlu0 %v4613_v25, %s4523_s24 }
  0x26   : > { %752 = vrot.lane.b32.xlu1 %v4636_v36, %s4523_s24  ;;  %754 = vrot.lane.b32.xlu2 %v4641_v38, %s4523_s24 }
  0x28   : > { %762 = vrot.lane.b32.xlu0 %v4625_v29, %s4523_s24 }
  0x30   : > { %756 = vrot.lane.b32.xlu0 %v4631_v32, %s4523_s24 }
  0x8a   : > { %v952_v39 = vpop.permute.xlu0 %951 }
  0x8b   : > { %v953_v42 = vrot.slane %v952_v39, 4 }
  0x8d   : > { %v955_v43 = vsel %vm954_vm6, %v953_v42, %v952_v39  ;;  %v963_v44 = vunpack.c.l.b16 %v953_v42  ;;  %v964_v45 = vunpack.c.h.b16 %v953_v42 }
  0x8e   : > { %v956_v46 = vunpack.c.l.b16 %v955_v43  ;;  %v957_v47 = vunpack.c.h.b16 %v955_v43 }
  0x8f   : > { %vm967_vm7 = vcmp.ne.s32.totalorder %v963_v44, %v4648_v40  ;;  %vm968_vm8 = vcmp.ne.s32.totalorder %v964_v45, %v4651_v41 }
  0x90   : > { %vm960_vm9 = vcmp.ne.s32.totalorder %v956_v46, %v4648_v40  ;;  %vm961_vm10 = vcmp.ne.s32.totalorder %v957_v47, %v4651_v41  ;;  %vm4669_vm11 = vmpackc.low %vm968_vm8, %vm967_vm7  ;;  %vm1651_vm7 = vcmask 908288   ;;  %vm1409_vm8 = vcmask 916480  }
  0x91   : > { %vm4673_vm12 = vmpackc.low %vm961_vm10, %vm960_vm9  ;;  %v979_v54 = vsel %vm4669_vm11, %v4654_v48, 0  ;;  %v981_v55 = vsel %vm4669_vm11, %v4657_v49, 0  ;;  %v975_v8 = vsel %vm4669_vm11, %v4690_v60, 0  ;;  %v977_v9 = vsel %vm4669_vm11, %v4693_v61, 0 }
  0x92   : > { %v1065_v56 = vunpack.c.l.b16 %v979_v54  ;;  %v1068_v57 = vunpack.c.l.b16 %v981_v55  ;;  %v978_v58 = vsel %vm4673_vm12, %v4662_v50, 0  ;;  %v980_v59 = vsel %vm4673_vm12, %v4665_v51, 0 }
  0x93   : > { %v1063_v62 = vunpack.c.l.b16 %v978_v58  ;;  %v1066_v63 = vunpack.c.l.b16 %v980_v59  ;;  %v1064_v0 = vunpack.c.h.b16 %v978_v58  ;;  %v1067_v2 = vunpack.c.h.b16 %v980_v59 }
  0x94   : > { %v1077_v5 = vpack.c.b16 %v1068_v57, %v1065_v56  ;;  %v974_v10 = vsel %vm4673_vm12, %v4696_v3, 0  ;;  %v976_v11 = vsel %vm4673_vm12, %v4699_v4, 0  ;;  %v1059_v13 = vunpack.c.l.b16 %v975_v8 }
  0x95   : > { %v1075_v6 = vpack.c.b16 %v1066_v63, %v1063_v62  ;;  %v1076_v7 = vpack.c.b16 %v1067_v2, %v1064_v0  ;;  %v1062_v14 = vunpack.c.l.b16 %v977_v9  ;;  %v1057_v18 = vunpack.c.l.b16 %v974_v10 }
  0x96   : > { %1094 = vrot.lane.b32.xlu0 %v1077_v5, %s4525_s26  ;;  %v1060_v19 = vunpack.c.l.b16 %v976_v11  ;;  %v1058_v20 = vunpack.c.h.b16 %v974_v10  ;;  %v1061_v21 = vunpack.c.h.b16 %v976_v11  ;;  %v971_v34 = vsel %vm4669_vm11, %v4717_v22, 0 }
  0x97   : > { %1090 = vrot.lane.b32.xlu1 %v1075_v6, %s4525_s26  ;;  %1092 = vrot.lane.b32.xlu2 %v1076_v7, %s4525_s26  ;;  %v1074_v30 = vpack.c.b16 %v1062_v14, %v1059_v13  ;;  %v973_v35 = vsel %vm4669_vm11, %v4720_v23, 0  ;;  %v970_v37 = vsel %vm4673_vm12, %v4723_v27, 0  ;;  %v972_v39 = vsel %vm4673_vm12, %v4726_v28, 0  ;;  %v767_v13 = vpop.permute.xlu1 %766  ;;  %v759_v14 = vpop.permute.xlu2 %758 }
  0x98   : > { %v1072_v31 = vpack.c.b16 %v1060_v19, %v1057_v18  ;;  %v1073_v33 = vpack.c.b16 %v1061_v21, %v1058_v20  ;;  %v1053_v42 = vunpack.c.l.b16 %v971_v34  ;;  %v1056_v43 = vunpack.c.l.b16 %v973_v35  ;;  %v765_v18 = vpop.permute.xlu0 %764 }
  0x99   : > { %v1052_v44 = vunpack.c.h.b16 %v970_v37  ;;  %v1055_v45 = vunpack.c.h.b16 %v972_v39  ;;  %v1051_v46 = vunpack.c.l.b16 %v970_v37  ;;  %v1054_v47 = vunpack.c.l.b16 %v972_v39 }
  0x9a   : > { %v1071_v52 = vpack.c.b16 %v1056_v43, %v1053_v42  ;;  %v413_v56 = vsel %vm4598_vm5, %v4662_v50, 0  ;;  %v414_v57 = vsel %vm4598_vm5, %v4665_v51, 0  ;;  %v411_v58 = vsel %vm4598_vm5, %v4696_v3, 0 }
  0x9b   : > { %v1070_v54 = vpack.c.b16 %v1055_v45, %v1052_v44  ;;  %v1069_v55 = vpack.c.b16 %v1054_v47, %v1051_v46  ;;  %v412_v59 = vsel %vm4598_vm5, %v4699_v4, 0  ;;  %v485_v62 = vunpack.c.l.b16 %v413_v56 }
  0x9c   : > { %v487_v63 = vunpack.c.l.b16 %v414_v57  ;;  %v486_v1 = vunpack.c.h.b16 %v413_v56  ;;  %v488_v0 = vunpack.c.h.b16 %v414_v57  ;;  %v481_v2 = vunpack.c.l.b16 %v411_v58  ;;  %v4276_v56 = vld [vmem:[%s7133_s1 + $0x30] sm:$0xff] }
  0x9d   : > { %v483_v5 = vunpack.c.l.b16 %v412_v59  ;;  %v482_v6 = vunpack.c.h.b16 %v411_v58  ;;  %v484_v7 = vunpack.c.h.b16 %v412_v59  ;;  %v409_v20 = vsel %vm4598_vm5, %v4723_v27, 0  ;;  %v4271_v59 = vld [vmem:[%s7133_s1 + $0x8] sm:$0xff] }
  0x9e   : > { %1088 = vrot.lane.b32.xlu0 %v1074_v30, %s4525_s26  ;;  %v493_v8 = vpack.c.b16 %v487_v63, %v485_v62  ;;  %v494_v9 = vpack.c.b16 %v488_v0, %v486_v1  ;;  %v410_v21 = vsel %vm4598_vm5, %v4726_v28, 0  ;;  %v477_v30 = vunpack.c.l.b16 %v409_v20  ;;  %v4277_v63 = vld [vmem:[%s7133_s1 + $0x38] sm:$0xff] }
  0x9f   : > { %1084 = vrot.lane.b32.xlu1 %v1072_v31, %s4525_s26  ;;  %1086 = vrot.lane.b32.xlu2 %v1073_v33, %s4525_s26  ;;  %v491_v10 = vpack.c.b16 %v483_v5, %v481_v2  ;;  %v492_v11 = vpack.c.b16 %v484_v7, %v482_v6  ;;  %v769_v19 = vpop.permute.xlu1 %768  ;;  %v479_v31 = vunpack.c.l.b16 %v410_v21  ;;  %v478_v33 = vunpack.c.h.b16 %v409_v20  ;;  %v761_v43 = vpop.permute.xlu2 %760 }
  0xa0   : > { %4342 = vmatpush.bf16.msra.mxu2 %v493_v8  ;;  %4345 = vmatpush.bf16.msra.mxu3 %v494_v9  ;;  %v480_v34 = vunpack.c.h.b16 %v410_v21  ;;  %v775_v39 = vsel %vm770_vm13, %v765_v18, %v767_v13  ;;  %v776_v42 = vsel %vm770_vm13, %v767_v13, %v769_v19  ;;  %v773_v44 = vsel %vm770_vm13, %v759_v14, %v761_v43  ;;  %v4278_v19 = vld [vmem:[%s7133_s1 + $0x40] sm:$0xff] }
  0xa1   : > { %580 = vmatpush.bf16.msra.mxu1 %v494_v9  ;;  %531 = vmatpush.bf16.msra.mxu0 %v493_v8  ;;  %v489_v35 = vpack.c.b16 %v479_v31, %v477_v30  ;;  %vm1821_vm9 = vcmask 146432  }
  0xa2   : > { %v490_v37 = vpack.c.b16 %v480_v34, %v478_v33 }
  0xa4   : > { %4343 = vmatpush.bf16.msra.mxu2 %v491_v10  ;;  %4346 = vmatpush.bf16.msra.mxu3 %v492_v11 }
  0xa5   : > { %581 = vmatpush.bf16.msra.mxu1 %v492_v11  ;;  %532 = vmatpush.bf16.msra.mxu0 %v491_v10  ;;  %v4272_v11 = vld [vmem:[%s7133_s1 + $0x10] sm:$0xff] }
  0xa6   : > { %1082 = vrot.lane.b32.xlu0 %v1071_v52, %s4525_s26  ;;  %v4275_v52 = vld [vmem:[%s7133_s1 + $0x28] sm:$0xff] }
  0xa7   : > { %1080 = vrot.lane.b32.xlu2 %v1070_v54, %s4525_s26  ;;  %1078 = vrot.lane.b32.xlu1 %v1069_v55, %s4525_s26  ;;  %v755_v45 = vpop.permute.xlu2 %754  ;;  %v753_v46 = vpop.permute.xlu1 %752  ;;  %v4270_v54 = vld [vmem:[%s7133_s1] sm:$0xff] }
  0xa8   : > { %4344 = vmatpush.bf16.msra.mxu2 %v489_v35  ;;  %4347 = vmatpush.bf16.msra.mxu3 %v490_v37  ;;  %v771_v47 = vsel %vm770_vm13, %v753_v46, %v755_v45  ;;  %v763_v55 = vpop.permute.xlu0 %762 }
  0xa9   : > { %582 = vmatpush.bf16.msra.mxu1 %v490_v37  ;;  %533 = vmatpush.bf16.msra.mxu0 %v489_v35  ;;  %v774_v6 = vsel %vm770_vm13, %v761_v43, %v763_v55  ;;  %v4273_v43 = vld [vmem:[%s7133_s1 + $0x18] sm:$0xff] }
  0xab   : > { %3680 = vmatmul.msk.bf16.vlgmr.msra.gmra.mxu3 %vm501_vm14, %v4274_v17  ;;  %3672 = vmatmul.msk.bf16.vlgmr.msra.gmra.mxu2 %vm501_vm14, %v4274_v17 }
  0xac   : > { %812 = vmatpush.bf16.msrb.mxu2 %v775_v39  ;;  %861 = vmatpush.bf16.msrb.mxu3 %v776_v42 }
  0xad   : > { %3676 = vmatmul.msk.bf16.vlgmr.msra.gmra.mxu1 %vm501_vm14, %v4270_v54  ;;  %3668 = vmatmul.msk.bf16.vlgmr.msra.gmra.mxu0 %vm501_vm14, %v4270_v54 }
  0xae   : > { %1647 = vrot.lane.b32.xlu0 %v4587_v12, %s4526_s27 }
  0xaf   : > { %1264 = vrot.lane.b32.xlu1 %v4749_v53, %s4527_s28  ;;  %1645 = vrot.lane.b32.xlu2 %v4613_v25, %s4526_s27  ;;  %s4528_s28 = smov 112  }
  0xb0   : > { %813 = vmatpush.bf16.msrb.mxu2 %v773_v44  ;;  %v757_v57 = vpop.permute.xlu0 %756  ;;  %862 = vmatpush.bf16.msrb.mxu3 %v774_v6 }
  0xb1   : > { %v772_v13 = vsel %vm770_vm13, %v755_v45, %v757_v57 }
  0xb4   : > { %814 = vmatpush.bf16.msrb.mxu2 %v771_v47  ;;  %863 = vmatpush.bf16.msrb.mxu3 %v772_v13  ;;  %v4279_v47 = vld [vmem:[%s7133_s1 + $0x48] sm:$0xff] }
  0xb6   : > { %1641 = vrot.lane.b32.xlu0 %v4615_v26, %s4526_s27 }
  0xb7   : > { %1639 = vrot.lane.b32.xlu2 %v4593_v15, %s4526_s27 }
  0xbb   : > { %3681 = vmatmul.msk.bf16.gmra.mxu3 %vm501_vm14, %v4275_v52  ;;  %3673 = vmatmul.msk.bf16.gmra.mxu2 %vm501_vm14, %v4275_v52 }
  0xbd   : > { %3677 = vmatmul.msk.bf16.gmra.mxu1 %vm501_vm14, %v4271_v59  ;;  %3669 = vmatmul.msk.bf16.gmra.mxu0 %vm501_vm14, %v4271_v59 }
  0xcb   : > { %3682 = vmatmul.msk.bf16.gmra.mxu3 %vm501_vm14, %v4276_v56  ;;  %3674 = vmatmul.msk.bf16.gmra.mxu2 %vm501_vm14, %v4276_v56 }
  0xcd   : > { %3678 = vmatmul.msk.bf16.gmra.mxu1 %vm501_vm14, %v4272_v11  ;;  %3670 = vmatmul.msk.bf16.gmra.mxu0 %vm501_vm14, %v4272_v11 }
  0xdb   : > { %3683 = vmatmul.msk.bf16.gmra.mxu3 %vm501_vm14, %v4277_v63  ;;  %3675 = vmatmul.msk.bf16.gmra.mxu2 %vm501_vm14, %v4277_v63 }
  0xdd   : > { %3679 = vmatmul.msk.bf16.gmra.mxu1 %vm501_vm14, %v4273_v43  ;;  %3671 = vmatmul.msk.bf16.gmra.mxu0 %vm501_vm14, %v4273_v43 }
  0xeb   : > { %3776 = vmatmul.msk.bf16.vlgmr.msrb.gmra.mxu3 %vm501_vm14, %v4278_v19  ;;  %3768 = vmatmul.msk.bf16.vlgmr.msrb.gmra.mxu2 %vm501_vm14, %v4278_v19 }
  0xf1   : > { %v1093_v58 = vpop.permute.xlu2 %1092 }
  0xf9   : > { %v1087_v5 = vpop.permute.xlu2 %1086 }
  0xfb   : > { %3777 = vmatmul.msk.bf16.gmra.mxu3 %vm501_vm14, %v4279_v47  ;;  %3769 = vmatmul.msk.bf16.gmra.mxu2 %vm501_vm14, %v4279_v47 }
 0x101   : > { %v1081_v14 = vpop.permute.xlu2 %1080 }
 0x108   : > { %v1095_v62 = vpop.permute.xlu0 %1094 }
 0x109   : > { %v1091_v1 = vpop.permute.xlu1 %1090  ;;  %v1102_v0 = vsel %vm1096_vm15, %v1093_v58, %v1095_v62 }
 0x10a   : > { %1187 = vmatpush.bf16.msrb.mxu1 %v1102_v0  ;;  %v1101_v2 = vsel %vm1096_vm15, %v1091_v1, %v1093_v58 }
 0x10b   : > { %1138 = vmatpush.bf16.msrb.mxu0 %v1101_v2 }
 0x110   : > { %v1089_v7 = vpop.permute.xlu0 %1088 }
 0x111   : > { %v1085_v8 = vpop.permute.xlu1 %1084  ;;  %v1100_v9 = vsel %vm1096_vm15, %v1087_v5, %v1089_v7 }
 0x112   : > { %1188 = vmatpush.bf16.msrb.mxu1 %v1100_v9  ;;  %v1099_v10 = vsel %vm1096_vm15, %v1085_v8, %v1087_v5 }
 0x113   : > { %1139 = vmatpush.bf16.msrb.mxu0 %v1099_v10 }
 0x118   : > { %v1083_v18 = vpop.permute.xlu0 %1082 }
 0x119   : > { %v1079_v20 = vpop.permute.xlu1 %1078  ;;  %v1098_v21 = vsel %vm1096_vm15, %v1081_v14, %v1083_v18 }
 0x11a   : > { %1189 = vmatpush.bf16.msrb.mxu1 %v1098_v21  ;;  %v1097_v30 = vsel %vm1096_vm15, %v1079_v20, %v1081_v14 }
 0x11b   : > { %1140 = vmatpush.bf16.msrb.mxu0 %v1097_v30 }
 0x120   : > { %v4902_v44 = vpop.permute.xlu0 %1647 }
 0x121   : > { %v1265_v31 = vpop.permute.xlu1 %1264 }
 0x122   : > { %v1266_v33 = vrot.slane %v1265_v31, 4 }
 0x124   : > { %v1268_v34 = vsel %vm1267_vm0, %v1266_v33, %v1265_v31  ;;  %v1276_v35 = vunpack.c.l.b16 %v1266_v33  ;;  %v1277_v37 = vunpack.c.h.b16 %v1266_v33 }
 0x125   : > { %v1269_v39 = vunpack.c.l.b16 %v1268_v34  ;;  %v1270_v42 = vunpack.c.h.b16 %v1268_v34  ;;  %v4286_v34 = vld [vmem:[%s7133_s1 + $0x80] sm:$0xff] }
 0x126   : > { %vm1280_vm1 = vcmp.ne.s32.totalorder %v1276_v35, %v4648_v40  ;;  %vm1281_vm2 = vcmp.ne.s32.totalorder %v1277_v37, %v4651_v41  ;;  %3840 = vmatmul.msk.bf16.vlgmr.msrb.gmra.mxu1 %vm501_vm14, %v4286_v34  ;;  %3832 = vmatmul.msk.bf16.vlgmr.msrb.gmra.mxu0 %vm501_vm14, %v4286_v34 }
 0x127   : > { %vm1273_vm3 = vcmp.ne.s32.totalorder %v1269_v39, %v4648_v40  ;;  %vm1274_vm4 = vcmp.ne.s32.totalorder %v1270_v42, %v4651_v41  ;;  %vm4837_vm5 = vmpackc.low %vm1281_vm2, %vm1280_vm1  ;;  %vm2133_vm1 = vcmask 261120  }
 0x128   : > { %vm4841_vm6 = vmpackc.low %vm1274_vm4, %vm1273_vm3  ;;  %v1292_v45 = vsel %vm4837_vm5, %v4654_v48, 0  ;;  %v1294_v46 = vsel %vm4837_vm5, %v4657_v49, 0  ;;  %v1288_v2 = vsel %vm4837_vm5, %v4690_v60, 0  ;;  %v1290_v5 = vsel %vm4837_vm5, %v4693_v61, 0 }
 0x129   : > { %v1378_v52 = vunpack.c.l.b16 %v1292_v45  ;;  %v1381_v54 = vunpack.c.l.b16 %v1294_v46  ;;  %v1291_v55 = vsel %vm4841_vm6, %v4662_v50, 0  ;;  %v1293_v56 = vsel %vm4841_vm6, %v4665_v51, 0  ;;  %v4280_v45 = vld [vmem:[%s7133_s1 + $0x50] sm:$0xff]  ;;  %v1646_v46 = vpop.permute.xlu2 %1645 }
 0x12a   : > { %v1377_v57 = vunpack.c.h.b16 %v1291_v55  ;;  %v1380_v58 = vunpack.c.h.b16 %v1293_v56  ;;  %v1376_v59 = vunpack.c.l.b16 %v1291_v55  ;;  %v1379_v62 = vunpack.c.l.b16 %v1293_v56  ;;  %3778 = vmatmul.msk.bf16.gmra.mxu3 %vm501_vm14, %v4280_v45  ;;  %3770 = vmatmul.msk.bf16.gmra.mxu2 %vm501_vm14, %v4280_v45  ;;  %v4911_v56 = vpop.permute.xlu0 %1641  ;;  %v4285_v45 = vld [vmem:[%s7133_s1 + $0x78] sm:$0xff] }
 0x12b   : > { %v1390_v63 = vpack.c.b16 %v1381_v54, %v1378_v52  ;;  %v1287_v6 = vsel %vm4841_vm6, %v4696_v3, 0  ;;  %v1289_v7 = vsel %vm4841_vm6, %v4699_v4, 0  ;;  %v1372_v8 = vunpack.c.l.b16 %v1288_v2  ;;  %v4289_v2 = vld [vmem:[%s7133_s1 + $0x98] sm:$0xff] }
 0x12c   : > { %v1389_v1 = vpack.c.b16 %v1380_v58, %v1377_v57  ;;  %v1388_v0 = vpack.c.b16 %v1379_v62, %v1376_v59  ;;  %v1375_v9 = vunpack.c.l.b16 %v1290_v5  ;;  %v1371_v10 = vunpack.c.h.b16 %v1287_v6  ;;  %v4287_v59 = vld [vmem:[%s7133_s1 + $0x88] sm:$0xff]  ;;  %v4281_v62 = vld [vmem:[%s7133_s1 + $0x58] sm:$0xff] }
 0x12d   : > { %1407 = vrot.lane.b32.xlu1 %v1390_v63, %s4528_s28  ;;  %v1374_v11 = vunpack.c.h.b16 %v1289_v7  ;;  %v1370_v13 = vunpack.c.l.b16 %v1287_v6  ;;  %v1373_v14 = vunpack.c.l.b16 %v1289_v7  ;;  %v1284_v21 = vsel %vm4837_vm5, %v4717_v22, 0  ;;  %v4288_v63 = vld [vmem:[%s7133_s1 + $0x90] sm:$0xff]  ;;  %v4283_v7 = vld [vmem:[%s7133_s1 + $0x68] sm:$0xff] }
 0x12e   : > { %1405 = vrot.lane.b32.xlu0 %v1389_v1, %s4528_s28  ;;  %1403 = vrot.lane.b32.xlu2 %v1388_v0, %s4528_s28  ;;  %v1387_v18 = vpack.c.b16 %v1375_v9, %v1372_v8  ;;  %v1286_v30 = vsel %vm4837_vm5, %v4720_v23, 0  ;;  %v1283_v31 = vsel %vm4841_vm6, %v4723_v27, 0  ;;  %v1285_v33 = vsel %vm4841_vm6, %v4726_v28, 0  ;;  %v4282_v1 = vld [vmem:[%s7133_s1 + $0x60] sm:$0xff]  ;;  %v4949_v0 = vpop.f32.mrf.mxu2 }
 0x12f   : > { %v1386_v19 = vpack.c.b16 %v1374_v11, %v1371_v10  ;;  %v1385_v20 = vpack.c.b16 %v1373_v14, %v1370_v13  ;;  %v1366_v35 = vunpack.c.l.b16 %v1284_v21  ;;  %v1369_v37 = vunpack.c.l.b16 %v1286_v30  ;;  %v4969_v10 = vpop.f32.mrf.mxu1  ;;  %v4971_v11 = vpop.f32.mrf.mxu0  ;;  %v4290_v13 = vld [vmem:[%s7133_s1 + $0xa0] sm:$0xff] }
 0x130   : > { %v1365_v39 = vunpack.c.h.b16 %v1283_v31  ;;  %v1368_v42 = vunpack.c.h.b16 %v1285_v33  ;;  %v1364_v43 = vunpack.c.l.b16 %v1283_v31  ;;  %v1367_v17 = vunpack.c.l.b16 %v1285_v33  ;;  %v4291_v33 = vld [vmem:[%s7133_s1 + $0xa8] sm:$0xff] }
 0x131   : > { %v1656_v47 = vsel %vm1651_vm7, %v1646_v46, %v4902_v44  ;;  %v1384_v52 = vpack.c.b16 %v1369_v37, %v1366_v35  ;;  %v1640_v57 = vpop.permute.xlu2 %1639 }
 0x132   : > { %1693 = vmatpush.bf16.msra.mxu0 %v1656_v47  ;;  %v1383_v54 = vpack.c.b16 %v1368_v42, %v1365_v39  ;;  %v1382_v55 = vpack.c.b16 %v1367_v17, %v1364_v43  ;;  %v1654_v58 = vsel %vm1651_vm7, %v1640_v57, %v4911_v56 }
 0x135   : > { %1401 = vrot.lane.b32.xlu1 %v1387_v18, %s4528_s28 }
 0x136   : > { %1399 = vrot.lane.b32.xlu0 %v1386_v19, %s4528_s28  ;;  %1397 = vrot.lane.b32.xlu2 %v1385_v20, %s4528_s28  ;;  %v4956_v6 = vpop.f32.mrf.mxu2  ;;  %v4284_v19 = vld [vmem:[%s7133_s1 + $0x70] sm:$0xff] }
 0x137   : > { %1694 = vmatpush.bf16.msra.mxu0 %v1654_v58  ;;  %3841 = vmatmul.msk.bf16.gmra.mxu1 %vm501_vm14, %v4287_v59  ;;  %7154 = vst [vmem:[#allocation2_spill] sm:$0xff] %v4956_v6  ;;  %v4985_v20 = vpop.f32.mrf.mxu1  ;;  %v4987_v21 = vpop.f32.mrf.mxu0 }
 0x138   : > { %3833 = vmatmul.msk.bf16.gmra.mxu0 %vm501_vm14, %v4287_v59  ;;  %7159 = vst [vmem:[#allocation7_spill] sm:$0xff] %v4985_v20 }
 0x139   : > { %7160 = vst [vmem:[#allocation8_spill] sm:$0xff] %v4987_v21 }
 0x13a   : > { %3779 = vmatmul.msk.bf16.gmra.mxu3 %vm501_vm14, %v4281_v62  ;;  %3771 = vmatmul.msk.bf16.gmra.mxu2 %vm501_vm14, %v4281_v62 }
 0x13d   : > { %1395 = vrot.lane.b32.xlu1 %v1384_v52, %s4528_s28 }
 0x13e   : > { %1393 = vrot.lane.b32.xlu0 %v1383_v54, %s4528_s28  ;;  %1391 = vrot.lane.b32.xlu2 %v1382_v55, %s4528_s28  ;;  %v4967_v9 = vpop.f32.mrf.mxu2  ;;  %v4292_v54 = vld [vmem:[%s7133_s1 + $0xb0] sm:$0xff] }
 0x13f   : > { %7156 = vst [vmem:[#allocation4_spill] sm:$0xff] %v4967_v9  ;;  %v4998_v34 = vpop.f32.mrf.mxu1  ;;  %v5000_v35 = vpop.f32.mrf.mxu0 }
 0x145   : > { %1649 = vrot.lane.b32.xlu1 %v4611_v24, %s4526_s27 }
 0x146   : > { %1635 = vrot.lane.b32.xlu0 %v4641_v38, %s4526_s27  ;;  %1633 = vrot.lane.b32.xlu2 %v4636_v36, %s4526_s27  ;;  %v4978_v18 = vpop.f32.mrf.mxu2 }
 0x147   : > { %3842 = vmatmul.msk.bf16.gmra.mxu1 %vm501_vm14, %v4288_v63  ;;  %7158 = vst [vmem:[#allocation6_spill] sm:$0xff] %v4978_v18  ;;  %v5008_v43 = vpop.f32.mrf.mxu1  ;;  %v5010_v17 = vpop.f32.mrf.mxu0 }
 0x148   : > { %3834 = vmatmul.msk.bf16.gmra.mxu0 %vm501_vm14, %v4288_v63  ;;  %7165 = vst [vmem:[#allocation13_spill] sm:$0xff] %v5008_v43 }
 0x149   : > { %7166 = vst [vmem:[#allocation14_spill] sm:$0xff] %v5010_v17 }
 0x14a   : > { %3780 = vmatmul.msk.bf16.gmra.mxu3 %vm501_vm14, %v4282_v1  ;;  %3772 = vmatmul.msk.bf16.gmra.mxu2 %vm501_vm14, %v4282_v1 }
 0x14d   : > { %1643 = vrot.lane.b32.xlu1 %v4625_v29, %s4526_s27 }
 0x14e   : > { %2130 = vrot.lane.b32.xlu0 %v4749_v53, %s4529_s12  ;;  %1818 = vrot.lane.b32.xlu2 %v4596_v16, %s4530_s13  ;;  %v4947_v53 = vpop.f32.mrf.mxu3  ;;  %v4993_v31 = vpop.f32.mrf.mxu2 }
 0x14f   : > { %7162 = vst [vmem:[#allocation10_spill] sm:$0xff] %v4993_v31  ;;  %v5024_v55 = vpop.f32.mrf.mxu1  ;;  %v5026_v57 = vpop.f32.mrf.mxu0 }
 0x150   : > { %7169 = vst [vmem:[#allocation17_spill] sm:$0xff] %v5024_v55 }
 0x155   : > { %1637 = vrot.lane.b32.xlu1 %v4631_v32, %s4526_s27 }
 0x156   : > { %v4954_v5 = vpop.f32.mrf.mxu3  ;;  %v5004_v39 = vpop.f32.mrf.mxu2 }
 0x157   : > { %3843 = vmatmul.msk.bf16.gmra.mxu1 %vm501_vm14, %v4289_v2  ;;  %7164 = vst [vmem:[#allocation12_spill] sm:$0xff] %v5004_v39  ;;  %v5034_v63 = vpop.f32.mrf.mxu1 }
 0x158   : > { %3835 = vmatmul.msk.bf16.gmra.mxu0 %vm501_vm14, %v4289_v2  ;;  %7172 = vst [vmem:[#allocation20_spill] sm:$0xff] %v5034_v63  ;;  %v5036_v2 = vpop.f32.mrf.mxu0 }
 0x159   : > { %7173 = vst [vmem:[#allocation21_spill] sm:$0xff] %v5036_v2  ;;  %v4293_v2 = vld [vmem:[%s7133_s1 + $0xb8] sm:$0xff] }
 0x15a   : > { %3781 = vmatmul.msk.bf16.gmra.mxu3 %vm501_vm14, %v4283_v7  ;;  %3773 = vmatmul.msk.bf16.gmra.mxu2 %vm501_vm14, %v4283_v7 }
 0x15e   : > { %v4965_v8 = vpop.f32.mrf.mxu3  ;;  %v5017_v52 = vpop.f32.mrf.mxu2 }
 0x15f   : > { %7155 = vst [vmem:[#allocation3_spill] sm:$0xff] %v4965_v8 }
 0x160   : > { %7168 = vst [vmem:[#allocation16_spill] sm:$0xff] %v5017_v52  ;;  %v5048_v63 = vpop.f32.mrf.mxu0 }
 0x166   : > { %v4976_v14 = vpop.f32.mrf.mxu3  ;;  %v5030_v62 = vpop.f32.mrf.mxu2 }
 0x167   : > { %7157 = vst [vmem:[#allocation5_spill] sm:$0xff] %v4976_v14  ;;  %3844 = vmatmul.msk.bf16.gmra.mxu1 %vm501_vm14, %v4290_v13 }
 0x168   : > { %3836 = vmatmul.msk.bf16.gmra.mxu0 %vm501_vm14, %v4290_v13  ;;  %7171 = vst [vmem:[#allocation19_spill] sm:$0xff] %v5030_v62 }
 0x16a   : > { %3782 = vmatmul.msk.bf16.gmra.mxu3 %vm501_vm14, %v4284_v19  ;;  %3774 = vmatmul.msk.bf16.gmra.mxu2 %vm501_vm14, %v4284_v19 }
 0x16e   : > { %v4991_v30 = vpop.f32.mrf.mxu3  ;;  %v5044_v21 = vpop.f32.mrf.mxu2 }
 0x16f   : > { %7161 = vst [vmem:[#allocation9_spill] sm:$0xff] %v4991_v30 }
 0x176   : > { %v5002_v37 = vpop.f32.mrf.mxu3 }
 0x177   : > { %7163 = vst [vmem:[#allocation11_spill] sm:$0xff] %v5002_v37  ;;  %3845 = vmatmul.msk.bf16.gmra.mxu1 %vm501_vm14, %v4291_v33 }
 0x178   : > { %3837 = vmatmul.msk.bf16.gmra.mxu0 %vm501_vm14, %v4291_v33 }
 0x17a   : > { %3783 = vmatmul.msk.bf16.gmra.mxu3 %vm501_vm14, %v4285_v45  ;;  %3775 = vmatmul.msk.bf16.gmra.mxu2 %vm501_vm14, %v4285_v45 }
 0x17e   : > { %v5015_v46 = vpop.f32.mrf.mxu3 }
 0x17f   : > { %7167 = vst [vmem:[#allocation15_spill] sm:$0xff] %v5015_v46 }
 0x186   : > { %v5028_v58 = vpop.f32.mrf.mxu3 }
 0x187   : > { %7170 = vst [vmem:[#allocation18_spill] sm:$0xff] %v5028_v58  ;;  %3846 = vmatmul.msk.bf16.gmra.mxu1 %vm501_vm14, %v4292_v54 }
 0x188   : > { %v1404_v42 = vpop.permute.xlu2 %1403  ;;  %3838 = vmatmul.msk.bf16.gmra.mxu0 %vm501_vm14, %v4292_v54  ;;  %v5046_v54 = vpop.f32.mrf.mxu1 }
 0x18e   : > { %v5042_v45 = vpop.f32.mrf.mxu3 }
 0x190   : > { %v1398_v47 = vpop.permute.xlu2 %1397 }
 0x197   : > { %3847 = vmatmul.msk.bf16.gmra.mxu1 %vm501_vm14, %v4293_v2 }
 0x198   : > { %v1392_v59 = vpop.permute.xlu2 %1391  ;;  %3839 = vmatmul.msk.bf16.gmra.mxu0 %vm501_vm14, %v4293_v2 }
 0x19f   : > { %v1408_v1 = vpop.permute.xlu1 %1407 }
 0x1a0   : > { %v1406_v7 = vpop.permute.xlu0 %1405  ;;  %v5038_v13 = vpop.permute.xlu2 %1633 }
 0x1a1   : > { %v1414_v19 = vsel %vm1409_vm8, %v1404_v42, %v1406_v7  ;;  %v1415_v33 = vsel %vm1409_vm8, %v1406_v7, %v1408_v1 }
 0x1a2   : > { %1451 = vmatpush.bf16.msra.mxu2 %v1414_v19  ;;  %1500 = vmatpush.bf16.msra.mxu3 %v1415_v33  ;;  %v5057_v19 = vpop.f32.mrf.mxu3  ;;  %v5059_v33 = vpop.f32.mrf.mxu2 }
 0x1a3   : > { %7174 = vst [vmem:[#allocation22_spill] sm:$0xff] %v5057_v19 }
 0x1a4   : > { %7175 = vst [vmem:[#allocation23_spill] sm:$0xff] %v5059_v33 }
 0x1a7   : > { %v1402_v17 = vpop.permute.xlu1 %1401 }
 0x1a8   : > { %v1400_v43 = vpop.permute.xlu0 %1399  ;;  %v1819_v42 = vpop.permute.xlu2 %1818 }
 0x1a9   : > { %v1820_v62 = vrot.slane %v1819_v42, 4  ;;  %v1412_v1 = vsel %vm1409_vm8, %v1398_v47, %v1400_v43  ;;  %v1413_v7 = vsel %vm1409_vm8, %v1400_v43, %v1402_v17  ;;  %v5069_v17 = vpop.f32.mrf.mxu1 }
 0x1aa   : > { %1452 = vmatpush.bf16.msra.mxu2 %v1412_v1  ;;  %1501 = vmatpush.bf16.msra.mxu3 %v1413_v7  ;;  %7178 = vst [vmem:[#allocation24_spill] sm:$0xff] %v5069_v17 }
 0x1ab   : > { %v1822_v58 = vsel %vm1821_vm9, %v1820_v62, %v1819_v42  ;;  %v1830_v52 = vunpack.c.l.b16 %v1820_v62  ;;  %v1831_v46 = vunpack.c.h.b16 %v1820_v62  ;;  %vm2275_vm9 = vcmask 785408  }
 0x1ac   : > { %v1823_v20 = vunpack.c.l.b16 %v1822_v58  ;;  %v1824_v39 = vunpack.c.h.b16 %v1822_v58 }
 0x1ad   : > { %vm1834_vm10 = vcmp.ne.s32.totalorder %v1830_v52, %v4648_v40  ;;  %vm1835_vm11 = vcmp.ne.s32.totalorder %v1831_v46, %v4651_v41 }
 0x1ae   : > { %vm1827_vm12 = vcmp.ne.s32.totalorder %v1823_v20, %v4648_v40  ;;  %vm1828_vm13 = vcmp.ne.s32.totalorder %v1824_v39, %v4651_v41  ;;  %vm5065_vm15 = vmpackc.low %vm1835_vm11, %vm1834_vm10  ;;  %v5081_v39 = vpop.f32.mrf.mxu0  ;;  %vm2687_vm10 = vcmask 277504  }
 0x1af   : > { %vm5071_vm0 = vmpackc.low %vm1828_vm13, %vm1827_vm12  ;;  %v1396_v62 = vpop.permute.xlu1 %1395  ;;  %v1846_v52 = vsel %vm5065_vm15, %v4654_v48, 0  ;;  %v1848_v20 = vsel %vm5065_vm15, %v4657_v49, 0  ;;  %7181 = vst [vmem:[#allocation25_spill] sm:$0xff] %v5081_v39  ;;  %v4294_v39 = vld [vmem:[%s7133_s1 + $0xc0] sm:$0xff] }
 0x1b0   : > { %v1394_v46 = vpop.permute.xlu0 %1393  ;;  %v1932_v58 = vunpack.c.l.b16 %v1846_v52  ;;  %v1935_v2 = vunpack.c.l.b16 %v1848_v20  ;;  %v1845_v42 = vsel %vm5071_vm0, %v4662_v50, 0  ;;  %v1847_v1 = vsel %vm5071_vm0, %v4665_v51, 0  ;;  %v5094_v52 = vpop.f32.mrf.mxu3 }
 0x1b1   : > { %v1410_v7 = vsel %vm1409_vm8, %v1392_v59, %v1394_v46  ;;  %v1411_v17 = vsel %vm1409_vm8, %v1394_v46, %v1396_v62  ;;  %v1931_v33 = vunpack.c.h.b16 %v1845_v42  ;;  %v1934_v19 = vunpack.c.h.b16 %v1847_v1  ;;  %7182 = vst [vmem:[#allocation26_spill] sm:$0xff] %v5094_v52  ;;  %v5096_v20 = vpop.f32.mrf.mxu2 }
 0x1b2   : > { %1453 = vmatpush.bf16.msra.mxu2 %v1410_v7  ;;  %1502 = vmatpush.bf16.msra.mxu3 %v1411_v17  ;;  %v1944_v37 = vpack.c.b16 %v1935_v2, %v1932_v58  ;;  %v1930_v31 = vunpack.c.l.b16 %v1845_v42  ;;  %v1933_v30 = vunpack.c.l.b16 %v1847_v1  ;;  %v1842_v59 = vsel %vm5065_vm15, %v4690_v60, 0 }
 0x1b3   : > { %v1943_v18 = vpack.c.b16 %v1934_v19, %v1931_v33  ;;  %v1844_v62 = vsel %vm5065_vm15, %v4693_v61, 0  ;;  %v1841_v17 = vsel %vm5071_vm0, %v4696_v3, 0  ;;  %v1843_v19 = vsel %vm5071_vm0, %v4699_v4, 0 }
 0x1b4   : > { %1961 = vrot.lane.b32.xlu0 %v1944_v37, %s4531_s14  ;;  %v1942_v46 = vpack.c.b16 %v1933_v30, %v1930_v31  ;;  %v1926_v33 = vunpack.c.l.b16 %v1842_v59  ;;  %v1929_v58 = vunpack.c.l.b16 %v1844_v62  ;;  %v5115_v37 = vpop.f32.mrf.mxu1  ;;  %v1925_v31 = vunpack.c.h.b16 %v1841_v17 }
 0x1b5   : > { %1959 = vrot.lane.b32.xlu2 %v1943_v18, %s4531_s14  ;;  %3904 = vmatmul.msk.bf16.vlgmr.msra.gmra.mxu3 %vm501_vm14, %v4294_v39  ;;  %v1928_v2 = vunpack.c.h.b16 %v1843_v19  ;;  %v1924_v18 = vunpack.c.l.b16 %v1841_v17  ;;  %v1927_v14 = vunpack.c.l.b16 %v1843_v19  ;;  %v1837_v19 = vsel %vm5071_vm0, %v4723_v27, 0 }
 0x1b6   : > { %1957 = vrot.lane.b32.xlu1 %v1942_v46, %s4531_s14  ;;  %3896 = vmatmul.msk.bf16.vlgmr.msra.gmra.mxu2 %vm501_vm14, %v4294_v39  ;;  %v5117_v42 = vpop.f32.mrf.mxu0  ;;  %v5126_v39 = vld [vmem:[%s7133_s1 + $0x100] sm:$0xff]  ;;  %v1941_v9 = vpack.c.b16 %v1929_v58, %v1926_v33  ;;  %v1839_v33 = vsel %vm5071_vm0, %v4726_v28, 0 }
 0x1b7   : > { %v1650_v30 = vpop.permute.xlu1 %1649  ;;  %v1940_v8 = vpack.c.b16 %v1928_v2, %v1925_v31  ;;  %v1939_v17 = vpack.c.b16 %v1927_v14, %v1924_v18  ;;  %v1919_v14 = vunpack.c.h.b16 %v1837_v19  ;;  %v1922_v31 = vunpack.c.h.b16 %v1839_v33 }
 0x1b8   : > { %v1657_v1 = vsel %vm1651_vm7, %v4902_v44, %v1650_v30  ;;  %v1636_v7 = vpop.permute.xlu0 %1635  ;;  %v5128_v62 = vpop.f32.mrf.mxu3  ;;  %v1838_v44 = vsel %vm5065_vm15, %v4717_v22, 0  ;;  %v1921_v18 = vunpack.c.l.b16 %v1839_v33 }
 0x1b9   : > { %1742 = vmatpush.bf16.msra.mxu1 %v1657_v1  ;;  %v1652_v59 = vsel %vm1651_vm7, %v5038_v13, %v1636_v7  ;;  %7183 = vst [vmem:[#allocation27_spill] sm:$0xff] %v5128_v62  ;;  %v5130_v46 = vpop.f32.mrf.mxu2  ;;  %v1840_v13 = vsel %vm5065_vm15, %v4720_v23, 0  ;;  %v1920_v43 = vunpack.c.l.b16 %v1838_v44  ;;  %v4295_v44 = vld [vmem:[%s7133_s1 + $0xc8] sm:$0xff]  ;;  %v1937_v52 = vpack.c.b16 %v1922_v31, %v1919_v14 }
 0x1ba   : > { %7184 = vst [vmem:[#allocation28_spill] sm:$0xff] %v5130_v46  ;;  %1695 = vmatpush.bf16.msra.mxu0 %v1652_v59  ;;  %v1923_v58 = vunpack.c.l.b16 %v1840_v13 }
 0x1bc   : > { %1955 = vrot.lane.b32.xlu0 %v1941_v9, %s4531_s14  ;;  %v5149_v30 = vpop.f32.mrf.mxu1  ;;  %v1938_v46 = vpack.c.b16 %v1923_v58, %v1920_v43 }
 0x1bd   : > { %1953 = vrot.lane.b32.xlu2 %v1940_v8, %s4531_s14  ;;  %3960 = vmatmul.msk.bf16.vlgmr.msra.gmra.mxu0 %vm501_vm14, %v5126_v39  ;;  %7185 = vst [vmem:[#allocation29_spill] sm:$0xff] %v5149_v30  ;;  %v1918_v8 = vunpack.c.l.b16 %v1837_v19 }
 0x1be   : > { %1951 = vrot.lane.b32.xlu1 %v1939_v17, %s4531_s14  ;;  %v5151_v2 = vpop.f32.mrf.mxu0 }
 0x1bf   : > { %v1644_v9 = vpop.permute.xlu1 %1643  ;;  %7186 = vst [vmem:[#allocation30_spill] sm:$0xff] %v5151_v2 }
 0x1c0   : > { %v2131_v1 = vpop.permute.xlu0 %2130  ;;  %v1655_v47 = vsel %vm1651_vm7, %v4911_v56, %v1644_v9  ;;  %v5158_v13 = vpop.f32.mrf.mxu3  ;;  %v1936_v56 = vpack.c.b16 %v1921_v18, %v1918_v8 }
 0x1c1   : > { %v2132_v59 = vrot.slane %v2131_v1, 4  ;;  %1743 = vmatpush.bf16.msra.mxu1 %v1655_v47  ;;  %v5160_v17 = vpop.f32.mrf.mxu2 }
 0x1c3   : > { %v2134_v62 = vsel %vm2133_vm1, %v2132_v59, %v2131_v1  ;;  %v2142_v2 = vunpack.c.l.b16 %v2132_v59  ;;  %v2143_v30 = vunpack.c.h.b16 %v2132_v59 }
 0x1c4   : > { %v2135_v6 = vunpack.c.l.b16 %v2134_v62  ;;  %v2136_v55 = vunpack.c.h.b16 %v2134_v62  ;;  %1949 = vrot.lane.b32.xlu0 %v1938_v46, %s4531_s14  ;;  %v5175_v62 = vpop.f32.mrf.mxu1 }
 0x1c5   : > { %vm2146_vm2 = vcmp.ne.s32.totalorder %v2142_v2, %v4648_v40  ;;  %vm2147_vm3 = vcmp.ne.s32.totalorder %v2143_v30, %v4651_v41  ;;  %1947 = vrot.lane.b32.xlu2 %v1937_v52, %s4531_s14  ;;  %3905 = vmatmul.msk.bf16.gmra.mxu3 %vm501_vm14, %v4295_v44 }
 0x1c6   : > { %vm2139_vm4 = vcmp.ne.s32.totalorder %v2135_v6, %v4648_v40  ;;  %vm2140_vm5 = vcmp.ne.s32.totalorder %v2136_v55, %v4651_v41  ;;  %vm5169_vm6 = vmpackc.low %vm2147_vm3, %vm2146_vm2  ;;  %1945 = vrot.lane.b32.xlu1 %v1936_v56, %s4531_s14  ;;  %3897 = vmatmul.msk.bf16.gmra.mxu2 %vm501_vm14, %v4295_v44  ;;  %v5187_v33 = vpop.f32.mrf.mxu0  ;;  %s4535_s14 = smov 94   ;;  %vm2517_vm2 = vcmask 777216   ;;  %vm2829_vm3 = vcmask 769024  }
 0x1c7   : > { %vm5177_vm8 = vmpackc.low %vm2140_vm5, %vm2139_vm4  ;;  %v1638_v52 = vpop.permute.xlu1 %1637  ;;  %v2158_v6 = vsel %vm5169_vm6, %v4654_v48, 0  ;;  %v2160_v55 = vsel %vm5169_vm6, %v4657_v49, 0  ;;  %v4303_v49 = vld [vmem:[%s7133_s1 + $0x108] sm:$0xff]  ;;  %v2156_v8 = vsel %vm5169_vm6, %v4693_v61, 0 }
 0x1c8   : > { %v1653_v43 = vsel %vm1651_vm7, %v1636_v7, %v1638_v52  ;;  %v2244_v58 = vunpack.c.l.b16 %v2158_v6  ;;  %v2247_v30 = vunpack.c.l.b16 %v2160_v55  ;;  %v2157_v9 = vsel %vm5177_vm8, %v4662_v50, 0  ;;  %v5199_v47 = vpop.f32.mrf.mxu3 }
 0x1c9   : > { %1744 = vmatpush.bf16.msra.mxu1 %v1653_v43  ;;  %v2159_v14 = vsel %vm5177_vm8, %v4665_v51, 0  ;;  %v2243_v48 = vunpack.c.h.b16 %v2157_v9  ;;  %v2242_v31 = vunpack.c.l.b16 %v2157_v9  ;;  %7191 = vst [vmem:[#allocation31_spill] sm:$0xff] %v5199_v47  ;;  %v2154_v50 = vsel %vm5169_vm6, %v4690_v60, 0  ;;  %v5207_v51 = vpop.f32.mrf.mxu2  ;;  %v4309_v47 = vld [vmem:[%s7133_s1 + $0x138] sm:$0xff] }
 0x1ca   : > { %v2256_v2 = vpack.c.b16 %v2247_v30, %v2244_v58  ;;  %v2246_v1 = vunpack.c.h.b16 %v2159_v14  ;;  %v2245_v7 = vunpack.c.l.b16 %v2159_v14  ;;  %7192 = vst [vmem:[#allocation32_spill] sm:$0xff] %v5207_v51  ;;  %v2153_v44 = vsel %vm5177_vm8, %v4696_v3, 0 }
 0x1cb   : > { %v2155_v60 = vsel %vm5177_vm8, %v4699_v4, 0  ;;  %v2238_v61 = vunpack.c.l.b16 %v2154_v50  ;;  %v2241_v56 = vunpack.c.l.b16 %v2156_v8  ;;  %v2236_v43 = vunpack.c.l.b16 %v2153_v44  ;;  %v4296_v4 = vld [vmem:[%s7133_s1 + $0xd0] sm:$0xff] }
 0x1cc   : > { %2273 = vrot.lane.b32.xlu0 %v2256_v2, %s4532_s22  ;;  %v2255_v18 = vpack.c.b16 %v2246_v1, %v2243_v48  ;;  %v2254_v59 = vpack.c.b16 %v2245_v7, %v2242_v31  ;;  %3968 = vmatmul.msk.bf16.vlgmr.msra.gmra.mxu1 %vm501_vm14, %v5126_v39  ;;  %v5221_v52 = vpop.f32.mrf.mxu1  ;;  %v2237_v39 = vunpack.c.h.b16 %v2153_v44  ;;  %v2240_v55 = vunpack.c.h.b16 %v2155_v60 }
 0x1cd   : > { %3961 = vmatmul.msk.bf16.gmra.mxu0 %vm501_vm14, %v4303_v49  ;;  %7193 = vst [vmem:[#allocation33_spill] sm:$0xff] %v5221_v52  ;;  %v2239_v3 = vunpack.c.l.b16 %v2155_v60  ;;  %v2253_v58 = vpack.c.b16 %v2241_v56, %v2238_v61  ;;  %v2150_v30 = vsel %vm5169_vm6, %v4717_v22, 0  ;;  %v2152_v9 = vsel %vm5169_vm6, %v4720_v23, 0 }
 0x1ce   : > { %2271 = vrot.lane.b32.xlu2 %v2255_v18, %s4532_s22  ;;  %2269 = vrot.lane.b32.xlu1 %v2254_v59, %s4532_s22  ;;  %v5223_v6 = vpop.f32.mrf.mxu0  ;;  %v2252_v14 = vpack.c.b16 %v2240_v55, %v2237_v39  ;;  %v2149_v2 = vsel %vm5177_vm8, %v4723_v27, 0  ;;  %v2151_v22 = vsel %vm5177_vm8, %v4726_v28, 0  ;;  %v2232_v23 = vunpack.c.l.b16 %v2150_v30  ;;  %v4304_v28 = vld [vmem:[%s7133_s1 + $0x110] sm:$0xff]  ;;  %v4298_v30 = vld [vmem:[%s7133_s1 + $0xe0] sm:$0xff] }
 0x1cf   : > { %7194 = vst [vmem:[#allocation34_spill] sm:$0xff] %v5223_v6  ;;  %v2251_v48 = vpack.c.b16 %v2239_v3, %v2236_v43  ;;  %v2235_v19 = vunpack.c.l.b16 %v2152_v9  ;;  %v2231_v8 = vunpack.c.h.b16 %v2149_v2  ;;  %v2234_v27 = vunpack.c.h.b16 %v2151_v22  ;;  %v4297_v43 = vld [vmem:[%s7133_s1 + $0xd8] sm:$0xff] }
 0x1d0   : > { %v5235_v31 = vpop.f32.mrf.mxu3  ;;  %v2230_v18 = vunpack.c.l.b16 %v2149_v2  ;;  %v2233_v59 = vunpack.c.l.b16 %v2151_v22  ;;  %vm1963_vm7 = vcmask 900096  }
 0x1d1   : > { %v5244_v1 = vpop.f32.mrf.mxu2  ;;  %v2250_v46 = vpack.c.b16 %v2235_v19, %v2232_v23  ;;  %v2249_v44 = vpack.c.b16 %v2234_v27, %v2231_v8 }
 0x1d2   : > { %v2248_v60 = vpack.c.b16 %v2233_v59, %v2230_v18  ;;  %v4300_v59 = vld [vmem:[%s7133_s1 + $0xf0] sm:$0xff] }
 0x1d4   : > { %2267 = vrot.lane.b32.xlu0 %v2253_v58, %s4532_s22  ;;  %v5248_v7 = vpop.f32.mrf.mxu1 }
 0x1d5   : > { %3906 = vmatmul.msk.bf16.gmra.mxu3 %vm501_vm14, %v4296_v4 }
 0x1d6   : > { %2265 = vrot.lane.b32.xlu2 %v2252_v14, %s4532_s22  ;;  %2263 = vrot.lane.b32.xlu1 %v2251_v48, %s4532_s22  ;;  %v5251_v50 = vpop.f32.mrf.mxu0 }
 0x1d7   : > { %3898 = vmatmul.msk.bf16.gmra.mxu2 %vm501_vm14, %v4296_v4 }
 0x1d8   : > { %v5261_v61 = vpop.f32.mrf.mxu3 }
 0x1d9   : > { %7195 = vst [vmem:[#allocation35_spill] sm:$0xff] %v5261_v61  ;;  %v5265_v39 = vpop.f32.mrf.mxu2 }
 0x1da   : > { %7197 = vst [vmem:[#allocation37_spill] sm:$0xff] %v5265_v39 }
 0x1dc   : > { %2261 = vrot.lane.b32.xlu0 %v2250_v46, %s4532_s22  ;;  %3969 = vmatmul.msk.bf16.gmra.mxu1 %vm501_vm14, %v4303_v49  ;;  %v5263_v56 = vpop.f32.mrf.mxu1 }
 0x1dd   : > { %3962 = vmatmul.msk.bf16.gmra.mxu0 %vm501_vm14, %v4304_v28  ;;  %7196 = vst [vmem:[#allocation36_spill] sm:$0xff] %v5263_v56 }
 0x1de   : > { %2259 = vrot.lane.b32.xlu2 %v2249_v44, %s4532_s22  ;;  %2257 = vrot.lane.b32.xlu1 %v2248_v60, %s4532_s22  ;;  %v5267_v55 = vpop.f32.mrf.mxu0  ;;  %v4308_v60 = vld [vmem:[%s7133_s1 + $0x130] sm:$0xff] }
 0x1df   : > { %7198 = vst [vmem:[#allocation38_spill] sm:$0xff] %v5267_v55 }
 0x1e0   : > { %v5283_v4 = vpop.f32.mrf.mxu3 }
 0x1e1   : > { %v5285_v58 = vpop.f32.mrf.mxu2 }
 0x1e4   : > { %2513 = vrot.lane.b32.xlu0 %v4587_v12, %s4533_s6  ;;  %v5276_v49 = vpop.f32.mrf.mxu1  ;;  %v4305_v12 = vld [vmem:[%s7133_s1 + $0x118] sm:$0xff] }
 0x1e5   : > { %3907 = vmatmul.msk.bf16.gmra.mxu3 %vm501_vm14, %v4297_v43 }
 0x1e6   : > { %2684 = vrot.lane.b32.xlu1 %v4596_v16, %s4534_s7  ;;  %2511 = vrot.lane.b32.xlu2 %v4613_v25, %s4533_s6  ;;  %v5281_v3 = vpop.f32.mrf.mxu0 }
 0x1e7   : > { %3899 = vmatmul.msk.bf16.gmra.mxu2 %vm501_vm14, %v4297_v43 }
 0x1e8   : > { %v5305_v9 = vpop.f32.mrf.mxu3 }
 0x1e9   : > { %v5307_v14 = vpop.f32.mrf.mxu2 }
 0x1ec   : > { %3970 = vmatmul.msk.bf16.gmra.mxu1 %vm501_vm14, %v4304_v28  ;;  %2507 = vrot.lane.b32.xlu0 %v4615_v26, %s4533_s6  ;;  %v5300_v25 = vpop.f32.mrf.mxu1 }
 0x1ed   : > { %3963 = vmatmul.msk.bf16.gmra.mxu0 %vm501_vm14, %v4305_v12  ;;  %7200 = vst [vmem:[#allocation40_spill] sm:$0xff] %v5300_v25 }
 0x1ee   : > { %2515 = vrot.lane.b32.xlu1 %v4611_v24, %s4533_s6  ;;  %2505 = vrot.lane.b32.xlu2 %v4593_v15, %s4533_s6  ;;  %v5298_v16 = vpop.f32.mrf.mxu0  ;;  %v4306_v24 = vld [vmem:[%s7133_s1 + $0x120] sm:$0xff] }
 0x1ef   : > { %7199 = vst [vmem:[#allocation39_spill] sm:$0xff] %v5298_v16 }
 0x1f1   : > { %v5327_v48 = vpop.f32.mrf.mxu2 }
 0x1f2   : > { %7202 = vst [vmem:[#allocation42_spill] sm:$0xff] %v5327_v48 }
 0x1f4   : > { %2501 = vrot.lane.b32.xlu0 %v4641_v38, %s4533_s6  ;;  %v5322_v26 = vpop.f32.mrf.mxu1  ;;  %v5325_v38 = vpop.f32.mrf.mxu3 }
 0x1f5   : > { %3908 = vmatmul.msk.bf16.gmra.mxu3 %vm501_vm14, %v4298_v30  ;;  %7201 = vst [vmem:[#allocation41_spill] sm:$0xff] %v5325_v38 }
 0x1f6   : > { %2509 = vrot.lane.b32.xlu1 %v4625_v29, %s4533_s6  ;;  %2499 = vrot.lane.b32.xlu2 %v4636_v36, %s4533_s6  ;;  %v5317_v15 = vpop.f32.mrf.mxu0  ;;  %v4299_v36 = vld [vmem:[%s7133_s1 + $0xe8] sm:$0xff] }
 0x1f7   : > { %3900 = vmatmul.msk.bf16.gmra.mxu2 %vm501_vm14, %v4298_v30 }
 0x1f9   : > { %v5343_v23 = vpop.f32.mrf.mxu2 }
 0x1fa   : > { %7205 = vst [vmem:[#allocation45_spill] sm:$0xff] %v5343_v23 }
 0x1fc   : > { %3971 = vmatmul.msk.bf16.gmra.mxu1 %vm501_vm14, %v4305_v12  ;;  %v5337_v2 = vpop.f32.mrf.mxu1  ;;  %v5340_v22 = vpop.f32.mrf.mxu3 }
 0x1fd   : > { %3964 = vmatmul.msk.bf16.gmra.mxu0 %vm501_vm14, %v4306_v24  ;;  %7204 = vst [vmem:[#allocation44_spill] sm:$0xff] %v5340_v22 }
 0x1fe   : > { %2503 = vrot.lane.b32.xlu1 %v4631_v32, %s4533_s6  ;;  %v5332_v29 = vpop.f32.mrf.mxu0  ;;  %v4307_v32 = vld [vmem:[%s7133_s1 + $0x128] sm:$0xff] }
 0x1ff   : > { %7203 = vst [vmem:[#allocation43_spill] sm:$0xff] %v5332_v29 }
 0x201   : > { %v5361_v28 = vpop.f32.mrf.mxu2 }
 0x202   : > { %7210 = vst [vmem:[#allocation50_spill] sm:$0xff] %v5361_v28  ;;  %v4503_v28 = vld [vmem:[%s4583_s23 + $0x44] sm:$0xf] }
 0x204   : > { %v5352_v8 = vpop.f32.mrf.mxu1  ;;  %v5356_v18 = vpop.f32.mrf.mxu3 }
 0x205   : > { %3909 = vmatmul.msk.bf16.gmra.mxu3 %vm501_vm14, %v4299_v36  ;;  %7207 = vst [vmem:[#allocation47_spill] sm:$0xff] %v5352_v8 }
 0x206   : > { %v5345_v19 = vpop.f32.mrf.mxu0  ;;  %7209 = vst [vmem:[#allocation49_spill] sm:$0xff] %v5356_v18  ;;  %v4505_v18 = vld [vmem:[%s4583_s23 + $0x3c] sm:$0xff] }
 0x207   : > { %3901 = vmatmul.msk.bf16.gmra.mxu2 %vm501_vm14, %v4299_v36  ;;  %7206 = vst [vmem:[#allocation46_spill] sm:$0xff] %v5345_v19  ;;  %v4301_v36 = vld [vmem:[%s7133_s1 + $0xf8] sm:$0xff] }
 0x209   : > { %v5374_v30 = vpop.f32.mrf.mxu2 }
 0x20a   : > { %7214 = vst [vmem:[#allocation54_spill] sm:$0xff] %v5374_v30 }
 0x20c   : > { %3972 = vmatmul.msk.bf16.gmra.mxu1 %vm501_vm14, %v4306_v24  ;;  %v5367_v44 = vpop.f32.mrf.mxu1  ;;  %v5372_v43 = vpop.f32.mrf.mxu3 }
 0x20d   : > { %3965 = vmatmul.msk.bf16.gmra.mxu0 %vm501_vm14, %v4307_v32  ;;  %7212 = vst [vmem:[#allocation52_spill] sm:$0xff] %v5367_v44 }
 0x20e   : > { %v5354_v27 = vpop.f32.mrf.mxu0  ;;  %7213 = vst [vmem:[#allocation53_spill] sm:$0xff] %v5372_v43 }
 0x20f   : > { %7208 = vst [vmem:[#allocation48_spill] sm:$0xff] %v5354_v27  ;;  %v1960_v12 = vpop.permute.xlu2 %1959 }
 0x211   : > { %v5388_v25 = vpop.f32.mrf.mxu2 }
 0x212   : > { %7218 = vst [vmem:[#allocation58_spill] sm:$0xff] %v5388_v25 }
 0x214   : > { %v5385_v55 = vpop.f32.mrf.mxu3 }
 0x215   : > { %3910 = vmatmul.msk.bf16.gmra.mxu3 %vm501_vm14, %v4300_v59  ;;  %7217 = vst [vmem:[#allocation57_spill] sm:$0xff] %v5385_v55 }
 0x216   : > { %v5365_v46 = vpop.f32.mrf.mxu0 }
 0x217   : > { %3902 = vmatmul.msk.bf16.gmra.mxu2 %vm501_vm14, %v4300_v59  ;;  %7211 = vst [vmem:[#allocation51_spill] sm:$0xff] %v5365_v46  ;;  %v5383_v59 = vpop.f32.mrf.mxu1  ;;  %v1954_v16 = vpop.permute.xlu2 %1953 }
 0x218   : > { %7216 = vst [vmem:[#allocation56_spill] sm:$0xff] %v5383_v59 }
 0x21c   : > { %3973 = vmatmul.msk.bf16.gmra.mxu1 %vm501_vm14, %v4307_v32  ;;  %v5402_v52 = vpop.f32.mrf.mxu3 }
 0x21d   : > { %3966 = vmatmul.msk.bf16.gmra.mxu0 %vm501_vm14, %v4308_v60  ;;  %7221 = vst [vmem:[#allocation61_spill] sm:$0xff] %v5402_v52  ;;  %v4310_v52 = vld [vmem:[%s7133_s1 + $0x140] sm:$0xff] }
 0x21e   : > { %v5378_v24 = vpop.f32.mrf.mxu0 }
 0x21f   : > { %7215 = vst [vmem:[#allocation55_spill] sm:$0xff] %v5378_v24  ;;  %v5399_v6 = vpop.f32.mrf.mxu1 }
 0x220   : > { %7220 = vst [vmem:[#allocation60_spill] sm:$0xff] %v5399_v6 }
 0x225   : > { %3911 = vmatmul.msk.bf16.gmra.mxu3 %vm501_vm14, %v4301_v36 }
 0x226   : > { %v1962_v56 = vpop.permute.xlu0 %1961  ;;  %v5392_v51 = vpop.f32.mrf.mxu0 }
 0x227   : > { %v1969_v32 = vsel %vm1963_vm7, %v1960_v12, %v1962_v56  ;;  %3903 = vmatmul.msk.bf16.gmra.mxu2 %vm501_vm14, %v4301_v36  ;;  %7219 = vst [vmem:[#allocation59_spill] sm:$0xff] %v5392_v51  ;;  %v1948_v36 = vpop.permute.xlu2 %1947  ;;  %v5410_v25 = vpop.f32.mrf.mxu1 }
 0x228   : > { %v1958_v39 = vpop.permute.xlu1 %1957  ;;  %2054 = vmatpush.bf16.msrb.mxu3 %v1969_v32  ;;  %v5405_v32 = vpop.f32.mrf.mxu2  ;;  %7224 = vst [vmem:[#allocation64_spill] sm:$0xff] %v5410_v25 }
 0x229   : > { %v1968_v61 = vsel %vm1963_vm7, %v1958_v39, %v1960_v12  ;;  %7222 = vst [vmem:[#allocation62_spill] sm:$0xff] %v5405_v32 }
 0x22a   : > { %2005 = vmatpush.bf16.msrb.mxu2 %v1968_v61 }
 0x22c   : > { %3974 = vmatmul.msk.bf16.gmra.mxu1 %vm501_vm14, %v4308_v60 }
 0x22d   : > { %3967 = vmatmul.msk.bf16.gmra.mxu0 %vm501_vm14, %v4309_v47 }
 0x22e   : > { %v1956_v56 = vpop.permute.xlu0 %1955  ;;  %v5407_v12 = vpop.f32.mrf.mxu0 }
 0x22f   : > { %v1967_v51 = vsel %vm1963_vm7, %v1954_v16, %v1956_v56  ;;  %7223 = vst [vmem:[#allocation63_spill] sm:$0xff] %v5407_v12  ;;  %v2272_v12 = vpop.permute.xlu2 %2271 }
 0x230   : > { %v1952_v39 = vpop.permute.xlu1 %1951  ;;  %2055 = vmatpush.bf16.msrb.mxu3 %v1967_v51 }
 0x231   : > { %v1966_v61 = vsel %vm1963_vm7, %v1952_v39, %v1954_v16 }
 0x232   : > { %2006 = vmatpush.bf16.msrb.mxu2 %v1966_v61 }
 0x236   : > { %v1950_v60 = vpop.permute.xlu0 %1949 }
 0x237   : > { %v1965_v55 = vsel %vm1963_vm7, %v1948_v36, %v1950_v60  ;;  %v2266_v6 = vpop.permute.xlu2 %2265 }
 0x238   : > { %v1946_v24 = vpop.permute.xlu1 %1945  ;;  %2056 = vmatpush.bf16.msrb.mxu3 %v1965_v55  ;;  %v5417_v32 = vpop.f32.mrf.mxu3 }
 0x239   : > { %v1964_v56 = vsel %vm1963_vm7, %v1946_v24, %v1948_v36  ;;  %v5419_v51 = vpop.f32.mrf.mxu2  ;;  %v5427_v24 = vpop.f32.mrf.mxu1 }
 0x23a   : > { %2007 = vmatpush.bf16.msrb.mxu2 %v1964_v56  ;;  %v5421_v16 = vpop.f32.mrf.mxu0  ;;  %7225 = vst [vmem:[#allocation65_spill] sm:$0xff] %v5427_v24 }
 0x23b   : > { %4032 = vmatmul.msk.bf16.vlgmr.msrb.gmra.mxu3 %vm501_vm14, %v4310_v52 }
 0x23c   : > { %3975 = vmatmul.msk.bf16.gmra.mxu1 %vm501_vm14, %v4309_v47 }
 0x23d   : > { %4024 = vmatmul.msk.bf16.vlgmr.msrb.gmra.mxu2 %vm501_vm14, %v4310_v52 }
 0x23e   : > { %v2274_v39 = vpop.permute.xlu0 %2273 }
 0x23f   : > { %v2281_v55 = vsel %vm2275_vm9, %v2272_v12, %v2274_v39  ;;  %v4311_v39 = vld [vmem:[%s7133_s1 + $0x148] sm:$0xff] }
 0x240   : > { %v2270_v61 = vpop.permute.xlu1 %2269  ;;  %2366 = vmatpush.bf16.msrb.mxu1 %v2281_v55  ;;  %v5430_v60 = vpop.f32.mrf.mxu3 }
 0x241   : > { %v2280_v36 = vsel %vm2275_vm9, %v2270_v61, %v2272_v12  ;;  %7226 = vst [vmem:[#allocation66_spill] sm:$0xff] %v5430_v60  ;;  %v5432_v56 = vpop.f32.mrf.mxu2 }
 0x242   : > { %7227 = vst [vmem:[#allocation67_spill] sm:$0xff] %v5432_v56  ;;  %2317 = vmatpush.bf16.msrb.mxu0 %v2280_v36  ;;  %v5434_v25 = vpop.f32.mrf.mxu0 }
 0x243   : > { %7228 = vst [vmem:[#allocation68_spill] sm:$0xff] %v5434_v25 }
 0x246   : > { %v2268_v47 = vpop.permute.xlu0 %2267 }
 0x247   : > { %v2279_v52 = vsel %vm2275_vm9, %v2266_v6, %v2268_v47  ;;  %v2260_v47 = vpop.permute.xlu2 %2259 }
 0x248   : > { %v2264_v55 = vpop.permute.xlu1 %2263  ;;  %2367 = vmatpush.bf16.msrb.mxu1 %v2279_v52  ;;  %v5441_v12 = vpop.f32.mrf.mxu3 }
 0x249   : > { %v2278_v24 = vsel %vm2275_vm9, %v2264_v55, %v2266_v6  ;;  %7229 = vst [vmem:[#allocation69_spill] sm:$0xff] %v5441_v12  ;;  %v5443_v61 = vpop.f32.mrf.mxu2  ;;  %v5445_v36 = vpop.f32.mrf.mxu1  ;;  %v4318_v6 = vld [vmem:[%s7133_s1 + $0x180] sm:$0xff] }
 0x24a   : > { %2318 = vmatpush.bf16.msrb.mxu0 %v2278_v24  ;;  %v5447_v25 = vpop.f32.mrf.mxu0 }
 0x24b   : > { %7230 = vst [vmem:[#allocation70_spill] sm:$0xff] %v5447_v25  ;;  %4033 = vmatmul.msk.bf16.gmra.mxu3 %vm501_vm14, %v4311_v39  ;;  %v4506_v25 = vld [vmem:[%s4583_s23 + $0x20] sm:$0xf] }
 0x24d   : > { %4025 = vmatmul.msk.bf16.gmra.mxu2 %vm501_vm14, %v4311_v39 }
 0x24e   : > { %v2262_v56 = vpop.permute.xlu0 %2261 }
 0x24f   : > { %v2277_v60 = vsel %vm2275_vm9, %v2260_v47, %v2262_v56  ;;  %v4312_v56 = vld [vmem:[%s7133_s1 + $0x150] sm:$0xff] }
 0x250   : > { %v2258_v52 = vpop.permute.xlu1 %2257  ;;  %2368 = vmatpush.bf16.msrb.mxu1 %v2277_v60  ;;  %v5456_v55 = vpop.f32.mrf.mxu3 }
 0x251   : > { %v2276_v24 = vsel %vm2275_vm9, %v2258_v52, %v2260_v47  ;;  %7231 = vst [vmem:[#allocation71_spill] sm:$0xff] %v5456_v55  ;;  %v5458_v30 = vpop.f32.mrf.mxu2  ;;  %v5460_v43 = vpop.f32.mrf.mxu1 }
 0x252   : > { %7232 = vst [vmem:[#allocation72_spill] sm:$0xff] %v5458_v30  ;;  %2319 = vmatpush.bf16.msrb.mxu0 %v2276_v24  ;;  %v5462_v39 = vpop.f32.mrf.mxu0 }
 0x253   : > { %7233 = vst [vmem:[#allocation73_spill] sm:$0xff] %v5460_v43  ;;  %4096 = vmatmul.msk.bf16.vlgmr.msrb.gmra.mxu1 %vm501_vm14, %v4318_v6 }
 0x254   : > { %7234 = vst [vmem:[#allocation74_spill] sm:$0xff] %v5462_v39 }
 0x255   : > { %4088 = vmatmul.msk.bf16.vlgmr.msrb.gmra.mxu0 %vm501_vm14, %v4318_v6 }
 0x258   : > { %v2685_v60 = vpop.permute.xlu1 %2684  ;;  %v5469_v52 = vpop.f32.mrf.mxu3 }
 0x259   : > { %v2686_v47 = vrot.slane %v2685_v60, 4  ;;  %7235 = vst [vmem:[#allocation75_spill] sm:$0xff] %v5469_v52  ;;  %v5473_v24 = vpop.f32.mrf.mxu1 }
 0x25a   : > { %v5471_v55 = vpop.f32.mrf.mxu2  ;;  %7237 = vst [vmem:[#allocation77_spill] sm:$0xff] %v5473_v24  ;;  %v5476_v6 = vpop.f32.mrf.mxu0  ;;  %v4507_v24 = vld [vmem:[%s4583_s23 + $0x2c] sm:$0xf] }
 0x25b   : > { %7236 = vst [vmem:[#allocation76_spill] sm:$0xff] %v5471_v55  ;;  %v2688_v30 = vsel %vm2687_vm10, %v2686_v47, %v2685_v60  ;;  %v2696_v39 = vunpack.c.l.b16 %v2686_v47  ;;  %v2697_v43 = vunpack.c.h.b16 %v2686_v47  ;;  %4034 = vmatmul.msk.bf16.gmra.mxu3 %vm501_vm14, %v4312_v56 }
 0x25c   : > { %7238 = vst [vmem:[#allocation78_spill] sm:$0xff] %v5476_v6  ;;  %v2689_v46 = vunpack.c.l.b16 %v2688_v30  ;;  %v2690_v59 = vunpack.c.h.b16 %v2688_v30  ;;  %v4502_v30 = vld [vmem:[%s4583_s23 + $0x38] sm:$0xf] }
 0x25d   : > { %vm2700_vm11 = vcmp.ne.s32.totalorder %v2696_v39, %v4648_v40  ;;  %vm2701_vm12 = vcmp.ne.s32.totalorder %v2697_v43, %v4651_v41  ;;  %4026 = vmatmul.msk.bf16.gmra.mxu2 %vm501_vm14, %v4312_v56 }
 0x25e   : > { %vm2693_vm13 = vcmp.ne.s32.totalorder %v2689_v46, %v4648_v40  ;;  %vm2694_vm15 = vcmp.ne.s32.totalorder %v2690_v59, %v4651_v41  ;;  %vm5483_vm0 = vmpackc.low %vm2701_vm12, %vm2700_vm11  ;;  %v4319_v40 = vld [vmem:[%s7133_s1 + $0x188] sm:$0xff]  ;;  %v4504_v59 = vld [vmem:[%s4583_s23 + $0x30] sm:$0xff] }
 0x25f   : > { %vm5487_vm1 = vmpackc.low %vm2694_vm15, %vm2693_vm13  ;;  %v2712_v39 = vsel %vm5483_vm0, %v4502_v30, 0  ;;  %v2714_v43 = vsel %vm5483_vm0, %v4503_v28, 0 }
 0x260   : > { %v2798_v41 = vunpack.c.l.b16 %v2712_v39  ;;  %v2801_v46 = vunpack.c.l.b16 %v2714_v43  ;;  %v2711_v56 = vsel %vm5487_vm1, %v4504_v59, 0  ;;  %v2713_v30 = vsel %vm5487_vm1, %v4505_v18, 0  ;;  %v5506_v22 = vpop.f32.mrf.mxu3 }
 0x261   : > { %v2797_v27 = vunpack.c.h.b16 %v2711_v56  ;;  %v2800_v44 = vunpack.c.h.b16 %v2713_v30  ;;  %v2796_v23 = vunpack.c.l.b16 %v2711_v56  ;;  %v2799_v28 = vunpack.c.l.b16 %v2713_v30  ;;  %7243 = vst [vmem:[#allocation79_spill] sm:$0xff] %v5506_v22  ;;  %v5510_v6 = vpop.f32.mrf.mxu1 }
 0x262   : > { %v2810_v39 = vpack.c.b16 %v2801_v46, %v2798_v41  ;;  %v5508_v43 = vpop.f32.mrf.mxu2  ;;  %7245 = vst [vmem:[#allocation81_spill] sm:$0xff] %v5510_v6  ;;  %v2708_v18 = vsel %vm5483_vm0, %v4506_v25, 0  ;;  %v2710_v56 = vsel %vm5483_vm0, %v4507_v24, 0  ;;  %v5519_v30 = vpop.f32.mrf.mxu0  ;;  %v4508_v41 = vld [vmem:[%s4583_s23 + $0x18] sm:$0xff]  ;;  %v4511_v6 = vld [vmem:[%s4583_s23 + $0x14] sm:$0xf] }
 0x263   : > { %7244 = vst [vmem:[#allocation80_spill] sm:$0xff] %v5508_v43  ;;  %4097 = vmatmul.msk.bf16.gmra.mxu1 %vm501_vm14, %v4319_v40  ;;  %v2809_v59 = vpack.c.b16 %v2800_v44, %v2797_v27  ;;  %v2808_v19 = vpack.c.b16 %v2799_v28, %v2796_v23  ;;  %v2707_v46 = vsel %vm5487_vm1, %v4508_v41, 0  ;;  %v4509_v43 = vld [vmem:[%s4583_s23 + $0x24] sm:$0xff]  ;;  %v2792_v25 = vunpack.c.l.b16 %v2708_v18  ;;  %v4313_v44 = vld [vmem:[%s7133_s1 + $0x158] sm:$0xff] }
 0x264   : > { %7246 = vst [vmem:[#allocation82_spill] sm:$0xff] %v5519_v30  ;;  %2827 = vrot.lane.b32.xlu1 %v2810_v39, %s4535_s14  ;;  %v2709_v23 = vsel %vm5487_vm1, %v4509_v43, 0  ;;  %v2795_v27 = vunpack.c.l.b16 %v2710_v56  ;;  %v2791_v24 = vunpack.c.h.b16 %v2707_v46  ;;  %v2790_v39 = vunpack.c.l.b16 %v2707_v46  ;;  %v4510_v56 = vld [vmem:[%s4583_s23 + $0x8] sm:$0xf] }
 0x265   : > { %2825 = vrot.lane.b32.xlu0 %v2809_v59, %s4535_s14  ;;  %2823 = vrot.lane.b32.xlu2 %v2808_v19, %s4535_s14  ;;  %v2794_v28 = vunpack.c.h.b16 %v2709_v23  ;;  %v2793_v43 = vunpack.c.l.b16 %v2709_v23  ;;  %v2704_v22 = vsel %vm5483_vm0, %v4510_v56, 0  ;;  %v2706_v46 = vsel %vm5483_vm0, %v4511_v6, 0  ;;  %v4512_v23 = vld [vmem:[%s4583_s23] sm:$0xff] }
 0x266   : > { %4089 = vmatmul.msk.bf16.gmra.mxu0 %vm501_vm14, %v4319_v40  ;;  %v2807_v59 = vpack.c.b16 %v2795_v27, %v2792_v25  ;;  %v2703_v25 = vsel %vm5487_vm1, %v4512_v23, 0  ;;  %v4513_v27 = vld [vmem:[%s4583_s23 + $0xc] sm:$0xff]  ;;  %v2786_v60 = vunpack.c.l.b16 %v2704_v22  ;;  %v2789_v6 = vunpack.c.l.b16 %v2706_v46 }
 0x267   : > { %v2806_v40 = vpack.c.b16 %v2794_v28, %v2791_v24  ;;  %v2805_v18 = vpack.c.b16 %v2793_v43, %v2790_v39  ;;  %v4320_v28 = vld [vmem:[%s7133_s1 + $0x190] sm:$0xff]  ;;  %v2785_v39 = vunpack.c.h.b16 %v2703_v25 }
 0x268   : > { %v5534_v41 = vpop.f32.mrf.mxu3  ;;  %v2804_v23 = vpack.c.b16 %v2789_v6, %v2786_v60  ;;  %v301_v60 = vld [vmem:[%s7134_s2 + $0x8] sm:$0xff]  ;;  %v300_v6 = vld [vmem:[%s7134_s2] sm:$0xff] }
 0x269   : > { %v5538_v30 = vpop.f32.mrf.mxu1 }
 0x26a   : > { %v5536_v19 = vpop.f32.mrf.mxu2  ;;  %7247 = vst [vmem:[#allocation83_spill] sm:$0xff] %v5538_v30  ;;  %v2705_v30 = vsel %vm5487_vm1, %v4513_v27, 0  ;;  %v5556_v24 = vpop.f32.mrf.mxu0 }
 0x26b   : > { %4035 = vmatmul.msk.bf16.gmra.mxu3 %vm501_vm14, %v4313_v44  ;;  %v2788_v43 = vunpack.c.h.b16 %v2705_v30  ;;  %v2787_v56 = vunpack.c.l.b16 %v2705_v30  ;;  %v4314_v30 = vld [vmem:[%s7133_s1 + $0x160] sm:$0xff] }
 0x26c   : > { %2821 = vrot.lane.b32.xlu1 %v2807_v59, %s4535_s14  ;;  %v2784_v59 = vunpack.c.l.b16 %v2703_v25  ;;  %v302_v25 = vld [vmem:[%s7134_s2 + $0x10] sm:$0xff] }
 0x26d   : > { %2819 = vrot.lane.b32.xlu0 %v2806_v40, %s4535_s14  ;;  %2817 = vrot.lane.b32.xlu2 %v2805_v18, %s4535_s14 }
 0x26e   : > { %4027 = vmatmul.msk.bf16.gmra.mxu2 %vm501_vm14, %v4313_v44  ;;  %v2803_v44 = vpack.c.b16 %v2788_v43, %v2785_v39  ;;  %v2802_v22 = vpack.c.b16 %v2787_v56, %v2784_v59  ;;  %v4321_v43 = vld [vmem:[%s7133_s1 + $0x198] sm:$0xff]  ;;  %v304_v59 = vld [vmem:[%s7134_s2 + $0x20] sm:$0xff] }
 0x270   : > { %v5562_v47 = vpop.f32.mrf.mxu3 }
 0x271   : > { %7248 = vst [vmem:[#allocation84_spill] sm:$0xff] %v5562_v47  ;;  %v5566_v18 = vpop.f32.mrf.mxu1 }
 0x272   : > { %v5564_v40 = vpop.f32.mrf.mxu2  ;;  %7250 = vst [vmem:[#allocation86_spill] sm:$0xff] %v5566_v18  ;;  %v5576_v46 = vpop.f32.mrf.mxu0 }
 0x273   : > { %7249 = vst [vmem:[#allocation85_spill] sm:$0xff] %v5564_v40  ;;  %4098 = vmatmul.msk.bf16.gmra.mxu1 %vm501_vm14, %v4320_v28  ;;  %v2516_v40 = vpop.permute.xlu1 %2515 }
 0x274   : > { %2815 = vrot.lane.b32.xlu1 %v2804_v23, %s4535_s14  ;;  %7251 = vst [vmem:[#allocation87_spill] sm:$0xff] %v5576_v46  ;;  %v4315_v46 = vld [vmem:[%s7133_s1 + $0x168] sm:$0xff] }
 0x275   : > { %2813 = vrot.lane.b32.xlu0 %v2803_v44, %s4535_s14  ;;  %2811 = vrot.lane.b32.xlu2 %v2802_v22, %s4535_s14  ;;  %v306_v44 = vld [vmem:[%s7134_s2 + $0x30] sm:$0xff]  ;;  %v303_v22 = vld [vmem:[%s7134_s2 + $0x18] sm:$0xff]  ;;  %s6864_s14 = scalar_lea.vmem %s7137_s5, %s6523_s9 }
 0x276   : > { %4090 = vmatmul.msk.bf16.gmra.mxu0 %vm501_vm14, %v4320_v28 }
 0x278   : > { %v5581_v27 = vpop.f32.mrf.mxu3 }
 0x279   : > { %v5591_v39 = vpop.f32.mrf.mxu1 }
 0x27a   : > { %v5589_v28 = vpop.f32.mrf.mxu2  ;;  %v5603_v23 = vpop.f32.mrf.mxu0 }
 0x27b   : > { %4036 = vmatmul.msk.bf16.gmra.mxu3 %vm501_vm14, %v4314_v30  ;;  %7253 = vst [vmem:[#allocation89_spill] sm:$0xff] %v5603_v23 }
 0x27c   : > { %328 = vperm.xlu1 %4373, %v302_v25  }
 0x27d   : > { %323 = vperm.xlu0 %4372, %v301_v60   ;;  %318 = vperm.xlu2 %4371, %v300_v6   ;;  %v2514_v60 = vpop.permute.xlu0 %2513  ;;  %v2512_v6 = vpop.permute.xlu2 %2511 }
 0x27e   : > { %4028 = vmatmul.msk.bf16.gmra.mxu2 %vm501_vm14, %v4314_v30  ;;  %v2522_v18 = vsel %vm2517_vm2, %v2512_v6, %v2514_v60  ;;  %v2523_v47 = vsel %vm2517_vm2, %v2514_v60, %v2516_v40  ;;  %v4322_v60 = vld [vmem:[%s7133_s1 + $0x1a0] sm:$0xff] }
 0x27f   : > { %2559 = vmatpush.bf16.msra.mxu2 %v2522_v18  ;;  %2608 = vmatpush.bf16.msra.mxu3 %v2523_v47 }
 0x280   : > { %v5601_v56 = vpop.f32.mrf.mxu3 }
 0x281   : > { %7252 = vst [vmem:[#allocation88_spill] sm:$0xff] %v5601_v56  ;;  %v5613_v25 = vpop.f32.mrf.mxu1 }
 0x282   : > { %v5611_v30 = vpop.f32.mrf.mxu2  ;;  %7255 = vst [vmem:[#allocation91_spill] sm:$0xff] %v5613_v25  ;;  %v5638_v40 = vpop.f32.mrf.mxu0 }
 0x283   : > { %7254 = vst [vmem:[#allocation90_spill] sm:$0xff] %v5611_v30  ;;  %4099 = vmatmul.msk.bf16.gmra.mxu1 %vm501_vm14, %v4321_v43 }
 0x284   : > { %338 = vperm.xlu1 %4373, %v304_v59   ;;  %v307_v59 = vld [vmem:[%s7134_s2 + $0x38] sm:$0xff]  ;;  %7258 = vst [vmem:[#allocation94_spill] sm:$0xff] %v5638_v40 }
 0x285   : > { %348 = vperm.xlu0 %4372, %v306_v44   ;;  %333 = vperm.xlu2 %4371, %v303_v22   ;;  %v305_v22 = vld [vmem:[%s7134_s2 + $0x28] sm:$0xff]  ;;  %v2508_v47 = vpop.permute.xlu0 %2507  ;;  %v2506_v18 = vpop.permute.xlu2 %2505 }
 0x286   : > { %4091 = vmatmul.msk.bf16.gmra.mxu0 %vm501_vm14, %v4321_v43  ;;  %v309_v43 = vld [vmem:[%s7134_s2 + $0x48] sm:$0xff]  ;;  %v2520_v30 = vsel %vm2517_vm2, %v2506_v18, %v2508_v47 }
 0x287   : > { %2560 = vmatpush.bf16.msra.mxu2 %v2520_v30 }
 0x288   : > { %v5625_v44 = vpop.f32.mrf.mxu3 }
 0x289   : > { %7256 = vst [vmem:[#allocation92_spill] sm:$0xff] %v5625_v44  ;;  %v5635_v25 = vpop.f32.mrf.mxu1  ;;  %v2510_v44 = vpop.permute.xlu1 %2509 }
 0x28a   : > { %v5633_v6 = vpop.f32.mrf.mxu2  ;;  %v5660_v40 = vpop.f32.mrf.mxu0 }
 0x28b   : > { %7257 = vst [vmem:[#allocation93_spill] sm:$0xff] %v5633_v6  ;;  %4037 = vmatmul.msk.bf16.gmra.mxu3 %vm501_vm14, %v4315_v46  ;;  %v310_v6 = vld [vmem:[%s7134_s2 + $0x50] sm:$0xff] }
 0x28c   : > { %353 = vperm.xlu1 %4373, %v307_v59   ;;  %v312_v59 = vld [vmem:[%s7134_s2 + $0x60] sm:$0xff]  ;;  %7262 = vst [vmem:[#allocation98_spill] sm:$0xff] %v5660_v40 }
 0x28d   : > { %363 = vperm.xlu0 %4372, %v309_v43   ;;  %343 = vperm.xlu2 %4371, %v305_v22   ;;  %v2502_v48 = vpop.permute.xlu0 %2501  ;;  %v2500_v52 = vpop.permute.xlu2 %2499 }
 0x28e   : > { %4029 = vmatmul.msk.bf16.gmra.mxu2 %vm501_vm14, %v4315_v46  ;;  %v308_v46 = vld [vmem:[%s7134_s2 + $0x40] sm:$0xff] }
 0x290   : > { %v5647_v8 = vpop.f32.mrf.mxu3 }
 0x291   : > { %7259 = vst [vmem:[#allocation95_spill] sm:$0xff] %v5647_v8  ;;  %v5657_v22 = vpop.f32.mrf.mxu1  ;;  %v2521_v8 = vsel %vm2517_vm2, %v2508_v47, %v2510_v44  ;;  %v315_v47 = vld [vmem:[%s7134_s2 + $0x78] sm:$0xff] }
 0x292   : > { %v5655_v43 = vpop.f32.mrf.mxu2  ;;  %7261 = vst [vmem:[#allocation97_spill] sm:$0xff] %v5657_v22  ;;  %2609 = vmatpush.bf16.msra.mxu3 %v2521_v8  ;;  %v2504_v22 = vpop.permute.xlu1 %2503  ;;  %v311_v8 = vld [vmem:[%s7134_s2 + $0x58] sm:$0xff] }
 0x293   : > { %7260 = vst [vmem:[#allocation96_spill] sm:$0xff] %v5655_v43  ;;  %4100 = vmatmul.msk.bf16.gmra.mxu1 %vm501_vm14, %v4322_v60  ;;  %v4316_v43 = vld [vmem:[%s7133_s1 + $0x170] sm:$0xff]  ;;  %v2519_v44 = vsel %vm2517_vm2, %v2502_v48, %v2504_v22 }
 0x294   : > { %368 = vperm.xlu1 %4373, %v310_v6   ;;  %v2518_v6 = vsel %vm2517_vm2, %v2500_v52, %v2502_v48  ;;  %v4323_v48 = vld [vmem:[%s7133_s1 + $0x1a8] sm:$0xff]  ;;  %v5690_v52 = vpop.f32.mrf.mxu0  ;;  %v314_v22 = vld [vmem:[%s7134_s2 + $0x70] sm:$0xff] }
 0x295   : > { %378 = vperm.xlu0 %4372, %v312_v59   ;;  %358 = vperm.xlu2 %4371, %v308_v46   ;;  %v313_v59 = vld [vmem:[%s7134_s2 + $0x68] sm:$0xff]  ;;  %7266 = vst [vmem:[#allocation102_spill] sm:$0xff] %v5690_v52 }
 0x296   : > { %4092 = vmatmul.msk.bf16.gmra.mxu0 %vm501_vm14, %v4322_v60  ;;  %2561 = vmatpush.bf16.msra.mxu2 %v2518_v6 }
 0x297   : > { %2610 = vmatpush.bf16.msra.mxu3 %v2519_v44 }
 0x298   : > { %v5672_v60 = vpop.f32.mrf.mxu3 }
 0x299   : > { %7263 = vst [vmem:[#allocation99_spill] sm:$0xff] %v5672_v60  ;;  %v5683_v18 = vpop.f32.mrf.mxu1 }
 0x29a   : > { %v5681_v30 = vpop.f32.mrf.mxu2  ;;  %7265 = vst [vmem:[#allocation101_spill] sm:$0xff] %v5683_v18 }
 0x29b   : > { %7264 = vst [vmem:[#allocation100_spill] sm:$0xff] %v5681_v30  ;;  %4038 = vmatmul.msk.bf16.gmra.mxu3 %vm501_vm14, %v4316_v43 }
 0x29c   : > { %383 = vperm.xlu1 %4373, %v313_v59   ;;  %v5706_v59 = vpop.f32.mrf.mxu0 }
 0x29d   : > { %393 = vperm.xlu0 %4372, %v315_v47   ;;  %373 = vperm.xlu2 %4371, %v311_v8   ;;  %7270 = vst [vmem:[#allocation106_spill] sm:$0xff] %v5706_v59 }
 0x29e   : > { %4030 = vmatmul.msk.bf16.gmra.mxu2 %vm501_vm14, %v4316_v43  ;;  %v4317_v43 = vld [vmem:[%s7133_s1 + $0x178] sm:$0xff] }
 0x2a0   : > { %v5692_v46 = vpop.f32.mrf.mxu3 }
 0x2a1   : > { %7267 = vst [vmem:[#allocation103_spill] sm:$0xff] %v5692_v46  ;;  %v5699_v6 = vpop.f32.mrf.mxu1 }
 0x2a2   : > { %v5697_v30 = vpop.f32.mrf.mxu2  ;;  %7269 = vst [vmem:[#allocation105_spill] sm:$0xff] %v5699_v6 }
 0x2a3   : > { %7268 = vst [vmem:[#allocation104_spill] sm:$0xff] %v5697_v30  ;;  %4101 = vmatmul.msk.bf16.gmra.mxu1 %vm501_vm14, %v4323_v48 }
 0x2a4   : > { %v5724_v46 = vpop.f32.mrf.mxu0 }
 0x2a5   : > { %388 = vperm.xlu2 %4371, %v314_v22   ;;  %7276 = vst [vmem:[#allocation112_spill] sm:$0xff] %v5724_v46 }
 0x2a6   : > { %4093 = vmatmul.msk.bf16.gmra.mxu0 %vm501_vm14, %v4323_v48  ;;  %v4324_v48 = vld [vmem:[%s7133_s1 + $0x1b0] sm:$0xff] }
 0x2a8   : > { %v5708_v44 = vpop.f32.mrf.mxu3 }
 0x2a9   : > { %7271 = vst [vmem:[#allocation107_spill] sm:$0xff] %v5708_v44  ;;  %v5710_v47 = vpop.f32.mrf.mxu1 }
 0x2aa   : > { %7272 = vst [vmem:[#allocation108_spill] sm:$0xff] %v5710_v47  ;;  %v5713_v8 = vpop.f32.mrf.mxu2 }
 0x2ab   : > { %4039 = vmatmul.msk.bf16.gmra.mxu3 %vm501_vm14, %v4317_v43  ;;  %7273 = vst [vmem:[#allocation109_spill] sm:$0xff] %v5713_v8 }
 0x2ac   : > { %v5736_v59 = vpop.f32.mrf.mxu0 }
 0x2ad   : > { %7279 = vst [vmem:[#allocation115_spill] sm:$0xff] %v5736_v59 }
 0x2ae   : > { %4031 = vmatmul.msk.bf16.gmra.mxu2 %vm501_vm14, %v4317_v43  ;;  %v4326_v43 = vld [vmem:[%s7133_s1 + $0x1c0] sm:$0xff] }
 0x2b0   : > { %v5722_v30 = vpop.f32.mrf.mxu3 }
 0x2b1   : > { %v5719_v22 = vpop.f32.mrf.mxu1  ;;  %7275 = vst [vmem:[#allocation111_spill] sm:$0xff] %v5722_v30 }
 0x2b2   : > { %7274 = vst [vmem:[#allocation110_spill] sm:$0xff] %v5719_v22  ;;  %v5727_v44 = vpop.f32.mrf.mxu2 }
 0x2b3   : > { %4102 = vmatmul.msk.bf16.gmra.mxu1 %vm501_vm14, %v4324_v48  ;;  %7277 = vst [vmem:[#allocation113_spill] sm:$0xff] %v5727_v44 }
 0x2b4   : > { %v5752_v60 = vpop.f32.mrf.mxu0 }
 0x2b5   : > { %7283 = vst [vmem:[#allocation119_spill] sm:$0xff] %v5752_v60 }
 0x2b6   : > { %4094 = vmatmul.msk.bf16.gmra.mxu0 %vm501_vm14, %v4324_v48  ;;  %v4325_v48 = vld [vmem:[%s7133_s1 + $0x1b8] sm:$0xff] }
 0x2b9   : > { %v5733_v8 = vpop.f32.mrf.mxu1 }
 0x2ba   : > { %7278 = vst [vmem:[#allocation114_spill] sm:$0xff] %v5733_v8 }
 0x2bb   : > { %4160 = vmatmul.msk.bf16.vlgmr.msra.gmra.mxu3 %vm501_vm14, %v4326_v43 }
 0x2be   : > { %4152 = vmatmul.msk.bf16.vlgmr.msra.gmra.mxu2 %vm501_vm14, %v4326_v43  ;;  %v2058_v22 = vpop.f32.mrf.mxu3  ;;  %v4327_v43 = vld [vmem:[%s7133_s1 + $0x1c8] sm:$0xff] }
 0x2bf   : > { %v2824_v30 = vpop.permute.xlu2 %2823 }
 0x2c0   : > { %v2009_v46 = vpop.f32.mrf.mxu2 }
 0x2c1   : > { %v5745_v47 = vpop.f32.mrf.mxu1 }
 0x2c2   : > { %7281 = vst [vmem:[#allocation117_spill] sm:$0xff] %v5745_v47 }
 0x2c3   : > { %4103 = vmatmul.msk.bf16.gmra.mxu1 %vm501_vm14, %v4325_v48 }
 0x2c6   : > { %4095 = vmatmul.msk.bf16.gmra.mxu0 %vm501_vm14, %v4325_v48  ;;  %v5743_v44 = vpop.f32.mrf.mxu3 }
 0x2c7   : > { %7280 = vst [vmem:[#allocation116_spill] sm:$0xff] %v5743_v44  ;;  %v2818_v8 = vpop.permute.xlu2 %2817 }
 0x2c8   : > { %v5750_v59 = vpop.f32.mrf.mxu2 }
 0x2c9   : > { %7282 = vst [vmem:[#allocation118_spill] sm:$0xff] %v5750_v59  ;;  %v4328_v59 = vld [vmem:[%s7133_s1 + $0x1d0] sm:$0xff] }
 0x2cb   : > { %4161 = vmatmul.msk.bf16.gmra.mxu3 %vm501_vm14, %v4327_v43 }
 0x2ce   : > { %4153 = vmatmul.msk.bf16.gmra.mxu2 %vm501_vm14, %v4327_v43  ;;  %v5756_v52 = vpop.f32.mrf.mxu3 }
 0x2cf   : > { %7284 = vst [vmem:[#allocation120_spill] sm:$0xff] %v5756_v52  ;;  %v2812_v48 = vpop.permute.xlu2 %2811 }
 0x2d0   : > { %v5758_v6 = vpop.f32.mrf.mxu2  ;;  %v2370_v44 = vpop.f32.mrf.mxu1 }
 0x2d1   : > { %7285 = vst [vmem:[#allocation121_spill] sm:$0xff] %v5758_v6 }
 0x2d2   : > { %v2321_v47 = vpop.f32.mrf.mxu0 }
 0x2d6   : > { %v2828_v40 = vpop.permute.xlu1 %2827  ;;  %v5760_v18 = vpop.f32.mrf.mxu3 }
 0x2d7   : > { %7286 = vst [vmem:[#allocation122_spill] sm:$0xff] %v5760_v18  ;;  %v2826_v55 = vpop.permute.xlu0 %2825  ;;  %v319_v23 = vpop.permute.xlu2 %318 }
 0x2d8   : > { %v2834_v60 = vsel %vm2829_vm3, %v2824_v30, %v2826_v55  ;;  %v2835_v43 = vsel %vm2829_vm3, %v2826_v55, %v2828_v40  ;;  %v624_v52 = vadd.f32 %v4971_v11, %v319_v23  ;;  %v625_v6 = vadd.f32 %v4969_v10, %v319_v23  ;;  %v5769_v56 = vpop.f32.mrf.mxu2  ;;  %v5771_v38 = vpop.f32.mrf.mxu1 }
 0x2d9   : > { %2871 = vmatpush.bf16.msra.mxu0 %v2834_v60  ;;  %2920 = vmatpush.bf16.msra.mxu1 %v2835_v43 }
 0x2da   : > { %v905_v18 = vadd.f32 %v5044_v21, %v624_v52  ;;  %v906_v12 = vadd.f32 %v5042_v45, %v625_v6  ;;  %v5775_v29 = vpop.f32.mrf.mxu0 }
 0x2db   : > { %4162 = vmatmul.msk.bf16.gmra.mxu3 %vm501_vm14, %v4328_v59 }
 0x2dc   : > { %v1231_v55 = vadd.f32 %v5117_v42, %v905_v18  ;;  %v1232_v11 = vadd.f32 %v5115_v37, %v906_v12 }
 0x2de   : > { %v1544_v10 = vadd.f32 %v5419_v51, %v1231_v55  ;;  %v1545_v23 = vadd.f32 %v5417_v32, %v1232_v11  ;;  %4154 = vmatmul.msk.bf16.gmra.mxu2 %vm501_vm14, %v4328_v59  ;;  %v2822_v40 = vpop.permute.xlu1 %2821  ;;  %v5783_v60 = vpop.f32.mrf.mxu3 }
 0x2df   : > { %v2820_v21 = vpop.permute.xlu0 %2819  ;;  %v5795_v6 = vpop.permute.xlu2 %333 }
 0x2e0   : > { %v5785_v30 = vpop.f32.mrf.mxu2  ;;  %v5787_v45 = vpop.f32.mrf.mxu1  ;;  %v2832_v52 = vsel %vm2829_vm3, %v2818_v8, %v2820_v21  ;;  %v2833_v42 = vsel %vm2829_vm3, %v2820_v21, %v2822_v40  ;;  %v1787_v37 = vadd.f32 %v5445_v36, %v1545_v23  ;;  %v1786_v32 = vadd.f32 %v5421_v16, %v1544_v10  ;;  %v4329_v36 = vld [vmem:[%s7133_s1 + $0x1d8] sm:$0xff] }
 0x2e1   : > { %2872 = vmatpush.bf16.msra.mxu0 %v2832_v52  ;;  %2921 = vmatpush.bf16.msra.mxu1 %v2833_v42 }
 0x2e2   : > { %v2099_v12 = vadd.f32 %v2058_v22, %v1787_v37  ;;  %v2098_v18 = vadd.f32 %v2009_v46, %v1786_v32 }
 0x2e3   : > { %v5793_v51 = vpop.f32.mrf.mxu0 }
 0x2e4   : > { %v5797_v59 = vadd.f32 %v2370_v44, %v2099_v12  ;;  %v5799_v43 = vadd.f32 %v2321_v47, %v2098_v18  ;;  %v4334_v44 = vld [vmem:[%s7133_s1 + $0x200] sm:$0xff] }
 0x2e6   : > { %v2816_v55 = vpop.permute.xlu1 %2815  ;;  %v5801_v8 = vpop.f32.mrf.mxu3 }
 0x2e7   : > { %7287 = vst [vmem:[#allocation123_spill] sm:$0xff] %v5801_v8  ;;  %v2814_v11 = vpop.permute.xlu0 %2813  ;;  %v5823_v21 = vpop.permute.xlu2 %343 }
 0x2e8   : > { %v5806_v23 = vpop.f32.mrf.mxu2  ;;  %v5808_v16 = vpop.f32.mrf.mxu1  ;;  %v2830_v46 = vsel %vm2829_vm3, %v2812_v48, %v2814_v11  ;;  %v2831_v47 = vsel %vm2829_vm3, %v2814_v11, %v2816_v55  ;;  %7289 = vst [vmem:[#allocation125_spill] sm:$0xff] %v5823_v21  ;;  %v4330_v55 = vld [vmem:[%s7133_s1 + $0x1e0] sm:$0xff] }
 0x2e9   : > { %7288 = vst [vmem:[#allocation124_spill] sm:$0xff] %v5806_v23  ;;  %2873 = vmatpush.bf16.msra.mxu0 %v2830_v46  ;;  %2922 = vmatpush.bf16.msra.mxu1 %v2831_v47 }
 0x2eb   : > { %v5815_v22 = vpop.f32.mrf.mxu0  ;;  %4163 = vmatmul.msk.bf16.gmra.mxu3 %vm501_vm14, %v4329_v36 }
 0x2ec   : > { %4216 = vmatmul.msk.bf16.vlgmr.msra.gmra.mxu0 %vm501_vm14, %v4334_v44  ;;  %4224 = vmatmul.msk.bf16.vlgmr.msra.gmra.mxu1 %vm501_vm14, %v4334_v44  ;;  %v4335_v44 = vld [vmem:[%s7133_s1 + $0x208] sm:$0xff] }
 0x2ee   : > { %4155 = vmatmul.msk.bf16.gmra.mxu2 %vm501_vm14, %v4329_v36  ;;  %v329_v10 = vpop.permute.xlu1 %328  ;;  %v2073_v48 = vpop.f32.mrf.mxu3 }
 0x2ef   : > { %v5821_v40 = vpop.permute.xlu0 %323  ;;  %v359_v23 = vpop.permute.xlu2 %358 }
 0x2f0   : > { %v5825_v52 = vpop.f32.mrf.mxu1 }
 0x2f1   : > { %v2024_v42 = vpop.f32.mrf.mxu2 }
 0x2f3   : > { %v5827_v37 = vpop.f32.mrf.mxu0 }
 0x2f6   : > { %v339_v32 = vpop.permute.xlu1 %338  ;;  %v5829_v12 = vpop.f32.mrf.mxu3 }
 0x2f7   : > { %7290 = vst [vmem:[#allocation126_spill] sm:$0xff] %v5829_v12  ;;  %v349_v18 = vpop.permute.xlu0 %348 }
 0x2f8   : > { %v636_v11 = vadd.f32 %v5048_v63, %v349_v18  ;;  %v637_v36 = vadd.f32 %v5046_v54, %v349_v18  ;;  %v5836_v46 = vpop.f32.mrf.mxu1  ;;  %v641_v18 = vadd.f32 %v4947_v53, %v359_v23 }
 0x2f9   : > { %7291 = vst [vmem:[#allocation127_spill] sm:$0xff] %v5836_v46  ;;  %v5841_v47 = vpop.f32.mrf.mxu2 }
 0x2fa   : > { %7292 = vst [vmem:[#allocation128_spill] sm:$0xff] %v5841_v47  ;;  %v917_v12 = vadd.f32 %v5244_v1, %v636_v11  ;;  %v918_v8 = vadd.f32 %v5235_v31, %v637_v36  ;;  %v640_v36 = vadd.f32 %v4949_v0, %v359_v23  ;;  %v632_v23 = vadd.f32 %v5026_v57, %v339_v32  ;;  %v4331_v57 = vld [vmem:[%s7133_s1 + $0x1e8] sm:$0xff] }
 0x2fb   : > { %v5845_v21 = vpop.f32.mrf.mxu0  ;;  %4164 = vmatmul.msk.bf16.gmra.mxu3 %vm501_vm14, %v4330_v55 }
 0x2fc   : > { %7293 = vst [vmem:[#allocation129_spill] sm:$0xff] %v5845_v21  ;;  %v1243_v63 = vadd.f32 %v5281_v3, %v917_v12  ;;  %v1244_v54 = vadd.f32 %v5276_v49, %v918_v8  ;;  %4217 = vmatmul.msk.bf16.gmra.mxu0 %vm501_vm14, %v4335_v44  ;;  %4225 = vmatmul.msk.bf16.gmra.mxu1 %vm501_vm14, %v4335_v44 }
 0x2fd   : > { %v922_v49 = vadd.f32 %v5283_v4, %v641_v18  ;;  %v629_v21 = vadd.f32 %v4998_v34, %v329_v10 }
 0x2fe   : > { %4156 = vmatmul.msk.bf16.gmra.mxu2 %vm501_vm14, %v4330_v55  ;;  %v5854_v46 = vpop.permute.xlu1 %353  ;;  %v2078_v1 = vpop.f32.mrf.mxu3  ;;  %v1557_v31 = vadd.f32 %v5534_v41, %v1244_v54  ;;  %v1556_v11 = vadd.f32 %v5536_v19, %v1243_v63  ;;  %v628_v55 = vadd.f32 %v5000_v35, %v329_v10  ;;  %v921_v19 = vadd.f32 %v5285_v58, %v640_v36  ;;  %v7295_v35 = vld [vmem:[#allocation2_spill] sm:$0xff] }
 0x2ff   : > { %v364_v3 = vpop.permute.xlu0 %363  ;;  %v1248_v0 = vadd.f32 %v5322_v26, %v922_v49  ;;  %v7296_v10 = vld [vmem:[#allocation26_spill] sm:$0xff]  ;;  %v7297_v49 = vld [vmem:[#allocation3_spill] sm:$0xff] }
 0x300   : > { %v2385_v12 = vpop.f32.mrf.mxu1  ;;  %v1799_v53 = vadd.f32 %v5591_v39, %v1557_v31  ;;  %v1798_v44 = vadd.f32 %v5556_v24, %v1556_v11  ;;  %v643_v47 = vadd.f32 %v4954_v5, %v364_v3  ;;  %v909_v39 = vadd.f32 %v5096_v20, %v628_v55  ;;  %v7294_v24 = vld [vmem:[#allocation17_spill] sm:$0xff]  ;;  %v4336_v20 = vld [vmem:[%s7133_s1 + $0x210] sm:$0xff] }
 0x301   : > { %v2029_v8 = vpop.f32.mrf.mxu2  ;;  %v633_v18 = vadd.f32 %v7294_v24, %v339_v32  ;;  %v642_v31 = vadd.f32 %v7295_v35, %v364_v3  ;;  %v910_v5 = vadd.f32 %v7296_v10, %v629_v21  ;;  %v1247_v58 = vadd.f32 %v5317_v15, %v921_v19  ;;  %v7299_v55 = vld [vmem:[#allocation4_spill] sm:$0xff]  ;;  %v7305_v10 = vld [vmem:[#allocation75_spill] sm:$0xff] }
 0x302   : > { %v2111_v41 = vadd.f32 %v2073_v48, %v1799_v53  ;;  %v2110_v63 = vadd.f32 %v2024_v42, %v1798_v44  ;;  %v924_v48 = vadd.f32 %v5305_v9, %v643_v47  ;;  %v913_v32 = vadd.f32 %v5160_v17, %v632_v23  ;;  %v7301_v23 = vld [vmem:[#allocation41_spill] sm:$0xff] }
 0x303   : > { %v2336_v54 = vpop.f32.mrf.mxu0  ;;  %v1561_v21 = vadd.f32 %v5581_v27, %v1248_v0  ;;  %v1235_v47 = vadd.f32 %v5187_v33, %v909_v39  ;;  %v914_v36 = vadd.f32 %v5158_v13, %v633_v18  ;;  %v923_v3 = vadd.f32 %v5307_v14, %v642_v31  ;;  %v7303_v39 = vld [vmem:[#allocation89_spill] sm:$0xff] }
 0x304   : > { %v5868_v4 = vadd.f32 %v2385_v12, %v2111_v41  ;;  %v5875_v11 = vadd.f32 %v2336_v54, %v2110_v63  ;;  %v1236_v15 = vadd.f32 %v5175_v62, %v910_v5  ;;  %v1250_v12 = vadd.f32 %v5337_v2, %v924_v48  ;;  %v7298_v2 = vld [vmem:[#allocation43_spill] sm:$0xff]  ;;  %v7302_v63 = vld [vmem:[#allocation88_spill] sm:$0xff]  ;;  %v374_v48 = vpop.permute.xlu2 %373 }
 0x305   : > { %v1560_v17 = vadd.f32 %v5589_v28, %v1247_v58  ;;  %v1239_v33 = vadd.f32 %v5251_v50, %v913_v32  ;;  %v1803_v13 = vadd.f32 %v5635_v25, %v1561_v21  ;;  %v1548_v62 = vadd.f32 %v5443_v61, %v1235_v47  ;;  %v7300_v28 = vld [vmem:[#allocation69_spill] sm:$0xff]  ;;  %v7304_v61 = vld [vmem:[#allocation76_spill] sm:$0xff]  ;;  %v7306_v58 = vld [vmem:[#allocation42_spill] sm:$0xff] }
 0x306   : > { %v2080_v34 = vpop.f32.mrf.mxu3  ;;  %v369_v26 = vpop.permute.xlu1 %368  ;;  %v1240_v14 = vadd.f32 %v5248_v7, %v914_v36  ;;  %v1249_v27 = vadd.f32 %v7298_v2, %v923_v3  ;;  %v1549_v19 = vadd.f32 %v7300_v28, %v1236_v15  ;;  %v1563_v25 = vadd.f32 %v7302_v63, %v1250_v12  ;;  %v7308_v32 = vld [vmem:[#allocation47_spill] sm:$0xff]  ;;  %v7309_v47 = vld [vmem:[#allocation97_spill] sm:$0xff] }
 0x307   : > { %v645_v53 = vadd.f32 %v7297_v49, %v369_v26  ;;  %v644_v41 = vadd.f32 %v7299_v55, %v369_v26  ;;  %v2115_v0 = vadd.f32 %v2078_v1, %v1803_v13  ;;  %v1802_v24 = vadd.f32 %v7303_v39, %v1560_v17  ;;  %v7310_v15 = vld [vmem:[#allocation77_spill] sm:$0xff]  ;;  %v7311_v49 = vld [vmem:[#allocation70_spill] sm:$0xff] }
 0x308   : > { %v5881_v42 = vpop.f32.mrf.mxu1  ;;  %v1552_v35 = vadd.f32 %v7304_v61, %v1239_v33  ;;  %v1553_v5 = vadd.f32 %v7305_v10, %v1240_v14  ;;  %v1805_v36 = vadd.f32 %v7309_v47, %v1563_v25  ;;  %v1791_v12 = vadd.f32 %v7310_v15, %v1549_v19  ;;  %v7312_v33 = vld [vmem:[#allocation5_spill] sm:$0xff]  ;;  %v7313_v14 = vld [vmem:[#allocation120_spill] sm:$0xff]  ;;  %v7318_v25 = vld [vmem:[#allocation78_spill] sm:$0xff] }
 0x309   : > { %v2031_v9 = vpop.f32.mrf.mxu2  ;;  %v926_v50 = vadd.f32 %v7301_v23, %v645_v53  ;;  %v925_v26 = vadd.f32 %v7306_v58, %v644_v41  ;;  %v1790_v53 = vadd.f32 %v7311_v49, %v1548_v62  ;;  %v647_v13 = vadd.f32 %v7312_v33, %v374_v48  ;;  %v7315_v41 = vld [vmem:[#allocation46_spill] sm:$0xff]  ;;  %v7323_v15 = vld [vmem:[#allocation101_spill] sm:$0xff] }
 0x30a   : > { %v2103_v2 = vadd.f32 %v7313_v14, %v1791_v12  ;;  %v1794_v39 = vadd.f32 %v7318_v25, %v1552_v35  ;;  %v2117_v19 = vadd.f32 %v2080_v34, %v1805_v36  ;;  %v7320_v10 = vld [vmem:[#allocation6_spill] sm:$0xff]  ;;  %v7321_v35 = vld [vmem:[#allocation44_spill] sm:$0xff]  ;;  %v7324_v49 = vld [vmem:[#allocation45_spill] sm:$0xff] }
 0x30b   : > { %v5894_v44 = vpop.f32.mrf.mxu0  ;;  %4165 = vmatmul.msk.bf16.gmra.mxu3 %vm501_vm14, %v4331_v57  ;;  %v1252_v21 = vadd.f32 %v7308_v32, %v926_v50  ;;  %v1251_v28 = vadd.f32 %v7315_v41, %v925_v26  ;;  %v7317_v50 = vld [vmem:[#allocation83_spill] sm:$0xff]  ;;  %v4337_v26 = vld [vmem:[%s7133_s1 + $0x218] sm:$0xff] }
 0x30c   : > { %4218 = vmatmul.msk.bf16.gmra.mxu0 %vm501_vm14, %v4336_v20  ;;  %4226 = vmatmul.msk.bf16.gmra.mxu1 %vm501_vm14, %v4336_v20  ;;  %v7307_v20 = vld [vmem:[#allocation90_spill] sm:$0xff]  ;;  %v1795_v63 = vadd.f32 %v7317_v50, %v1553_v5  ;;  %v5935_v61 = vadd.f32 %v5787_v45, %v2103_v2  ;;  %v2106_v45 = vadd.f32 %v5785_v30, %v1794_v39  ;;  %v7325_v30 = vld [vmem:[#allocation52_spill] sm:$0xff]  ;;  %v7330_v50 = vld [vmem:[#allocation49_spill] sm:$0xff] }
 0x30d   : > { %v1562_v1 = vadd.f32 %v7307_v20, %v1249_v27  ;;  %v7316_v27 = vld [vmem:[#allocation94_spill] sm:$0xff]  ;;  %v928_v20 = vadd.f32 %v7321_v35, %v647_v13  ;;  %v7326_v13 = vld [vmem:[#allocation9_spill] sm:$0xff]  ;;  %v7331_v25 = vld [vmem:[#allocation95_spill] sm:$0xff] }
 0x30e   : > { %4157 = vmatmul.msk.bf16.gmra.mxu2 %vm501_vm14, %v4331_v57  ;;  %v2083_v54 = vpop.f32.mrf.mxu3  ;;  %v2114_v57 = vadd.f32 %v2029_v8, %v1802_v24  ;;  %v7314_v8 = vld [vmem:[#allocation121_spill] sm:$0xff]  ;;  %v7319_v24 = vld [vmem:[#allocation92_spill] sm:$0xff]  ;;  %v2107_v34 = vadd.f32 %v5783_v60, %v1795_v63  ;;  %v5956_v60 = vadd.f32 %v5827_v37, %v2106_v45  ;;  %v7335_v45 = vld [vmem:[#allocation11_spill] sm:$0xff] }
 0x30f   : > { %v2102_v55 = vadd.f32 %v7314_v8, %v1790_v53  ;;  %v1565_v62 = vadd.f32 %v7319_v24, %v1252_v21  ;;  %v379_v21 = vpop.permute.xlu0 %378  ;;  %v7328_v37 = vld [vmem:[#allocation48_spill] sm:$0xff] }
 0x310   : > { %v2390_v18 = vpop.f32.mrf.mxu1  ;;  %v649_v14 = vadd.f32 %v7326_v13, %v379_v21  ;;  %v7334_v35 = vld [vmem:[#allocation56_spill] sm:$0xff] }
 0x311   : > { %v2034_v7 = vpop.f32.mrf.mxu2  ;;  %v5912_v31 = vadd.f32 %v2390_v18, %v2115_v0  ;;  %v1804_v0 = vadd.f32 %v7316_v27, %v1562_v1  ;;  %v4332_v18 = vld [vmem:[%s7133_s1 + $0x1f0] sm:$0xff]  ;;  %v5942_v5 = vadd.f32 %v5793_v51, %v2102_v55  ;;  %v1807_v12 = vadd.f32 %v7323_v15, %v1565_v62  ;;  %v384_v62 = vpop.permute.xlu1 %383 }
 0x312   : > { %v930_v63 = vadd.f32 %v7330_v50, %v649_v14  ;;  %v4338_v14 = vld [vmem:[%s7133_s1 + $0x220] sm:$0xff] }
 0x313   : > { %v2341_v3 = vpop.f32.mrf.mxu0  ;;  %v2116_v47 = vadd.f32 %v2031_v9, %v1804_v0  ;;  %v1254_v9 = vadd.f32 %v7325_v30, %v928_v20  ;;  %v2119_v55 = vadd.f32 %v2083_v54, %v1807_v12  ;;  %v4333_v12 = vld [vmem:[%s7133_s1 + $0x1f8] sm:$0xff]  ;;  %v7339_v30 = vld [vmem:[#allocation102_spill] sm:$0xff] }
 0x314   : > { %v5921_v17 = vadd.f32 %v2341_v3, %v2114_v57  ;;  %v646_v57 = vadd.f32 %v7320_v10, %v374_v48  ;;  %v7322_v48 = vld [vmem:[#allocation93_spill] sm:$0xff]  ;;  %v5951_v3 = vadd.f32 %v5825_v52, %v2107_v34  ;;  %v7327_v52 = vld [vmem:[#allocation98_spill] sm:$0xff]  ;;  %v1256_v20 = vadd.f32 %v7334_v35, %v930_v63  ;;  %v7347_v35 = vld [vmem:[#allocation108_spill] sm:$0xff] }
 0x315   : > { %v1564_v36 = vadd.f32 %v7322_v48, %v1251_v28  ;;  %v7329_v28 = vld [vmem:[#allocation10_spill] sm:$0xff]  ;;  %v1567_v39 = vadd.f32 %v7331_v25, %v1254_v9  ;;  %v7343_v25 = vld [vmem:[#allocation100_spill] sm:$0xff] }
 0x316   : > { %v2085_v23 = vpop.f32.mrf.mxu3  ;;  %v927_v53 = vadd.f32 %v7324_v49, %v646_v57  ;;  %v648_v27 = vadd.f32 %v7329_v28, %v379_v21  ;;  %v651_v21 = vadd.f32 %v7335_v45, %v384_v62  ;;  %v7338_v49 = vld [vmem:[#allocation12_spill] sm:$0xff]  ;;  %v389_v28 = vpop.permute.xlu2 %388  ;;  %v7342_v50 = vld [vmem:[#allocation54_spill] sm:$0xff] }
 0x317   : > { %v1806_v2 = vadd.f32 %v7327_v52, %v1564_v36  ;;  %v7340_v52 = vld [vmem:[#allocation53_spill] sm:$0xff] }
 0x318   : > { %v2392_v58 = vpop.f32.mrf.mxu1  ;;  %v1253_v41 = vadd.f32 %v7328_v37, %v927_v53  ;;  %v650_v53 = vadd.f32 %v7338_v49, %v384_v62 }
 0x319   : > { %v2036_v1 = vpop.f32.mrf.mxu2  ;;  %v5946_v32 = vadd.f32 %v2392_v58, %v2117_v19  ;;  %v2118_v10 = vadd.f32 %v2034_v7, %v1806_v2  ;;  %v7332_v58 = vld [vmem:[#allocation50_spill] sm:$0xff]  ;;  %v7337_v7 = vld [vmem:[#allocation51_spill] sm:$0xff]  ;;  %v932_v2 = vadd.f32 %v7340_v52, %v651_v21  ;;  %v7348_v21 = vld [vmem:[#allocation16_spill] sm:$0xff] }
 0x31a   : > { %v931_v63 = vadd.f32 %v7342_v50, %v650_v53  ;;  %v7351_v53 = vld [vmem:[#allocation22_spill] sm:$0xff]  ;;  %v7353_v52 = vld [vmem:[#allocation103_spill] sm:$0xff] }
 0x31b   : > { %v2343_v51 = vpop.f32.mrf.mxu0  ;;  %4166 = vmatmul.msk.bf16.gmra.mxu3 %vm501_vm14, %v4332_v18 }
 0x31c   : > { %v5959_v33 = vadd.f32 %v2343_v51, %v2116_v47  ;;  %4219 = vmatmul.msk.bf16.gmra.mxu0 %vm501_vm14, %v4337_v26  ;;  %4227 = vmatmul.msk.bf16.gmra.mxu1 %vm501_vm14, %v4337_v26  ;;  %v929_v26 = vadd.f32 %v7332_v58, %v648_v27  ;;  %v7336_v47 = vld [vmem:[#allocation105_spill] sm:$0xff]  ;;  %v7345_v58 = vld [vmem:[#allocation15_spill] sm:$0xff] }
 0x31d   : > { %v1809_v48 = vadd.f32 %v7336_v47, %v1567_v39  ;;  %v652_v47 = vadd.f32 %v7348_v21, %v389_v28 }
 0x31e   : > { %4158 = vmatmul.msk.bf16.gmra.mxu2 %vm501_vm14, %v4332_v18  ;;  %v2088_v8 = vpop.f32.mrf.mxu3  ;;  %v7333_v18 = vld [vmem:[#allocation96_spill] sm:$0xff]  ;;  %v1255_v51 = vadd.f32 %v7337_v7, %v929_v26  ;;  %v653_v26 = vadd.f32 %v7345_v58, %v389_v28  ;;  %v7350_v7 = vld [vmem:[#allocation106_spill] sm:$0xff] }
 0x31f   : > { %v1566_v34 = vadd.f32 %v7333_v18, %v1253_v41  ;;  %v2121_v15 = vadd.f32 %v2085_v23, %v1809_v48  ;;  %v7346_v18 = vld [vmem:[#allocation60_spill] sm:$0xff]  ;;  %v7349_v48 = vld [vmem:[#allocation55_spill] sm:$0xff]  ;;  %v7358_v58 = vld [vmem:[#allocation18_spill] sm:$0xff] }
 0x320   : > { %v2395_v0 = vpop.f32.mrf.mxu1  ;;  %v1568_v39 = vadd.f32 %v7343_v25, %v1255_v51  ;;  %v7355_v28 = vld [vmem:[#allocation104_spill] sm:$0xff]  ;;  %v7356_v25 = vld [vmem:[#allocation29_spill] sm:$0xff] }
 0x321   : > { %v2039_v19 = vpop.f32.mrf.mxu2  ;;  %v5971_v24 = vadd.f32 %v2395_v0, %v2119_v55  ;;  %v1808_v9 = vadd.f32 %v7339_v30, %v1566_v34  ;;  %v7341_v55 = vld [vmem:[#allocation99_spill] sm:$0xff]  ;;  %v1258_v34 = vadd.f32 %v7346_v18, %v932_v2  ;;  %v7359_v18 = vld [vmem:[#allocation110_spill] sm:$0xff] }
 0x322   : > { %v1569_v37 = vadd.f32 %v7341_v55, %v1256_v20  ;;  %v1810_v51 = vadd.f32 %v7350_v7, %v1568_v39  ;;  %v7362_v7 = vld [vmem:[#allocation112_spill] sm:$0xff] }
 0x323   : > { %v2346_v57 = vpop.f32.mrf.mxu0  ;;  %v2120_v27 = vadd.f32 %v2036_v1, %v1808_v9  ;;  %v7352_v9 = vld [vmem:[#allocation57_spill] sm:$0xff]  ;;  %v1571_v2 = vadd.f32 %v7353_v52, %v1258_v34 }
 0x324   : > { %v5975_v54 = vadd.f32 %v2346_v57, %v2118_v10  ;;  %v7344_v10 = vld [vmem:[#allocation7_spill] sm:$0xff]  ;;  %v1811_v1 = vadd.f32 %v7347_v35, %v1569_v37 }
 0x325   : > { %v627_v57 = vadd.f32 %v7344_v10, %v5821_v40  ;;  %v7357_v10 = vld [vmem:[#allocation64_spill] sm:$0xff]  ;;  %v1813_v34 = vadd.f32 %v7359_v18, %v1571_v2  ;;  %v7371_v18 = vld [vmem:[#allocation73_spill] sm:$0xff] }
 0x326   : > { %v2090_v36 = vpop.f32.mrf.mxu3  ;;  %v2123_v45 = vadd.f32 %v2088_v8, %v1811_v1  ;;  %v7354_v8 = vld [vmem:[#allocation58_spill] sm:$0xff] }
 0x327   : > { %v908_v30 = vadd.f32 %v7351_v53, %v627_v57  ;;  %v2125_v1 = vadd.f32 %v2090_v36, %v1813_v34 }
 0x328   : > { %v2397_v13 = vpop.f32.mrf.mxu1 }
 0x329   : > { %v2041_v23 = vpop.f32.mrf.mxu2  ;;  %v5991_v41 = vadd.f32 %v2397_v13, %v2121_v15  ;;  %v1257_v15 = vadd.f32 %v7349_v48, %v931_v63  ;;  %v934_v13 = vadd.f32 %v7352_v9, %v653_v26  ;;  %v1234_v39 = vadd.f32 %v7356_v25, %v908_v30  ;;  %v7364_v30 = vld [vmem:[#allocation61_spill] sm:$0xff] }
 0x32a   : > { %v7368_v25 = vld [vmem:[#allocation13_spill] sm:$0xff] }
 0x32b   : > { %v2348_v0 = vpop.f32.mrf.mxu0  ;;  %4167 = vmatmul.msk.bf16.gmra.mxu3 %vm501_vm14, %v4333_v12  ;;  %v1570_v50 = vadd.f32 %v7355_v28, %v1257_v15  ;;  %v1260_v57 = vadd.f32 %v7357_v10, %v934_v13  ;;  %v4339_v15 = vld [vmem:[%s7133_s1 + $0x228] sm:$0xff]  ;;  %v7369_v10 = vld [vmem:[#allocation65_spill] sm:$0xff] }
 0x32c   : > { %v5996_v62 = vadd.f32 %v2348_v0, %v2120_v27  ;;  %4220 = vmatmul.msk.bf16.gmra.mxu0 %vm501_vm14, %v4338_v14  ;;  %4228 = vmatmul.msk.bf16.gmra.mxu1 %vm501_vm14, %v4338_v14  ;;  %v394_v14 = vpop.permute.xlu0 %393  ;;  %v933_v0 = vadd.f32 %v7354_v8, %v652_v47  ;;  %v7365_v13 = vld [vmem:[#allocation107_spill] sm:$0xff]  ;;  %v7366_v8 = vld [vmem:[#allocation62_spill] sm:$0xff] }
 0x32d   : > { %v655_v26 = vadd.f32 %v7358_v58, %v394_v14  ;;  %v1812_v47 = vadd.f32 %v7362_v7, %v1570_v50  ;;  %v1573_v52 = vadd.f32 %v7365_v13, %v1260_v57  ;;  %v7376_v13 = vld [vmem:[#allocation111_spill] sm:$0xff] }
 0x32e   : > { %4159 = vmatmul.msk.bf16.gmra.mxu2 %vm501_vm14, %v4333_v12  ;;  %v2093_v20 = vpop.f32.mrf.mxu3  ;;  %v2122_v12 = vadd.f32 %v2039_v19, %v1810_v51  ;;  %v7361_v19 = vld [vmem:[#allocation19_spill] sm:$0xff] }
 0x32f   : > { %v654_v48 = vadd.f32 %v7361_v19, %v394_v14  ;;  %v936_v9 = vadd.f32 %v7364_v30, %v655_v26  ;;  %v2124_v36 = vadd.f32 %v2041_v23, %v1812_v47  ;;  %v7370_v26 = vld [vmem:[#allocation114_spill] sm:$0xff]  ;;  %v7374_v47 = vld [vmem:[#allocation115_spill] sm:$0xff] }
 0x330   : > { %v2400_v49 = vpop.f32.mrf.mxu1  ;;  %v1815_v57 = vadd.f32 %v7370_v26, %v1573_v52  ;;  %v7375_v30 = vld [vmem:[#allocation27_spill] sm:$0xff] }
 0x331   : > { %v2044_v55 = vpop.f32.mrf.mxu2  ;;  %v6012_v37 = vadd.f32 %v2400_v49, %v2123_v45  ;;  %v7360_v45 = vld [vmem:[#allocation59_spill] sm:$0xff]  ;;  %v7363_v49 = vld [vmem:[#allocation66_spill] sm:$0xff]  ;;  %v935_v14 = vadd.f32 %v7366_v8, %v654_v48  ;;  %v1262_v58 = vadd.f32 %v7369_v10, %v936_v9 }
 0x332   : > { %v1259_v21 = vadd.f32 %v7360_v45, %v933_v0  ;;  %v1547_v53 = vadd.f32 %v7363_v49, %v1234_v39  ;;  %v7367_v0 = vld [vmem:[#allocation109_spill] sm:$0xff]  ;;  %v631_v39 = vadd.f32 %v7368_v25, %v5795_v6  ;;  %v7373_v48 = vld [vmem:[#allocation63_spill] sm:$0xff] }
 0x333   : > { %v2351_v27 = vpop.f32.mrf.mxu0  ;;  %v1261_v7 = vadd.f32 %v7373_v48, %v935_v14  ;;  %v1575_v52 = vadd.f32 %v7376_v13, %v1262_v58  ;;  %v7379_v25 = vld [vmem:[#allocation113_spill] sm:$0xff] }
 0x334   : > { %v6016_v63 = vadd.f32 %v2351_v27, %v2122_v12  ;;  %v1572_v28 = vadd.f32 %v7367_v0, %v1259_v21  ;;  %v1789_v23 = vadd.f32 %v7371_v18, %v1547_v53  ;;  %v7372_v21 = vld [vmem:[#allocation14_spill] sm:$0xff]  ;;  %v912_v9 = vadd.f32 %v7375_v30, %v631_v39  ;;  %v7377_v53 = vld [vmem:[#allocation116_spill] sm:$0xff]  ;;  %v7381_v39 = vld [vmem:[#allocation117_spill] sm:$0xff] }
 0x335   : > { %v630_v19 = vadd.f32 %v7372_v21, %v5795_v6  ;;  %v7378_v0 = vld [vmem:[#allocation28_spill] sm:$0xff]  ;;  %v1574_v14 = vadd.f32 %v7379_v25, %v1261_v7  ;;  %v7383_v21 = vld [vmem:[#allocation119_spill] sm:$0xff] }
 0x336   : > { %v2095_v35 = vpop.f32.mrf.mxu3  ;;  %v7384_v7 = vld [vmem:[#allocation71_spill] sm:$0xff] }
 0x337   : > { %v911_v6 = vadd.f32 %v7378_v0, %v630_v19  ;;  %v4340_v19 = vld [vmem:[%s7133_s1 + $0x230] sm:$0xff]  ;;  %v7388_v0 = vld [vmem:[#allocation122_spill] sm:$0xff] }
 0x338   : > { %v2402_v51 = vpop.f32.mrf.mxu1 }
 0x339   : > { %v2046_v2 = vpop.f32.mrf.mxu2  ;;  %v6031_v12 = vadd.f32 %v2402_v51, %v2125_v1  ;;  %v2127_v1 = vadd.f32 %v2093_v20, %v1815_v57  ;;  %v1814_v51 = vadd.f32 %v7374_v47, %v1572_v28  ;;  %v2101_v20 = vadd.f32 %v7377_v53, %v1789_v23  ;;  %v7380_v28 = vld [vmem:[#allocation33_spill] sm:$0xff]  ;;  %v7382_v23 = vld [vmem:[#allocation34_spill] sm:$0xff] }
 0x33a   : > { %v1238_v26 = vadd.f32 %v7380_v28, %v912_v9  ;;  %v1817_v57 = vadd.f32 %v7381_v39, %v1575_v52  ;;  %v7386_v52 = vld [vmem:[#allocation81_spill] sm:$0xff] }
 0x33b   : > { %v2353_v27 = vpop.f32.mrf.mxu0  ;;  %v2413_v58 = vadd.f32 %v5771_v38, %v2101_v20  ;;  %v7385_v38 = vld [vmem:[#allocation72_spill] sm:$0xff] }
 0x33c   : > { %v6035_v50 = vadd.f32 %v2353_v27, %v2124_v36  ;;  %4221 = vmatmul.msk.bf16.gmra.mxu0 %vm501_vm14, %v4339_v15  ;;  %4229 = vmatmul.msk.bf16.gmra.mxu1 %vm501_vm14, %v4339_v15  ;;  %v2126_v27 = vadd.f32 %v2044_v55, %v1814_v51  ;;  %v1237_v55 = vadd.f32 %v7382_v23, %v911_v6  ;;  %v7390_v23 = vld [vmem:[#allocation23_spill] sm:$0xff] }
 0x33d   : > { %v1551_v47 = vadd.f32 %v7384_v7, %v1238_v26  ;;  %v7389_v26 = vld [vmem:[#allocation8_spill] sm:$0xff] }
 0x33e   : > { %v2612_v34 = vpop.f32.mrf.mxu3  ;;  %v1550_v13 = vadd.f32 %v7385_v38, %v1237_v55  ;;  %v626_v39 = vadd.f32 %v7389_v26, %v5821_v40 }
 0x33f   : > { %v6045_v45 = vadd.f32 %v2612_v34, %v5797_v59  ;;  %v2129_v34 = vadd.f32 %v2095_v35, %v1817_v57 }
 0x340   : > { %v2405_v49 = vpop.f32.mrf.mxu1  ;;  %v907_v55 = vadd.f32 %v7390_v23, %v626_v39  ;;  %v7399_v23 = vld [vmem:[#allocation21_spill] sm:$0xff] }
 0x341   : > { %v2563_v15 = vpop.f32.mrf.mxu2  ;;  %v6053_v36 = vadd.f32 %v2405_v49, %v2127_v1 }
 0x342   : > { %v2652_v59 = vadd.f32 %v2563_v15, %v5799_v43  ;;  %v1816_v43 = vadd.f32 %v7383_v21, %v1574_v14  ;;  %v1793_v15 = vadd.f32 %v7386_v52, %v1551_v47 }
 0x343   : > { %v2356_v8 = vpop.f32.mrf.mxu0 }
 0x344   : > { %v6059_v10 = vadd.f32 %v2356_v8, %v2126_v27  ;;  %v2128_v30 = vadd.f32 %v2046_v2, %v1816_v43  ;;  %v7387_v27 = vld [vmem:[#allocation74_spill] sm:$0xff]  ;;  %v2105_v6 = vadd.f32 %v7388_v0, %v1793_v15 }
 0x345   : > { %v1792_v8 = vadd.f32 %v7387_v27, %v1550_v13 }
 0x346   : > { %v2614_v18 = vpop.f32.mrf.mxu3  ;;  %v2417_v28 = vadd.f32 %v5808_v16, %v2105_v6 }
 0x347   : > { %v2655_v1 = vadd.f32 %v2614_v18, %v2413_v58  ;;  %v2104_v14 = vadd.f32 %v5769_v56, %v1792_v8  ;;  %v7391_v56 = vld [vmem:[#allocation30_spill] sm:$0xff] }
 0x348   : > { %v2407_v48 = vpop.f32.mrf.mxu1  ;;  %v1233_v16 = vadd.f32 %v7391_v56, %v907_v55 }
 0x349   : > { %v2565_v51 = vpop.f32.mrf.mxu2  ;;  %v6070_v49 = vadd.f32 %v2407_v48, %v2129_v34  ;;  %v2416_v18 = vadd.f32 %v5815_v22, %v2104_v14  ;;  %v7392_v22 = vld [vmem:[#allocation67_spill] sm:$0xff]  ;;  %v7393_v48 = vld [vmem:[#allocation68_spill] sm:$0xff] }
 0x34a   : > { %v1546_v43 = vadd.f32 %v7392_v22, %v1233_v16 }
 0x34b   : > { %v2358_v9 = vpop.f32.mrf.mxu0 }
 0x34c   : > { %v6073_v35 = vadd.f32 %v2358_v9, %v2128_v30  ;;  %4222 = vmatmul.msk.bf16.gmra.mxu0 %vm501_vm14, %v4340_v19  ;;  %4230 = vmatmul.msk.bf16.gmra.mxu1 %vm501_vm14, %v4340_v19  ;;  %v1788_v19 = vadd.f32 %v7393_v48, %v1546_v43  ;;  %v7394_v9 = vld [vmem:[#allocation118_spill] sm:$0xff]  ;;  %v7400_v43 = vld [vmem:[#allocation31_spill] sm:$0xff] }
 0x34e   : > { %v2617_v53 = vpop.f32.mrf.mxu3  ;;  %v2100_v38 = vadd.f32 %v7394_v9, %v1788_v19  ;;  %v7401_v19 = vld [vmem:[#allocation35_spill] sm:$0xff] }
 0x34f   : > { %v2657_v20 = vadd.f32 %v2617_v53, %v5935_v61  ;;  %v4341_v61 = vld [vmem:[%s7133_s1 + $0x238] sm:$0xff] }
 0x350   : > { %v2412_v53 = vadd.f32 %v5775_v29, %v2100_v38 }
 0x351   : > { %v2568_v25 = vpop.f32.mrf.mxu2 }
 0x352   : > { %v2656_v2 = vadd.f32 %v2568_v25, %v5942_v5  ;;  %v2654_v0 = vadd.f32 %v2565_v51, %v2412_v53 }
 0x356   : > { %v2619_v57 = vpop.f32.mrf.mxu3 }
 0x357   : > { %v6086_v58 = vadd.f32 %v2619_v57, %v2417_v28  ;;  %v7395_v57 = vld [vmem:[#allocation125_spill] sm:$0xff] }
 0x358   : > { %v634_v55 = vadd.f32 %v7399_v23, %v7395_v57 }
 0x359   : > { %v2570_v34 = vpop.f32.mrf.mxu2 }
 0x35a   : > { %v6093_v5 = vadd.f32 %v2570_v34, %v2416_v18  ;;  %v7396_v18 = vld [vmem:[#allocation20_spill] sm:$0xff]  ;;  %v7398_v34 = vld [vmem:[#allocation25_spill] sm:$0xff] }
 0x35b   : > { %v638_v51 = vadd.f32 %v7398_v34, %v5854_v46 }
 0x35c   : > { %4223 = vmatmul.msk.bf16.gmra.mxu0 %vm501_vm14, %v4341_v61  ;;  %4231 = vmatmul.msk.bf16.gmra.mxu1 %vm501_vm14, %v4341_v61  ;;  %v7397_v61 = vld [vmem:[#allocation24_spill] sm:$0xff] }
 0x35e   : > { %v6098_v40 = vpop.f32.mrf.mxu3 }
 0x361   : > { %v6100_v21 = vpop.f32.mrf.mxu2 }
 0x366   : > { %v6104_v7 = vpop.f32.mrf.mxu3 }
 0x369   : > { %v6106_v47 = vpop.f32.mrf.mxu2  ;;  %v2875_v30 = vpop.f32.mrf.mxu0 }
 0x36a   : > { %v2964_v13 = vadd.f32 %v2875_v30, %v2652_v59  ;;  %v2924_v52 = vpop.f32.mrf.mxu1  ;;  %v635_v59 = vadd.f32 %v7396_v18, %v7395_v57  ;;  %v7405_v57 = vld [vmem:[#allocation40_spill] sm:$0xff] }
 0x36b   : > { %v2965_v15 = vadd.f32 %v2924_v52, %v6045_v45  ;;  %v639_v45 = vadd.f32 %v7397_v61, %v5854_v46  ;;  %v7402_v52 = vld [vmem:[#allocation37_spill] sm:$0xff]  ;;  %v7403_v46 = vld [vmem:[#allocation32_spill] sm:$0xff] }
 0x36c   : > { %v4232_v8 = vmul.f32 -1.442695, %v2964_v13  ;;  %v916_v48 = vadd.f32 %v7400_v43, %v635_v59 }
 0x36d   : > { %v4233_v14 = vmul.f32 -1.442695, %v2965_v15  ;;  %v920_v30 = vadd.f32 %v7401_v19, %v639_v45  ;;  %v919_v15 = vadd.f32 %v7402_v52, %v638_v51  ;;  %v7407_v45 = vld [vmem:[#allocation38_spill] sm:$0xff]  ;;  %v7411_v52 = vld [vmem:[#allocation80_spill] sm:$0xff] }
 0x36e   : > { %v6111_v27 = vpop.f32.mrf.mxu3  ;;  %4374 = vpow2.f32 %v4232_v8 }
 0x36f   : > { %4376 = vpow2.f32 %v4233_v14  ;;  %v1246_v18 = vadd.f32 %v7405_v57, %v920_v30  ;;  %v7410_v30 = vld [vmem:[#allocation85_spill] sm:$0xff] }
 0x371   : > { %v6113_v6 = vpop.f32.mrf.mxu2  ;;  %v2877_v25 = vpop.f32.mrf.mxu0 }
 0x372   : > { %v2966_v28 = vadd.f32 %v2877_v25, %v2654_v0  ;;  %v2926_v26 = vpop.f32.mrf.mxu1  ;;  %v915_v0 = vadd.f32 %v7403_v46, %v634_v55  ;;  %v7412_v46 = vld [vmem:[#allocation86_spill] sm:$0xff] }
 0x373   : > { %v2967_v39 = vadd.f32 %v2926_v26, %v2655_v1 }
 0x374   : > { %v4234_v56 = vmul.f32 -1.442695, %v2966_v28  ;;  %v4375_v16 = vpop.eup %4374  ;;  %v7404_v28 = vld [vmem:[#allocation36_spill] sm:$0xff] }
 0x375   : > { %v4235_v9 = vmul.f32 -1.442695, %v2967_v39  ;;  %v4377_v8 = vpop.eup %4376  ;;  %v6131_v25 = vadd.f32 1.0, %v4375_v16  ;;  %v1242_v26 = vadd.f32 %v7404_v28, %v916_v48  ;;  %v7406_v39 = vld [vmem:[#allocation39_spill] sm:$0xff] }
 0x376   : > { %v6119_v29 = vpop.f32.mrf.mxu3  ;;  %4378 = vpow2.f32 %v4234_v56  ;;  %v6138_v61 = vadd.f32 1.0, %v4377_v8  ;;  %v7408_v56 = vld [vmem:[#allocation79_spill] sm:$0xff] }
 0x377   : > { %4380 = vpow2.f32 %v4235_v9  ;;  %v1555_v16 = vadd.f32 %v7408_v56, %v1242_v26  ;;  %v7414_v26 = vld [vmem:[#allocation87_spill] sm:$0xff]  ;;  %vm3033_vm14 = vweird.f32 %v6131_v25 }
 0x378   : > { %4382 = vrcp.f32 %v6131_v25  ;;  %vm3048_vm4 = vweird.f32 %v6138_v61 }
 0x379   : > { %v6125_v22 = vpop.f32.mrf.mxu2  ;;  %v2880_v1 = vpop.f32.mrf.mxu0 }
 0x37a   : > { %v2968_v38 = vadd.f32 %v2880_v1, %v2656_v2  ;;  %v2929_v13 = vpop.f32.mrf.mxu1  ;;  %v1245_v2 = vadd.f32 %v7406_v39, %v919_v15  ;;  %v7409_v1 = vld [vmem:[#allocation84_spill] sm:$0xff] }
 0x37b   : > { %v2969_v53 = vadd.f32 %v2929_v13, %v2657_v20  ;;  %v1241_v20 = vadd.f32 %v7407_v45, %v915_v0  ;;  %v1559_v43 = vadd.f32 %v7409_v1, %v1246_v18  ;;  %v1797_v0 = vadd.f32 %v7412_v46, %v1555_v16  ;;  %v7416_v1 = vld [vmem:[#allocation123_spill] sm:$0xff]  ;;  %v7419_v46 = vld [vmem:[#allocation124_spill] sm:$0xff] }
 0x37c   : > { %v4236_v14 = vmul.f32 -1.442695, %v2968_v38  ;;  %v4379_v55 = vpop.eup %4378  ;;  %v1558_v9 = vadd.f32 %v7410_v30, %v1245_v2  ;;  %v2660_v45 = vadd.f32 %v6100_v21, %v5956_v60 }
 0x37d   : > { %v4237_v34 = vmul.f32 -1.442695, %v2969_v53  ;;  %v4381_v13 = vpop.eup %4380  ;;  %v1554_v15 = vadd.f32 %v7411_v52, %v1241_v20  ;;  %v6151_v53 = vadd.f32 1.0, %v4379_v55 }
 0x37e   : > { %v6135_v59 = vpop.f32.mrf.mxu3  ;;  %4384 = vpow2.f32 %v4236_v14  ;;  %v6153_v8 = vpop.eup %4382  ;;  %v7413_v14 = vld [vmem:[#allocation91_spill] sm:$0xff]  ;;  %v1800_v57 = vadd.f32 %v7414_v26, %v1558_v9  ;;  %v6158_v18 = vadd.f32 1.0, %v4381_v13  ;;  %v7418_v13 = vld [vmem:[#allocation128_spill] sm:$0xff] }
 0x37f   : > { %4386 = vrcp.f32 %v6138_v61  ;;  %v1801_v28 = vadd.f32 %v7413_v14, %v1559_v43  ;;  %v2109_v43 = vadd.f32 %v7416_v1, %v1797_v0  ;;  %v7420_v14 = vld [vmem:[#allocation127_spill] sm:$0xff]  ;;  %vm3034_vm5 = vweird.f32 %v6153_v8 }
 0x380   : > { %4388 = vpow2.f32 %v4237_v34  ;;  %v2661_v34 = vadd.f32 %v6098_v40, %v5951_v3  ;;  %v2112_v52 = vadd.f32 %v7418_v13, %v1800_v57  ;;  %v2664_v13 = vadd.f32 %v6113_v6, %v5875_v11  ;;  %vm6254_vm7 = vmor %vm3033_vm14, %vm3034_vm5 }
 0x381   : > { %v6142_v51 = vpop.f32.mrf.mxu2  ;;  %v2882_v23 = vpop.f32.mrf.mxu0  ;;  %4390 = vrcp.f32 %v6151_v53  ;;  %v2421_v26 = vadd.f32 %v7420_v14, %v2109_v43  ;;  %v3069_v11 = vand.u32 2147483648, %v6151_v53  ;;  %vm3063_vm10 = vweird.f32 %v6151_v53 }
 0x382   : > { %v2970_v48 = vadd.f32 %v2882_v23, %v6093_v5  ;;  %v2931_v19 = vpop.f32.mrf.mxu1  ;;  %v3029_v23 = vmul.f32 %v6153_v8, %v6131_v25  ;;  %4392 = vrcp.f32 %v6158_v18  ;;  %vm3078_vm11 = vweird.f32 %v6158_v18 }
 0x383   : > { %v2971_v38 = vadd.f32 %v2931_v19, %v6086_v58  ;;  %v7415_v58 = vld [vmem:[#allocation82_spill] sm:$0xff]  ;;  %v2663_v1 = vadd.f32 %v6104_v7, %v2421_v26 }
 0x384   : > { %v4385_v5 = vpop.eup %4384  ;;  %v1796_v2 = vadd.f32 %v7415_v58, %v1554_v15  ;;  %v4238_v55 = vmul.f32 -1.442695, %v2970_v48  ;;  %v7417_v19 = vld [vmem:[#allocation126_spill] sm:$0xff]  ;;  %v3030_v0 = vsub.f32 1.0, %v3029_v23 }
 0x385   : > { %v6165_v20 = vpop.eup %4386  ;;  %v2113_v30 = vadd.f32 %v7417_v19, %v1801_v28  ;;  %v6174_v9 = vadd.f32 1.0, %v4385_v5  ;;  %v4239_v3 = vmul.f32 -1.442695, %v2971_v38 }
 0x386   : > { %v6160_v39 = vpop.f32.mrf.mxu3  ;;  %v4389_v16 = vpop.eup %4388  ;;  %v2108_v48 = vadd.f32 %v7419_v46, %v1796_v2  ;;  %v3044_v28 = vmul.f32 %v6165_v20, %v6138_v61  ;;  %4394 = vpow2.f32 %v4238_v55  ;;  %v2424_v2 = vadd.f32 %v5894_v44, %v2112_v52 }
 0x387   : > { %v6184_v5 = vadd.f32 1.0, %v4389_v16  ;;  %4396 = vrcp.f32 %v6174_v9  ;;  %v6196_v16 = vadd.f32 %v6111_v27, %v5868_v4  ;;  %v3037_v55 = vand.u32 2147483647, %v6131_v25 }
 0x388   : > { %4398 = vpow2.f32 %v4239_v3  ;;  %v3045_v19 = vsub.f32 1.0, %v3044_v28  ;;  %v3031_v7 = vmul.f32 %v6153_v8, %v3030_v0  ;;  %v3052_v3 = vand.u32 2147483647, %v6138_v61 }
 0x389   : > { %v2885_v56 = vpop.f32.mrf.mxu0  ;;  %v6178_v40 = vpop.f32.mrf.mxu2  ;;  %vm6229_vm6 = vcmp.eq.f32.partialorder %v3037_v55, 8.507059e+37  ;;  %vm3049_vm8 = vweird.f32 %v6165_v20  ;;  %v3067_v55 = vand.u32 2147483647, %v6151_v53  ;;  %vm3093_vm3 = vweird.f32 %v6174_v9 }
 0x38a   : > { %v2972_v60 = vadd.f32 %v2885_v56, %v2660_v45  ;;  %v2934_v21 = vpop.f32.mrf.mxu1  ;;  %v7421_v45 = vld [vmem:[#allocation129_spill] sm:$0xff]  ;;  %v6188_v56 = vpop.eup %4390  ;;  %v3032_v26 = vadd.f32 %v6153_v8, %v3031_v7  ;;  %vm6258_vm9 = vcmp.eq.f32.partialorder %v3052_v3, 8.507059e+37  ;;  %vm6300_vm13 = vmor %vm3048_vm4, %vm3049_vm8  ;;  %vm3108_vm5 = vweird.f32 %v6184_v5 }
 0x38b   : > { %v2973_v15 = vadd.f32 %v2934_v21, %v2661_v34  ;;  %v2420_v57 = vadd.f32 %v7421_v45, %v2108_v48  ;;  %v2425_v34 = vadd.f32 %v5881_v42, %v2113_v30  ;;  %v6199_v43 = vpop.eup %4392  ;;  %v3039_v30 = vand.u32 2147483648, %v6131_v25 }
 0x38c   : > { %v4240_v58 = vmul.f32 -1.442695, %v2972_v60  ;;  %v3054_v60 = vand.u32 2147483648, %v6138_v61  ;;  %v4395_v21 = vpop.eup %4394  ;;  %v3074_v46 = vmul.f32 %v6199_v43, %v6158_v18  ;;  %v6221_v48 = vadd.f32 %v6125_v22, %v2424_v2 }
 0x38d   : > { %v4241_v38 = vmul.f32 -1.442695, %v2973_v15  ;;  %v2662_v23 = vadd.f32 %v6106_v47, %v2420_v57  ;;  %v3059_v47 = vmul.f32 %v6188_v56, %v6151_v53  ;;  %v6212_v52 = vadd.f32 %v6119_v29, %v2425_v34  ;;  %v6216_v15 = vpop.eup %4396 }
 0x38e   : > { %4400 = vpow2.f32 %v4240_v58  ;;  %v6202_v42 = vpop.f32.mrf.mxu3  ;;  %v4399_v6 = vpop.eup %4398  ;;  %v3040_v0 = vor.u32 1.1754944e-38, %v3039_v30  ;;  %v3046_v22 = vmul.f32 %v6165_v20, %v3045_v19  ;;  %v6238_v2 = vadd.f32 %v6135_v59, %v5912_v31 }
 0x38f   : > { %4402 = vrcp.f32 %v6184_v5  ;;  %v3060_v45 = vsub.f32 1.0, %v3059_v47  ;;  %v3075_v7 = vsub.f32 1.0, %v3074_v46  ;;  %v6246_v19 = vadd.f32 %v6142_v51, %v5921_v17 }
 0x390   : > { %4404 = vpow2.f32 %v4241_v38  ;;  %v3055_v38 = vor.u32 1.1754944e-38, %v3054_v60  ;;  %v6263_v30 = vor.u32 1.1754944e-38, %v3069_v11  ;;  %v3036_v47 = vsel %vm6254_vm7, %v6153_v8, %v3032_v26 }
 0x391   : > { %v2887_v44 = vpop.f32.mrf.mxu0  ;;  %v6225_v29 = vpop.f32.mrf.mxu2  ;;  %v3047_v25 = vadd.f32 %v6165_v20, %v3046_v22  ;;  %v3061_v46 = vmul.f32 %v6188_v56, %v3060_v45  ;;  %vm6285_vm12 = vcmp.eq.f32.partialorder %v3067_v55, 8.507059e+37  ;;  %v3084_v45 = vand.u32 2147483648, %v6158_v18 }
 0x392   : > { %v2974_v4 = vadd.f32 %v2887_v44, %v2662_v23  ;;  %v2936_v27 = vpop.f32.mrf.mxu1  ;;  %v6240_v23 = vadd.f32 1.0, %v4395_v21  ;;  %vm3064_vm15 = vweird.f32 %v6188_v56  ;;  %v6307_v55 = vsel %vm6229_vm6, %v3040_v0, %v3036_v47 }
 0x393   : > { %v2975_v57 = vadd.f32 %v2936_v27, %v2663_v1  ;;  %v6248_v1 = vadd.f32 1.0, %v4399_v6  ;;  %v3089_v27 = vmul.f32 %v6216_v15, %v6174_v9  ;;  %vm3079_vm0 = vweird.f32 %v6199_v43  ;;  %vm6338_vm2 = vmor %vm3063_vm10, %vm3064_vm15 }
 0x394   : > { %v4242_v14 = vmul.f32 -1.442695, %v2974_v4  ;;  %v4401_v28 = vpop.eup %4400  ;;  %v3082_v4 = vand.u32 2147483647, %v6158_v18  ;;  %v6328_v0 = vadd.f32 %v6178_v40, %v5959_v33  ;;  %v3085_v59 = vor.u32 1.1754944e-38, %v3084_v45  ;;  %vm6358_vm14 = vmor %vm3078_vm11, %vm3079_vm0 }
 0x395   : > { %v6234_v34 = vpop.eup %4402  ;;  %7424 = vst [vmem:[#allocation17_spill] sm:$0xff] %v6248_v1  ;;  %v6265_v17 = vadd.f32 1.0, %v4401_v28  ;;  %v4243_v60 = vmul.f32 -1.442695, %v2975_v57  ;;  %v3076_v28 = vmul.f32 %v6199_v43, %v3075_v7  ;;  %v6293_v57 = vadd.f32 %v6160_v39, %v5946_v32 }
 0x396   : > { %4406 = vpow2.f32 %v4242_v14  ;;  %v4405_v44 = vpop.eup %4404  ;;  %v3104_v14 = vmul.f32 %v6234_v34, %v6184_v5  ;;  %v6281_v11 = vpop.f32.mrf.mxu3  ;;  %v3051_v32 = vsel %vm6300_vm13, %v6165_v20, %v3047_v25  ;;  %v3062_v39 = vadd.f32 %v6188_v56, %v3061_v46 }
 0x397   : > { %4408 = vrcp.f32 %v6240_v23  ;;  %v6279_v8 = vadd.f32 1.0, %v4405_v44  ;;  %v3090_v7 = vsub.f32 1.0, %v3089_v27  ;;  %vm6320_vm1 = vcmp.eq.f32.partialorder %v3082_v4, 8.507059e+37 }
 0x398   : > { %4410 = vrcp.f32 %v6248_v1  ;;  %v3105_v31 = vsub.f32 1.0, %v3104_v14  ;;  %v6332_v25 = vsel %vm6258_vm9, %v3055_v38, %v3051_v32  ;;  %v3099_v27 = vand.u32 2147483648, %v6174_v9 }
 0x399   : > { %v2890_v51 = vpop.f32.mrf.mxu0  ;;  %4412 = vrcp.f32 %v6265_v17  ;;  %v3066_v40 = vsel %vm6338_vm2, %v6188_v56, %v3062_v39  ;;  %v3097_v38 = vand.u32 2147483647, %v6174_v9  ;;  %v3091_v56 = vmul.f32 %v6216_v15, %v3090_v7 }
 0x39a   : > { %v2976_v21 = vadd.f32 %v2890_v51, %v2664_v13  ;;  %v2939_v3 = vpop.f32.mrf.mxu1  ;;  %4414 = vpow2.f32 %v4243_v60  ;;  %v6316_v51 = vpop.f32.mrf.mxu2  ;;  %v3077_v60 = vadd.f32 %v6199_v43, %v3076_v28  ;;  %v3106_v14 = vmul.f32 %v6234_v34, %v3105_v31 }
 0x39b   : > { %v2977_v6 = vadd.f32 %v2939_v3, %v6196_v16  ;;  %4416 = vrcp.f32 %v6279_v8  ;;  %vm3094_vm4 = vweird.f32 %v6216_v15  ;;  %v3114_v18 = vand.u32 2147483648, %v6184_v5 }
 0x39c   : > { %v4407_v26 = vpop.eup %4406  ;;  %v4244_v13 = vmul.f32 -1.442695, %v2976_v21  ;;  %v6379_v45 = vadd.f32 %v6202_v42, %v5971_v24  ;;  %v3100_v16 = vor.u32 1.1754944e-38, %v3099_v27  ;;  %v3191_v39 = vand.u32 2147483648, %v6265_v17  ;;  %vm6437_vm9 = vmor %vm3093_vm3, %vm3094_vm4 }
 0x39d   : > { %v4245_v44 = vmul.f32 -1.442695, %v2977_v6  ;;  %v6314_v61 = vadd.f32 1.0, %v4407_v26  ;;  %v6324_v20 = vpop.eup %4408  ;;  %v3081_v26 = vsel %vm6358_vm14, %v6199_v43, %v3077_v60  ;;  %v6386_v43 = vsel %vm6285_vm12, %v6263_v30, %v3066_v40 }
 0x39e   : > { %4418 = vpow2.f32 %v4244_v13  ;;  %v6343_v21 = vpop.eup %4410  ;;  %v6375_v28 = vmul.f32 %v6324_v20, %v6240_v23  ;;  %v6391_v7 = vadd.f32 %v6225_v29, %v5975_v54  ;;  %vm3109_vm6 = vweird.f32 %v6234_v34 }
 0x39f   : > { %4420 = vpow2.f32 %v4245_v44  ;;  %7437 = vst [vmem:[#allocation2_spill] sm:$0xff] %v6343_v21  ;;  %v6350_v3 = vpop.eup %4412  ;;  %v6381_v44 = vpop.f32.mrf.mxu3  ;;  %v6396_v42 = vmul.f32 %v6343_v21, %v6248_v1  ;;  %v6400_v30 = vsel %vm6320_vm1, %v3085_v59, %v3081_v26  ;;  %v3092_v22 = vadd.f32 %v6216_v15, %v3091_v56  ;;  %vm6455_vm10 = vmor %vm3108_vm5, %vm3109_vm6 }
 0x3a0   : > { %4422 = vrcp.f32 %v6314_v61  ;;  %v4415_v6 = vpop.eup %4414  ;;  %vm6403_vm8 = vcmp.eq.f32.partialorder %v3097_v38, 8.507059e+37  ;;  %v3107_v54 = vadd.f32 %v6234_v34, %v3106_v14  ;;  %v3181_v29 = vmul.f32 %v6350_v3, %v6265_v17 }
 0x3a1   : > { %v2892_v47 = vpop.f32.mrf.mxu0  ;;  %v6371_v13 = vpop.eup %4416  ;;  %7440 = vst [vmem:[#allocation26_spill] sm:$0xff] %v6396_v42  ;;  %v6412_v4 = vadd.f32 1.0, %v4415_v6  ;;  %v3115_v27 = vor.u32 1.1754944e-38, %v3114_v18  ;;  %v6423_v38 = vadd.f32 %v6281_v11, %v5991_v41  ;;  %v6428_v6 = vor.u32 1.1754944e-38, %v3191_v39 }
 0x3a2   : > { %v2941_v33 = vpop.f32.mrf.mxu1  ;;  %v2978_v53 = vadd.f32 %v2892_v47, %v6221_v48  ;;  %v3112_v48 = vand.u32 2147483647, %v6184_v5  ;;  %v3196_v47 = vmul.f32 %v6371_v13, %v6279_v8  ;;  %v2593_v46 = vpop.f32.mrf.mxu2  ;;  %v3206_v26 = vand.u32 2147483648, %v6279_v8 }
 0x3a3   : > { %v2979_v56 = vadd.f32 %v2941_v33, %v6212_v52  ;;  %v3182_v39 = vsub.f32 1.0, %v3181_v29  ;;  %vm3185_vm11 = vweird.f32 %v6265_v17  ;;  %vm3200_vm12 = vweird.f32 %v6279_v8 }
 0x3a4   : > { %v4419_v32 = vpop.eup %4418  ;;  %v4246_v31 = vmul.f32 -1.442695, %v2978_v53  ;;  %vm6414_vm7 = vcmp.eq.f32.partialorder %v3112_v48, 8.507059e+37  ;;  %v6470_v5 = vor.u32 1.1754944e-38, %v3206_v26  ;;  %v3221_v29 = vand.u32 2147483648, %v6314_v61 }
 0x3a5   : > { %v4421_v24 = vpop.eup %4420  ;;  %v6425_v53 = vadd.f32 1.0, %v4419_v32  ;;  %v3096_v32 = vsel %vm6437_vm9, %v6216_v15, %v3092_v22  ;;  %v4247_v9 = vmul.f32 -1.442695, %v2979_v56  ;;  %v6462_v15 = vadd.f32 %v6316_v51, %v5996_v62 }
 0x3a6   : > { %v6418_v40 = vpop.eup %4422  ;;  %v6431_v48 = vadd.f32 1.0, %v4421_v24  ;;  %4424 = vpow2.f32 %v4246_v31  ;;  %v3197_v31 = vsub.f32 1.0, %v3196_v47  ;;  %v3111_v22 = vsel %vm6455_vm10, %v6234_v34, %v3107_v54 }
 0x3a7   : > { %v3211_v24 = vmul.f32 %v6418_v40, %v6314_v61  ;;  %4426 = vrcp.f32 %v6412_v4  ;;  %v6473_v47 = vpop.f32.mrf.mxu3  ;;  %v3204_v62 = vand.u32 2147483647, %v6279_v8  ;;  %v3183_v56 = vmul.f32 %v6350_v3, %v3182_v39 }
 0x3a8   : > { %4428 = vrcp.f32 %v6425_v53  ;;  %v3198_v34 = vmul.f32 %v6371_v13, %v3197_v31  ;;  %v3236_v54 = vand.u32 2147483648, %v6412_v4  ;;  %vm3186_vm13 = vweird.f32 %v6350_v3 }
 0x3a9   : > { %v2895_v14 = vpop.f32.mrf.mxu0  ;;  %4430 = vrcp.f32 %v6431_v48  ;;  %vm3201_vm15 = vweird.f32 %v6371_v13  ;;  %vm3215_vm0 = vweird.f32 %v6314_v61  ;;  %v6499_v58 = vor.u32 1.1754944e-38, %v3221_v29  ;;  %vm6536_vm14 = vmor %vm3185_vm11, %vm3186_vm13 }
 0x3aa   : > { %v2944_v18 = vpop.f32.mrf.mxu1  ;;  %v2980_v52 = vadd.f32 %v2895_v14, %v6246_v19  ;;  %v3189_v19 = vand.u32 2147483647, %v6265_v17  ;;  %v3212_v14 = vsub.f32 1.0, %v3211_v24  ;;  %vm6510_vm2 = vcmp.eq.f32.partialorder %v3204_v62, 8.507059e+37  ;;  %vm6548_vm4 = vmor %vm3200_vm12, %vm3201_vm15 }
 0x3ab   : > { %v2981_v33 = vadd.f32 %v2944_v18, %v6238_v2  ;;  %v6479_v18 = vsel %vm6403_vm8, %v3100_v16, %v3096_v32  ;;  %vm3216_vm3 = vweird.f32 %v6418_v40  ;;  %vm3245_vm9 = vweird.f32 %v6425_v53 }
 0x3ac   : > { %v4248_v59 = vmul.f32 -1.442695, %v2980_v52  ;;  %v4425_v51 = vpop.eup %4424  ;;  %vm6493_vm1 = vcmp.eq.f32.partialorder %v3189_v19, 8.507059e+37  ;;  %v3213_v24 = vmul.f32 %v6418_v40, %v3212_v14  ;;  %v3219_v19 = vand.u32 2147483647, %v6314_v61  ;;  %vm6584_vm6 = vmor %vm3215_vm0, %vm3216_vm3 }
 0x3ad   : > { %v4249_v11 = vmul.f32 -1.442695, %v2981_v33  ;;  %v6487_v41 = vpop.eup %4426  ;;  %v6506_v33 = vadd.f32 %v2593_v46, %v6016_v63  ;;  %v6508_v32 = vadd.f32 1.0, %v4425_v51  ;;  %v6520_v63 = vor.u32 1.1754944e-38, %v3236_v54 }
 0x3ae   : > { %4432 = vpow2.f32 %v4248_v59  ;;  %v6485_v59 = vsel %vm6414_vm7, %v3115_v27, %v3111_v22  ;;  %v6497_v52 = vpop.eup %4428  ;;  %v6503_v27 = vadd.f32 %v6381_v44, %v6012_v37  ;;  %v3184_v37 = vadd.f32 %v6350_v3, %v3183_v56 }
 0x3af   : > { %4434 = vpow2.f32 %v4249_v11  ;;  %7449 = vst [vmem:[#allocation3_spill] sm:$0xff] %v6485_v59  ;;  %v6514_v31 = vpop.eup %4430  ;;  %v3199_v46 = vadd.f32 %v6371_v13, %v3198_v34  ;;  %v3226_v29 = vmul.f32 %v6487_v41, %v6412_v4  ;;  %v3266_v14 = vand.u32 2147483648, %v6431_v48 }
 0x3b0   : > { %4436 = vpow2.f32 %v4247_v9  ;;  %v3241_v17 = vmul.f32 %v6497_v52, %v6425_v53  ;;  %v3214_v8 = vadd.f32 %v6418_v40, %v3213_v24  ;;  %vm6576_vm5 = vcmp.eq.f32.partialorder %v3219_v19, 8.507059e+37 }
 0x3b1   : > { %v2897_v26 = vpop.f32.mrf.mxu0  ;;  %v3227_v1 = vsub.f32 1.0, %v3226_v29  ;;  %vm3231_vm8 = vweird.f32 %v6487_v41  ;;  %v3460_v29 = vld [vmem:[%s6559_s11] sm:$0xff]  ;;  %vm3230_vm7 = vweird.f32 %v6412_v4  ;;  %vm3246_vm10 = vweird.f32 %v6497_v52 }
 0x3b2   : > { %v2982_v16 = vadd.f32 %v2897_v26, %v6328_v0  ;;  %v2946_v60 = vpop.f32.mrf.mxu1  ;;  %v2595_v0 = vpop.f32.mrf.mxu2  ;;  %v3242_v61 = vsub.f32 1.0, %v3241_v17  ;;  %vm6675_vm11 = vmor %vm3230_vm7, %vm3231_vm8  ;;  %vm3260_vm3 = vweird.f32 %v6431_v48 }
 0x3b3   : > { %v2983_v2 = vadd.f32 %v2946_v60, %v6293_v57  ;;  %v3251_v57 = vand.u32 2147483648, %v6425_v53  ;;  %v3256_v60 = vmul.f32 %v6514_v31, %v6431_v48  ;;  %v3228_v39 = vmul.f32 %v6487_v41, %v3227_v1  ;;  %vm6693_vm13 = vmor %vm3245_vm9, %vm3246_vm10 }
 0x3b4   : > { %v4250_v9 = vmul.f32 -1.442695, %v2982_v16  ;;  %v4433_v44 = vpop.eup %4432  ;;  %v3188_v16 = vsel %vm6536_vm14, %v6350_v3, %v3184_v37 }
 0x3b5   : > { %v4435_v22 = vpop.eup %4434  ;;  %v6530_v62 = vadd.f32 1.0, %v4433_v44  ;;  %v4251_v54 = vmul.f32 -1.442695, %v2983_v2  ;;  %v3203_v44 = vsel %vm6548_vm4, %v6371_v13, %v3199_v46  ;;  %v6572_v56 = vor.u32 1.1754944e-38, %v3251_v57 }
 0x3b6   : > { %4438 = vpow2.f32 %v4250_v9  ;;  %v4437_v51 = vpop.eup %4436  ;;  %v6542_v34 = vadd.f32 1.0, %v4435_v22  ;;  %v2647_v9 = vpop.f32.mrf.mxu3  ;;  %v6589_v13 = vor.u32 1.1754944e-38, %v3266_v14  ;;  %v6593_v46 = vadd.f32 %v6473_v47, %v6031_v12  ;;  %v3461_v14 = vld [vmem:[%s6559_s11 + $0x8] sm:$0xff] }
 0x3b7   : > { %4440 = vrcp.f32 %v6508_v32  ;;  %v6574_v3 = vadd.f32 1.0, %v4437_v51  ;;  %v3193_v19 = vsel %vm6493_vm1, %v6428_v6, %v3188_v16  ;;  %v3281_v51 = vand.u32 2147483648, %v6508_v32 }
 0x3b8   : > { %4442 = vrcp.f32 %v6530_v62  ;;  %v3208_v22 = vsel %vm6510_vm2, %v6470_v5, %v3203_v44  ;;  %v3218_v12 = vsel %vm6584_vm6, %v6418_v40, %v3214_v8  ;;  %v3257_v11 = vsub.f32 1.0, %v3256_v60 }
 0x3b9   : > { %4444 = vrcp.f32 %v6542_v34  ;;  %v2900_v2 = vpop.f32.mrf.mxu0  ;;  %v6611_v6 = vadd.f32 %v2595_v0, %v6035_v50  ;;  %v6622_v8 = vmul.f32 %v3460_v29, %v3193_v19  ;;  %v3223_v1 = vsel %vm6576_vm5, %v6499_v58, %v3218_v12 }
 0x3ba   : > { %v2949_v24 = vpop.f32.mrf.mxu1  ;;  %4446 = vpow2.f32 %v4251_v54  ;;  %v2598_v54 = vpop.f32.mrf.mxu2  ;;  %v2984_v17 = vadd.f32 %v2900_v2, %v6391_v7  ;;  %v6628_v7 = vadd.f32 %v2647_v9, %v6053_v36  ;;  %v3243_v0 = vmul.f32 %v6497_v52, %v3242_v61 }
 0x3bb   : > { %v2985_v16 = vadd.f32 %v2949_v24, %v6379_v45  ;;  %4448 = vrcp.f32 %v6574_v3  ;;  %v6630_v45 = vmul.f32 %v3461_v14, %v3208_v22  ;;  %v6636_v60 = vor.u32 1.1754944e-38, %v3281_v51  ;;  %v3462_v24 = vld [vmem:[%s6559_s11 + $0x10] sm:$0xff] }
 0x3bc   : > { %v4439_v57 = vpop.eup %4438  ;;  %v3296_v2 = vand.u32 2147483648, %v6574_v3  ;;  %v6640_v44 = vadd.f32 %v2598_v54, %v6059_v10  ;;  %v6644_v36 = vmul.f32 %v6514_v31, %v3257_v11  ;;  %v4252_v22 = vmul.f32 -1.442695, %v2984_v17 }
 0x3bd   : > { %v6607_v47 = vpop.eup %4440  ;;  %v6620_v40 = vadd.f32 1.0, %v4439_v57  ;;  %7462 = vst [vmem:[#allocation43_spill] sm:$0xff] %v6636_v60  ;;  %v4253_v37 = vmul.f32 -1.442695, %v2985_v16  ;;  %v6657_v12 = vmul.f32 %v3462_v24, %v3223_v1  ;;  %v6664_v17 = vadd.f32 %v6487_v41, %v3228_v39 }
 0x3be   : > { %v6615_v5 = vpop.eup %4442  ;;  %v3271_v19 = vmul.f32 %v6607_v47, %v6508_v32  ;;  %v2649_v61 = vpop.f32.mrf.mxu3  ;;  %v6661_v54 = vor.u32 1.1754944e-38, %v3296_v2  ;;  %v6667_v16 = vadd.f32 %v6497_v52, %v3243_v0  ;;  %v7467_v2 = vand.u32 2147483647, %v6412_v4 }
 0x3bf   : > { %v6624_v50 = vpop.eup %4444  ;;  %v3333_v9 = vmul.f32 %v6615_v5, %v6530_v62  ;;  %4450 = vrcp.f32 %v6620_v40  ;;  %v6681_v0 = vadd.f32 %v2649_v61, %v6070_v49  ;;  %v3341_v49 = vand.u32 2147483647, %v6530_v62 }
 0x3c0   : > { %v4447_v26 = vpop.eup %4446  ;;  %v3348_v29 = vmul.f32 %v6624_v50, %v6542_v34  ;;  %4452 = vpow2.f32 %v4252_v22  ;;  %7463 = vst [vmem:[#allocation4_spill] sm:$0xff] %v6661_v54  ;;  %v3343_v22 = vand.u32 2147483648, %v6530_v62  ;;  %v3272_v39 = vsub.f32 1.0, %v3271_v19 }
 0x3c1   : > { %v2902_v58 = vpop.f32.mrf.mxu0  ;;  %v6653_v10 = vadd.f32 1.0, %v4447_v26  ;;  %v6659_v11 = vpop.eup %4448  ;;  %v3334_v60 = vsub.f32 1.0, %v3333_v9  ;;  %4454 = vpow2.f32 %v4253_v37  ;;  %7466 = vst [vmem:[#allocation69_spill] sm:$0xff] %v6681_v0  ;;  %vm6685_vm12 = vcmp.eq.f32.partialorder %v7467_v2, 8.507059e+37 }
 0x3c2   : > { %v2951_v57 = vpop.f32.mrf.mxu1  ;;  %v2986_v51 = vadd.f32 %v2902_v58, %v6462_v15  ;;  %v3349_v1 = vsub.f32 1.0, %v3348_v29  ;;  %v3286_v37 = vmul.f32 %v6659_v11, %v6574_v3  ;;  %v3356_v19 = vand.u32 2147483647, %v6542_v34  ;;  %v2600_v2 = vpop.f32.mrf.mxu2 }
 0x3c3   : > { %v2987_v14 = vadd.f32 %v2951_v57, %v6423_v38  ;;  %4456 = vrcp.f32 %v6653_v10  ;;  %v3358_v29 = vand.u32 2147483648, %v6542_v34  ;;  %v3233_v57 = vsel %vm6675_vm11, %v6487_v41, %v6664_v17 }
 0x3c4   : > { %v4254_v15 = vmul.f32 -1.442695, %v2986_v51  ;;  %vm3337_vm15 = vweird.f32 %v6530_v62  ;;  %vm3352_vm0 = vweird.f32 %v6542_v34  ;;  %vm3261_vm1 = vweird.f32 %v6514_v31 }
 0x3c5   : > { %v4255_v58 = vmul.f32 -1.442695, %v2987_v14  ;;  %v6700_v4 = vpop.eup %4450  ;;  %v6714_v14 = vor.u32 1.1754944e-38, %v3343_v22  ;;  %v6719_v41 = vmul.f32 %v6607_v47, %v3272_v39  ;;  %v3350_v17 = vmul.f32 %v6624_v50, %v3349_v1  ;;  %vm6832_vm11 = vmor %vm3260_vm3, %vm3261_vm1 }
 0x3c6   : > { %4458 = vpow2.f32 %v4254_v15  ;;  %v4453_v51 = vpop.eup %4452  ;;  %v3335_v15 = vmul.f32 %v6615_v5, %v3334_v60  ;;  %v3287_v59 = vsub.f32 1.0, %v3286_v37  ;;  %vm6725_vm2 = vcmp.eq.f32.partialorder %v3341_v49, 8.507059e+37 }
 0x3c7   : > { %v6722_v38 = vadd.f32 1.0, %v4453_v51  ;;  %v4455_v54 = vpop.eup %4454  ;;  %v3363_v21 = vmul.f32 %v6700_v4, %v6620_v40  ;;  %4460 = vpow2.f32 %v4255_v58  ;;  %vm3338_vm14 = vweird.f32 %v6615_v5 }
 0x3c8   : > { %vm6736_vm4 = vcmp.eq.f32.partialorder %v3356_v19, 8.507059e+37  ;;  %v6741_v1 = vadd.f32 %v2600_v2, %v6073_v35  ;;  %vm3353_vm5 = vweird.f32 %v6624_v50  ;;  %v6746_v49 = vadd.f32 1.0, %v4455_v54  ;;  %v3463_v54 = vld [vmem:[%s6559_s11 + $0x18] sm:$0xff]  ;;  %vm6766_vm6 = vmor %vm3337_vm15, %vm3338_vm14 }
 0x3c9   : > { %v2905_v26 = vpop.f32.mrf.mxu0  ;;  %v6732_v42 = vpop.eup %4456  ;;  %4462 = vrcp.f32 %v6722_v38  ;;  %v3351_v58 = vadd.f32 %v6624_v50, %v3350_v17  ;;  %v3373_v19 = vand.u32 2147483648, %v6620_v40  ;;  %v7479_v17 = vand.u32 2147483647, %v6425_v53  ;;  %vm6785_vm7 = vmor %vm3352_vm0, %vm3353_vm5 }
 0x3ca   : > { %v2988_v61 = vadd.f32 %v2905_v26, %v6506_v33  ;;  %v2954_v60 = vpop.f32.mrf.mxu1  ;;  %v3359_v26 = vor.u32 1.1754944e-38, %v3358_v29  ;;  %v3364_v29 = vsub.f32 1.0, %v3363_v21  ;;  %v3378_v35 = vmul.f32 %v6732_v42, %v6653_v10 }
 0x3cb   : > { %v2989_v39 = vadd.f32 %v2954_v60, %v6503_v27  ;;  %v3336_v27 = vadd.f32 %v6615_v5, %v3335_v15  ;;  %v3238_v15 = vsel %vm6685_vm12, %v6520_v63, %v3233_v57  ;;  %v3388_v21 = vand.u32 2147483648, %v6653_v10 }
 0x3cc   : > { %v4459_v37 = vpop.eup %4458  ;;  %4464 = vtanh.f32 %v2988_v61  ;;  %v6760_v61 = vmul.f32 %v6659_v11, %v3287_v59  ;;  %vm6774_vm8 = vcmp.eq.f32.partialorder %v7479_v17, 8.507059e+37  ;;  %vm3367_vm9 = vweird.f32 %v6620_v40 }
 0x3cd   : > { %v6750_v51 = vadd.f32 1.0, %v4459_v37  ;;  %4466 = vtanh.f32 %v2989_v39  ;;  %v4461_v59 = vpop.eup %4460  ;;  %v3340_v24 = vsel %vm6766_vm6, %v6615_v5, %v3336_v27  ;;  %v3371_v53 = vand.u32 2147483647, %v6620_v40 }
 0x3ce   : > { %4468 = vrcp.f32 %v6746_v49  ;;  %7476 = vst [vmem:[#allocation41_spill] sm:$0xff] %v6760_v61  ;;  %v6793_v60 = vadd.f32 %v6514_v31, %v6644_v36  ;;  %v3355_v34 = vsel %vm6785_vm7, %v6624_v50, %v3351_v58  ;;  %v6800_v5 = vor.u32 1.1754944e-38, %v3373_v19 }
 0x3cf   : > { %4470 = vrcp.f32 %v6750_v51  ;;  %v6795_v39 = vpop.eup %4462  ;;  %v6803_v2 = vmul.f32 %v3463_v54, %v3238_v15  ;;  %v3365_v61 = vmul.f32 %v6700_v4, %v3364_v29  ;;  %v3379_v0 = vsub.f32 1.0, %v3378_v35 }
 0x3d0   : > { %v3393_v36 = vmul.f32 %v6795_v39, %v6722_v38  ;;  %v7484_v62 = vsel %vm6693_vm13, %v6497_v52, %v6667_v16  ;;  %v6820_v19 = vsel %vm6725_vm2, %v6714_v14, %v3340_v24  ;;  %vm3368_vm10 = vweird.f32 %v6700_v4 }
 0x3d1   : > { %v2907_v57 = vpop.f32.mrf.mxu0  ;;  %v3253_v50 = vsel %vm6774_vm8, %v6572_v56, %v7484_v62  ;;  %v3386_v29 = vand.u32 2147483647, %v6653_v10  ;;  %v6824_v35 = vor.u32 1.1754944e-38, %v3388_v21  ;;  %v6838_v56 = vsel %vm6736_vm4, %v3359_v26, %v3355_v34  ;;  %vm6884_vm1 = vmor %vm3367_vm9, %vm3368_vm10 }
 0x3d2   : > { %v2990_v37 = vadd.f32 %v2907_v57, %v6611_v6  ;;  %v2956_v27 = vpop.f32.mrf.mxu1  ;;  %v4465_v17 = vpop.eup %4464  ;;  %v3464_v6 = vld [vmem:[%s6559_s11 + $0x20] sm:$0xff]  ;;  %vm6840_vm12 = vcmp.eq.f32.partialorder %v3371_v53, 8.507059e+37  ;;  %v3394_v14 = vsub.f32 1.0, %v3393_v36  ;;  %v6844_v22 = vadd.f32 1.0, %v4461_v59 }
 0x3d3   : > { %v4467_v58 = vpop.eup %4466  ;;  %v3476_v15 = vmul.f32 %v4465_v17, %v6307_v55  ;;  %vm3382_vm13 = vweird.f32 %v6653_v10  ;;  %v6851_v63 = vmul.f32 %v3464_v6, %v3253_v50  ;;  %v3263_v33 = vsel %vm6832_vm11, %v6514_v31, %v6793_v60 }
 0x3d4   : > { %v6826_v9 = vpop.eup %4468  ;;  %v3477_v21 = vmul.f32 %v4467_v58, %v6332_v25  ;;  %4472 = vtanh.f32 %v2990_v37  ;;  %v3366_v26 = vadd.f32 %v6700_v4, %v3365_v61  ;;  %v3380_v59 = vmul.f32 %v6732_v42, %v3379_v0 }
 0x3d5   : > { %v6847_v54 = vpop.eup %4470  ;;  %vm3383_vm15 = vweird.f32 %v6732_v42  ;;  %v3264_v55 = vand.u32 2147483647, %v6431_v48  ;;  %v3408_v25 = vmul.f32 %v6826_v9, %v6746_v49  ;;  %v3484_v24 = vadd.f32 %v3476_v15, %v6622_v8 }
 0x3d6   : > { %v3485_v31 = vadd.f32 %v3477_v21, %v6630_v45  ;;  %v7489_v61 = vsub.f32 1.0, %v6375_v28  ;;  %vm3276_vm0 = vweird.f32 %v6607_v47  ;;  %v3395_v53 = vmul.f32 %v6795_v39, %v3394_v14  ;;  %vm6922_vm4 = vmor %vm3382_vm13, %vm3383_vm15 }
 0x3d7   : > { %v3423_v57 = vmul.f32 %v6847_v54, %v6750_v51  ;;  %4474 = vrcp.f32 %v6844_v22  ;;  %v2991_v48 = vadd.f32 %v2956_v27, %v6593_v46  ;;  %vm3397_vm2 = vweird.f32 %v6722_v38  ;;  %3508 = vst [vmem:[%s6864_s14] sm:$0xff] %v3484_v24 }
 0x3d8   : > { %v3121_v0 = vmul.f32 %v6324_v20, %v7489_v61  ;;  %v3403_v8 = vand.u32 2147483648, %v6722_v38  ;;  %4476 = vtanh.f32 %v3484_v24  ;;  %vm3275_vm3 = vweird.f32 %v6508_v32  ;;  %3509 = vst [vmem:[%s6864_s14 + $0x8] sm:$0xff] %v3485_v31 }
 0x3d9   : > { %v2910_v60 = vpop.f32.mrf.mxu0  ;;  %v3370_v46 = vsel %vm6884_vm1, %v6700_v4, %v3366_v26  ;;  %v6897_v40 = vadd.f32 %v6732_v42, %v3380_v59  ;;  %v3401_v37 = vand.u32 2147483647, %v6722_v38  ;;  %v3418_v27 = vand.u32 2147483648, %v6746_v49  ;;  %vm6980_vm11 = vmor %vm3275_vm3, %vm3276_vm0 }
 0x3da   : > { %v2992_v45 = vadd.f32 %v2910_v60, %v6640_v44  ;;  %v2959_v34 = vpop.f32.mrf.mxu1  ;;  %v4473_v17 = vpop.eup %4472  ;;  %vm3398_vm14 = vweird.f32 %v6795_v39  ;;  %v3409_v36 = vsub.f32 1.0, %v3408_v25  ;;  %4478 = vtanh.f32 %v3485_v31 }
 0x3db   : > { %v2993_v44 = vadd.f32 %v2959_v34, %v6628_v7  ;;  %v6905_v62 = vadd.f32 %v6795_v39, %v3395_v53  ;;  %v3424_v50 = vsub.f32 1.0, %v3423_v57  ;;  %v3478_v4 = vmul.f32 %v4473_v17, %v6386_v43  ;;  %vm6939_vm8 = vmor %vm3397_vm2, %vm3398_vm14  ;;  %v7522_v43 = vld [vmem:[#allocation4_spill] sm:$0xff] }
 0x3dc   : > { %4480 = vtanh.f32 %v2991_v48  ;;  %v6911_v6 = vsel %vm6840_vm12, %v6800_v5, %v3370_v46  ;;  %v6913_v58 = vor.u32 1.1754944e-38, %v3403_v8  ;;  %v3416_v52 = vand.u32 2147483647, %v6746_v49 }
 0x3dd   : > { %4482 = vtanh.f32 %v2992_v45  ;;  %v6916_v14 = vpop.eup %4474  ;;  %v6926_v7 = vor.u32 1.1754944e-38, %v3418_v27  ;;  %v3433_v5 = vand.u32 2147483648, %v6750_v51  ;;  %v3486_v16 = vadd.f32 %v3478_v4, %v6657_v12  ;;  %v7507_v4 = vld [vmem:[#allocation2_spill] sm:$0xff]  ;;  %v3467_v45 = vld [vmem:[%s6559_s11 + $0x38] sm:$0xff] }
 0x3de   : > { %vm3265_vm5 = vcmp.eq.f32.partialorder %v3264_v55, 8.507059e+37  ;;  %v4477_v15 = vpop.eup %4476  ;;  %vm3291_vm6 = vweird.f32 %v6659_v11  ;;  %v3385_v21 = vsel %vm6922_vm4, %v6732_v42, %v6897_v40  ;;  %v3410_v12 = vmul.f32 %v6826_v9, %v3409_v36  ;;  %v7504_v36 = vld [vmem:[#allocation69_spill] sm:$0xff] }
 0x3df   : > { %v3268_v59 = vsel %vm3265_vm5, %v6589_v13, %v3263_v33  ;;  %4484 = vtanh.f32 %v2993_v44  ;;  %v3400_v55 = vsel %vm6939_vm8, %v6795_v39, %v6905_v62  ;;  %v6956_v25 = vmul.f32 %v6847_v54, %v3424_v50  ;;  %3510 = vst [vmem:[%s6864_s14 + $0x10] sm:$0xff] %v3486_v16  ;;  %v3465_v13 = vld [vmem:[%s6559_s11 + $0x28] sm:$0xff]  ;;  %v7505_v50 = vld [vmem:[#allocation26_spill] sm:$0xff] }
 0x3e0   : > { %v3500_v24 = vmul.f32 %v4477_v15, %v6820_v19  ;;  %4486 = vtanh.f32 %v3486_v16  ;;  %v4479_v61 = vpop.eup %4478  ;;  %vm3290_vm7 = vweird.f32 %v6574_v3  ;;  %vm3413_vm9 = vweird.f32 %v6826_v9 }
 0x3e1   : > { %v2912_v31 = vpop.f32.mrf.mxu0  ;;  %v3122_v53 = vadd.f32 %v6324_v20, %v3121_v0  ;;  %vm3124_vm10 = vweird.f32 %v6324_v20  ;;  %v3274_v57 = vadd.f32 %v6607_v47, %v6719_v41  ;;  %v6970_v48 = vmul.f32 %v6916_v14, %v6844_v22 }
 0x3e2   : > { %v2994_v33 = vadd.f32 %v2912_v31, %v6741_v1  ;;  %v4481_v19 = vpop.eup %4480  ;;  %3516 = vst [vmem:[%s6948_s17] sm:$0xff] %v3500_v24  ;;  %v3501_v60 = vmul.f32 %v4479_v61, %v6838_v56  ;;  %v3127_v28 = vand.u32 2147483647, %v6240_v23  ;;  %v3279_v1 = vand.u32 2147483647, %v6508_v32  ;;  %v2961_v8 = vpop.f32.mrf.mxu1  ;;  %v7513_v31 = vld [vmem:[#allocation43_spill] sm:$0xff] }
 0x3e3   : > { %v4483_v0 = vpop.eup %4482  ;;  %vm6986_vm12 = vcmp.eq.f32.partialorder %v3386_v29, 8.507059e+37  ;;  %v6991_v56 = vadd.f32 %v6826_v9, %v3410_v12  ;;  %vm3412_vm13 = vweird.f32 %v6746_v49  ;;  %v3479_v34 = vmul.f32 %v4481_v19, %v6400_v30 }
 0x3e4   : > { %vm3123_vm15 = vweird.f32 %v6240_v23  ;;  %v3129_v32 = vand.u32 2147483648, %v6240_v23  ;;  %3517 = vst [vmem:[%s6948_s17 + $0x8] sm:$0xff] %v3501_v60  ;;  %v3480_v46 = vmul.f32 %v4483_v0, %v6479_v18  ;;  %v3473_v27 = vmul.f32 %v3465_v13, %v3268_v59  ;;  %v3466_v13 = vld [vmem:[%s6559_s11 + $0x30] sm:$0xff] }
 0x3e5   : > { %vm7001_vm0 = vmor %vm3123_vm15, %vm3124_vm10  ;;  %v3278_v29 = vsel %vm6980_vm11, %v6607_v47, %v3274_v57  ;;  %4488 = vtanh.f32 %v2994_v33  ;;  %v4485_v30 = vpop.eup %4484  ;;  %vm7010_vm1 = vcmp.eq.f32.partialorder %v3401_v37, 8.507059e+37  ;;  %v3487_v18 = vadd.f32 %v3479_v34, %v6803_v2  ;;  %v7508_v37 = vld [vmem:[#allocation3_spill] sm:$0xff] }
 0x3e6   : > { %v3126_v17 = vsel %vm7001_vm0, %v6324_v20, %v3122_v53  ;;  %v2995_v44 = vadd.f32 %v2961_v8, %v7504_v36  ;;  %v7506_v47 = vsub.f32 1.0, %v7505_v50  ;;  %v4487_v15 = vpop.eup %4486  ;;  %v3488_v38 = vadd.f32 %v3480_v46, %v6851_v63  ;;  %vm7049_vm11 = vmor %vm3290_vm7, %vm3291_vm6 }
 0x3e7   : > { %v3481_v12 = vmul.f32 %v4485_v30, %v7508_v37  ;;  %vm7024_vm2 = vcmp.eq.f32.partialorder %v3127_v28, 8.507059e+37  ;;  %vm3280_vm3 = vcmp.eq.f32.partialorder %v3279_v1, 8.507059e+37  ;;  %vm7028_vm14 = vcmp.eq.f32.partialorder %v3416_v52, 8.507059e+37  ;;  %3511 = vst [vmem:[%s6864_s14 + $0x18] sm:$0xff] %v3487_v18  ;;  %v7514_v52 = vld [vmem:[#allocation17_spill] sm:$0xff]  ;;  %vm7080_vm7 = vmor %vm3412_vm13, %vm3413_vm9 }
 0x3e8   : > { %v3136_v16 = vmul.f32 %v7507_v4, %v7506_v47  ;;  %v3502_v59 = vmul.f32 %v4487_v15, %v6911_v6  ;;  %4490 = vtanh.f32 %v3487_v18  ;;  %v3130_v24 = vor.u32 1.1754944e-38, %v3129_v32  ;;  %3512 = vst [vmem:[%s6864_s14 + $0x20] sm:$0xff] %v3488_v38  ;;  %v7515_v6 = vld [vmem:[#allocation41_spill] sm:$0xff] }
 0x3e9   : > { %v3283_v61 = vsel %vm3280_vm3, %v7513_v31, %v3278_v29  ;;  %vm3427_vm5 = vweird.f32 %v6750_v51  ;;  %4492 = vtanh.f32 %v3488_v38  ;;  %v3489_v63 = vadd.f32 %v3481_v12, %v3473_v27 }
 0x3ea   : > { %v3137_v33 = vadd.f32 %v7507_v4, %v3136_v16  ;;  %vm3139_vm10 = vweird.f32 %v7507_v4  ;;  %3518 = vst [vmem:[%s6948_s17 + $0x10] sm:$0xff] %v3502_v59  ;;  %v3144_v53 = vand.u32 2147483648, %v7514_v52  ;;  %v3289_v57 = vadd.f32 %v6659_v11, %v7515_v6 }
 0x3eb   : > { %v3294_v19 = vand.u32 2147483647, %v6574_v3  ;;  %4494 = vtanh.f32 %v2995_v44  ;;  %v4489_v60 = vpop.eup %4488  ;;  %3513 = vst [vmem:[%s6864_s14 + $0x28] sm:$0xff] %v3489_v63  ;;  %v3131_v1 = vsel %vm7024_vm2, %v3130_v24, %v3126_v17  ;;  %vm3138_vm15 = vweird.f32 %v7514_v52 }
 0x3ec   : > { %4496 = vtanh.f32 %v3489_v63  ;;  %v3142_v8 = vand.u32 2147483647, %v7514_v52  ;;  %v3439_v0 = vsub.f32 1.0, %v6970_v48  ;;  %v3474_v41 = vmul.f32 %v3466_v13, %v3283_v61  ;;  %vm7061_vm6 = vmor %vm3138_vm15, %vm3139_vm10 }
 0x3ed   : > { %v3482_v34 = vmul.f32 %v4489_v60, %v3131_v1  ;;  %v3293_v32 = vsel %vm7049_vm11, %v6659_v11, %v3289_v57  ;;  %v3390_v48 = vsel %vm6986_vm12, %v6824_v35, %v3385_v21  ;;  %vm3428_vm0 = vweird.f32 %v6847_v54 }
 0x3ee   : > { %v3141_v11 = vsel %vm7061_vm6, %v7507_v4, %v3137_v33  ;;  %vm3295_vm2 = vcmp.eq.f32.partialorder %v3294_v19, 8.507059e+37  ;;  %v4491_v42 = vpop.eup %4490  ;;  %v3415_v35 = vsel %vm7080_vm7, %v6826_v9, %v6991_v56  ;;  %v3145_v49 = vor.u32 1.1754944e-38, %v3144_v53  ;;  %vm3429_vm8 = vmor %vm3427_vm5, %vm3428_vm0 }
 0x3ef   : > { %v3490_v40 = vadd.f32 %v3482_v34, %v3474_v41  ;;  %v3298_v21 = vsel %vm3295_vm2, %v7522_v43, %v3293_v32  ;;  %v4493_v27 = vpop.eup %4492  ;;  %v3405_v10 = vsel %vm7010_vm1, %v6913_v58, %v3400_v55  ;;  %v3426_v29 = vadd.f32 %v6847_v54, %v6956_v25 }
 0x3f0   : > { %v3503_v9 = vmul.f32 %v4491_v42, %v3390_v48  ;;  %vm3143_vm4 = vcmp.eq.f32.partialorder %v3142_v8, 8.507059e+37  ;;  %v3440_v30 = vmul.f32 %v6916_v14, %v3439_v0  ;;  %v3504_v18 = vmul.f32 %v4493_v27, %v3405_v10 }
 0x3f1   : > { %v4495_v56 = vpop.eup %4494  ;;  %4498 = vtanh.f32 %v3490_v40  ;;  %3514 = vst [vmem:[%s6864_s14 + $0x30] sm:$0xff] %v3490_v40  ;;  %v3146_v26 = vsel %vm3143_vm4, %v3145_v49, %v3141_v11  ;;  %v3420_v39 = vsel %vm7028_vm14, %v6926_v7, %v3415_v35  ;;  %v3431_v62 = vand.u32 2147483647, %v6750_v51 }
 0x3f2   : > { %v4497_v17 = vpop.eup %4496  ;;  %3519 = vst [vmem:[%s6948_s17 + $0x18] sm:$0xff] %v3503_v9  ;;  %v3475_v58 = vmul.f32 %v3467_v45, %v3298_v21  ;;  %v3483_v55 = vmul.f32 %v4495_v56, %v3146_v26  ;;  %v3430_v23 = vsel %vm3429_vm8, %v6847_v54, %v3426_v29  ;;  %v3434_v44 = vor.u32 1.1754944e-38, %v3433_v5 }
 0x3f3   : > { %3520 = vst [vmem:[%s6948_s17 + $0x20] sm:$0xff] %v3504_v18  ;;  %v3505_v25 = vmul.f32 %v4497_v17, %v3420_v39  ;;  %v3441_v7 = vadd.f32 %v6916_v14, %v3440_v30  ;;  %vm3443_vm9 = vweird.f32 %v6916_v14  ;;  %vm3432_vm12 = vcmp.eq.f32.partialorder %v3431_v62, 8.507059e+37 }
 0x3f4   : > { %v3491_v36 = vadd.f32 %v3483_v55, %v3475_v58  ;;  %v3448_v50 = vand.u32 2147483648, %v6844_v22  ;;  %v3435_v4 = vsel %vm3432_vm12, %v3434_v44, %v3430_v23  ;;  %vm3442_vm13 = vweird.f32 %v6844_v22 }
 0x3f5   : > { %3521 = vst [vmem:[%s6948_s17 + $0x28] sm:$0xff] %v3505_v25  ;;  %v3446_v54 = vand.u32 2147483647, %v6844_v22  ;;  %vm3444_vm1 = vmor %vm3442_vm13, %vm3443_vm9 }
 0x3f6   : > { %4500 = vtanh.f32 %v3491_v36  ;;  %3515 = vst [vmem:[%s6864_s14 + $0x38] sm:$0xff] %v3491_v36  ;;  %v3445_v5 = vsel %vm3444_vm1, %v6916_v14, %v3441_v7  ;;  %v3449_v16 = vor.u32 1.1754944e-38, %v3448_v50 }
 0x3f7   : > { %v4499_v47 = vpop.eup %4498  ;;  %vm3447_vm3 = vcmp.eq.f32.partialorder %v3446_v54, 8.507059e+37 }
 0x3f8   : > { %v3506_v51 = vmul.f32 %v4499_v47, %v3435_v4  ;;  %v3450_v38 = vsel %vm3447_vm3, %v3449_v16, %v3445_v5 }
 0x3fa   : > { %3522 = vst [vmem:[%s6948_s17 + $0x30] sm:$0xff] %v3506_v51 }
 0x3fc   : > { %v4501_v15 = vpop.eup %4500 }
 0x3fd   : > { %v3507_v37 = vmul.f32 %v4501_v15, %v3450_v38 }
 0x3ff   : > { %3523 = vst [vmem:[%s6948_s17 + $0x38] sm:$0xff] %v3507_v37 }
 0x400 PF: > { %s16_s18 = sadd.s32 1, %s4520_s18  }
 0x401   : > { %p13_p4 = scmp.ge.s32.totalorder %s16_s18, 4  }
 0x403   :  { %15 = sbr.rel (!%p13_p4) target bundleno = 1 (0x1), region = 89 }

</bundles_post_ra>
